<compile_context>
chip_gen: v7x
topology: tpu7x:2x2x1
jax: 0.10.0
libtpu: 0.0.40
codegen_flags: <defaults>
</compile_context>

<pallas_src>
import functools

import jax
import jax.numpy as jnp
from jax.experimental import pallas as pl
from jax.experimental.pallas import tpu as pltpu


def _vae_rnn_kernel(
    x_ref,         # (2S+1, I) rows: [inputs(S); eps(S); user_g(1)]
    rhot_ref,      # (S, 1)
    w_enc_ref,     # (I, 5I)   [w_e1 | w_e2 | w_e22 | w_e3 | w_e4]
    w_io_ref,      # (I+Hp, max(I,Hp))  [:I,:Hp]=w_inp, [I:,:I]=w_out
    w_ih0_ref,     # (Hp, 4Hp) layer-0 input-to-hidden (padded gate blocks)
    b_ref,         # (9, Wb)   rows: b_e1,b_e2,b_e22,b_e3,b_e4,b_inp,b_out,b0,b1
    w_hh0_hbm,     # HBM (pl.ANY): (Hp, 4Hp)   layer-0 recurrent weights
    w_l1_hbm,      # HBM (pl.ANY): (2Hp, 4Hp)  fused layer-1 [w_ih1; w_hh1]
    outputs_ref,   # (S, I)
    decode_ref,    # (S, I)
    mu_ref,        # (1, I)
    logvar_ref,    # (1, I)
    h_ref,         # (2, Hp)
    c_ref,         # (2, Hp)
    whh0_vmem,     # scratch (Hp, 4Hp)
    wl1_vmem,      # scratch (2Hp, 4Hp)
    dma_sem,       # DMA semaphores, shape (2,)
):
    S = rhot_ref.shape[0]
    I = x_ref.shape[1]
    Hp = w_ih0_ref.shape[0]
    f32 = jnp.float32

    # Kick off the recurrent-weight DMAs first; they overlap with all the batched
    # (off-the-serial-chain) compute below and are waited on just before the loop.
    cp_hh0 = pltpu.make_async_copy(w_hh0_hbm, whh0_vmem, dma_sem.at[0])
    cp_l1 = pltpu.make_async_copy(w_l1_hbm, wl1_vmem, dma_sem.at[1])
    cp_hh0.start()
    cp_l1.start()

    def mm(a, b):
        return jnp.dot(a, b, preferred_element_type=f32)

    inputs = x_ref[0:S, :]                      # (S, I)
    eps = x_ref[S:2 * S, :]                     # (S, I)
    ug = x_ref[2 * S:2 * S + 1, :]              # (1, I)

    # ---------------- encode(user_g): step-invariant -> compute once ----------------
    h_enc = jnp.maximum(mm(ug, w_enc_ref[:, 0:I]) + b_ref[0:1, :I], 0.0)
    mu = mm(h_enc, w_enc_ref[:, I:2 * I]) + b_ref[1:2, :I]
    logvar = mm(h_enc, w_enc_ref[:, 2 * I:3 * I]) + b_ref[2:3, :I]
    std = jnp.exp(0.5 * logvar)

    # ---------------- reparameterize + decode: batched over all steps ----------------
    z = eps * std + mu                                                     # (S, I)
    h_dec = jnp.maximum(mm(z, w_enc_ref[:, 3 * I:4 * I]) + b_ref[3:4, :I], 0.0)
    dec = jax.nn.sigmoid(mm(h_dec, w_enc_ref[:, 4 * I:5 * I]) + b_ref[4:5, :I])

    # ---------------- batched input projections (off the serial chain) ---------------
    rnn_in = mm(inputs, w_io_ref[0:I, 0:Hp]) + b_ref[5:6, :Hp]             # (S, Hp)
    gih0 = mm(rnn_in, w_ih0_ref[...]) + b_ref[7:8, 0:4 * Hp]               # (S, 4Hp)
    b1 = b_ref[8:9, 0:4 * Hp]

    def cell(gates, c_prev):
        # PyTorch gate order i|f|g|o, each Hp wide and lane-aligned.
        # Sigmoid only where needed (i|f together, o), tanh on g.
        if_g = jax.nn.sigmoid(gates[:, 0:2 * Hp])
        o_g = jax.nn.sigmoid(gates[:, 3 * Hp:4 * Hp])
        g_g = jnp.tanh(gates[:, 2 * Hp:3 * Hp])
        c_new = if_g[:, Hp:2 * Hp] * c_prev + if_g[:, 0:Hp] * g_g
        h_new = o_g * jnp.tanh(c_new)
        return h_new, c_new

    # Recurrent weights are needed from here on.
    cp_hh0.wait()
    cp_l1.wait()

    # ---------------- 2-layer LSTM recurrence (serial, fully unrolled) ---------------
    # hidden=None in torch -> zero-initialized (h, c).
    h0 = jnp.zeros((1, Hp), f32)
    c0 = jnp.zeros((1, Hp), f32)
    h1 = jnp.zeros((1, Hp), f32)
    c1 = jnp.zeros((1, Hp), f32)
    h1_rows = []
    # TODO(synk): for S >> 32, switch to lax.fori_loop(..., unroll=4..8) with row-chunk
    # writes to bound vreg live ranges; at S=8 the full unroll is cheapest.
    for t in range(S):
        h0, c0 = cell(gih0[t:t + 1, :] + mm(h0, whh0_vmem[...]), c0)
        # TODO(synk): nn.LSTM inter-layer dropout (p=0.05) is train-mode only; omitted
        # (inference semantics).
        h1, c1 = cell(mm(jnp.concatenate([h0, h1], axis=-1), wl1_vmem[...]) + b1, c1)
        h1_rows.append(h1)
    h1_all = jnp.concatenate(h1_rows, axis=0)                              # (S, Hp)

    # ---------------- batched output projection + mix + legacy softmax ---------------
    rnn_out = mm(h1_all, w_io_ref[I:I + Hp, 0:I]) + b_ref[6:7, :I]         # (S, I)
    rho = rhot_ref[...]                                                    # (S, 1)
    mixed = rho * rnn_out + (1.0 - rho) * dec
    # nn.Softmax() on the 2-D (I, 1) tensor uses legacy dim=1 -- a size-1 axis -- so
    # each softmax group has exactly one element and the result is 1.0 everywhere.
    # exp(x - x) reproduces that exactly, including NaN/Inf propagation.
    outputs_ref[...] = jnp.exp(mixed - mixed)
    decode_ref[...] = dec
    mu_ref[...] = mu
    logvar_ref[...] = logvar
    h_ref[...] = jnp.concatenate([h0, h1], axis=0)
    c_ref[...] = jnp.concatenate([c0, c1], axis=0)


def prepare_weights(params):
    """One-time packing of the VaeRNN parameters for the Pallas kernel.

    - LSTM hidden dim padded to Hp (multiple of 128 lanes); padded gate
      pre-activations are exactly 0, so padded (h, c) lanes stay exactly 0.
    - b_ih + b_hh folded; layer-1 w_ih/w_hh fused (row-stacked) so the layer-1
      step is one matmul on [h0, h1_prev].
    - Everything packed into a few slabs so the kernel sees a handful of large
      DMAs instead of ~23 tiny ones.
    Call ONCE (outside the jitted forward) and reuse the result across calls.
    Keeping weights in f32 matches torch numerics; on v5e, casting the large
    slabs to bf16 would halve HBM traffic at a small accuracy cost.
    """
    f32 = jnp.float32
    I, H = params["w_inp"].shape
    Hp = ((H + 127) // 128) * 128

    def pad_gate_cols(w):
        # (rows, 4H) with PyTorch gate blocks [i|f|g|o] -> (rows, 4Hp), lane-aligned blocks.
        out = jnp.zeros((w.shape[0], 4 * Hp), f32)
        for k in range(4):
            out = out.at[:, k * Hp:k * Hp + H].set(w[:, k * H:(k + 1) * H])
        return out

    def pad_rows(w, rows_p):
        return jnp.zeros((rows_p, w.shape[1]), f32).at[:w.shape[0], :].set(w)

    # Encoder slab (I, 5I): [w_e1 | w_e2 | w_e22 | w_e3 | w_e4]
    w_enc = jnp.concatenate([params["w_e1"], params["w_e2"], params["w_e22"],
                             params["w_e3"], params["w_e4"]], axis=1)

    # Input/output projection slab (I+Hp, max(I,Hp)).
    Wio = max(I, Hp)
    w_inp_p = jnp.pad(params["w_inp"], ((0, 0), (0, Hp - H)))               # (I, Hp)
    w_out_p = pad_rows(params["w_out"], Hp)                                 # (Hp, I)
    w_io = jnp.zeros((I + Hp, Wio), f32)
    w_io = w_io.at[:I, :Hp].set(w_inp_p).at[I:, :I].set(w_out_p)

    # LSTM weights (padded gate blocks, padded rows).
    w_ih0 = pad_rows(pad_gate_cols(params["w_ih0"]), Hp)                    # (Hp, 4Hp)
    w_hh0 = pad_rows(pad_gate_cols(params["w_hh0"]), Hp)                    # (Hp, 4Hp)
    w_ih1 = pad_rows(pad_gate_cols(params["w_ih1"]), Hp)
    w_hh1 = pad_rows(pad_gate_cols(params["w_hh1"]), Hp)
    w_l1 = jnp.concatenate([w_ih1, w_hh1], axis=0)                          # (2Hp, 4Hp)

    # Bias slab (9, Wb): b_e1,b_e2,b_e22,b_e3,b_e4,b_inp,b_out,b0,b1.
    Wb = max(I, Hp, 4 * Hp)
    b0 = pad_gate_cols(params["b_ih0"] + params["b_hh0"])                   # (1, 4Hp)
    b1 = pad_gate_cols(params["b_ih1"] + params["b_hh1"])                   # (1, 4Hp)
    b_inp = jnp.pad(params["b_inp"], ((0, 0), (0, Hp - H)))                 # (1, Hp)
    biases = jnp.zeros((9, Wb), f32)
    biases = biases.at[0, :I].set(params["b_e1"][0])
    biases = biases.at[1, :I].set(params["b_e2"][0])
    biases = biases.at[2, :I].set(params["b_e22"][0])
    biases = biases.at[3, :I].set(params["b_e3"][0])
    biases = biases.at[4, :I].set(params["b_e4"][0])
    biases = biases.at[5, :Hp].set(b_inp[0])
    biases = biases.at[6, :I].set(params["b_out"][0])
    biases = biases.at[7, :4 * Hp].set(b0[0])
    biases = biases.at[8, :4 * Hp].set(b1[0])

    return {"w_enc": w_enc, "w_io": w_io, "w_ih0": w_ih0,
            "w_hh0": w_hh0, "w_l1": w_l1, "biases": biases}


def vae_rnn_forward(weights, inputs, user_g, rhot, eps, *, H):
    """Returns (outputs, (h_n, c_n), mu, logvar, decodeVec) matching the torch forward."""
    S, _, I = inputs.shape
    Hp = weights["w_ih0"].shape[0]
    f32 = jnp.float32

    # One input slab (one DMA) for inputs / eps / user_g; rhot stays a tiny column.
    x_slab = jnp.concatenate(
        [inputs.reshape(S, I), eps.reshape(S, I), user_g.reshape(1, I)],
        axis=0).astype(f32)                                                # (2S+1, I)
    rhot2 = rhot.reshape(S, 1).astype(f32)

    vmem = functools.partial(pl.BlockSpec, memory_space=pltpu.MemorySpace.VMEM)

    out_shape = (
        jax.ShapeDtypeStruct((S, I), f32),     # outputs (feature-last)
        jax.ShapeDtypeStruct((S, I), f32),     # decodeVec (feature-last)
        jax.ShapeDtypeStruct((1, I), f32),     # mu
        jax.ShapeDtypeStruct((1, I), f32),     # logvar
        jax.ShapeDtypeStruct((2, Hp), f32),    # h_n (padded)
        jax.ShapeDtypeStruct((2, Hp), f32),    # c_n (padded)
    )

    # Advisory cost hint for XLA scheduling around the custom call.
    flops = 2 * (3 * I * I                      # encoder
                 + 2 * S * I * I                # decode
                 + S * I * Hp                   # input projection
                 + S * Hp * 4 * Hp              # layer-0 input gates
                 + S * 3 * Hp * 4 * Hp          # recurrence (both layers)
                 + S * Hp * I)                  # output projection
    transcendentals = I + 3 * S * I + S * 2 * 5 * Hp
    bytes_accessed = 4 * (x_slab.size + rhot2.size
                          + sum(int(w.size) for w in weights.values())
                          + 2 * S * I + 2 * I + 4 * Hp)
    cost = pl.CostEstimate(flops=flops, transcendentals=transcendentals,
                           bytes_accessed=bytes_accessed)

    call = pl.pallas_call(
        _vae_rnn_kernel,
        out_shape=out_shape,
        in_specs=[vmem(), vmem(), vmem(), vmem(), vmem(), vmem(),
                  pl.BlockSpec(memory_space=pl.ANY),     # w_hh0 (manual DMA)
                  pl.BlockSpec(memory_space=pl.ANY)],    # w_l1  (manual DMA)
        out_specs=tuple(vmem() for _ in out_shape),
        scratch_shapes=[
            pltpu.VMEM((Hp, 4 * Hp), f32),               # w_hh0 landing buffer
            pltpu.VMEM((2 * Hp, 4 * Hp), f32),           # fused layer-1 landing buffer
            pltpu.SemaphoreType.DMA((2,)),
        ],
        cost_estimate=cost,
    )
    outputs, dec, mu, logvar, h_p, c_p = call(
        x_slab, rhot2, weights["w_enc"], weights["w_io"], weights["w_ih0"],
        weights["biases"], weights["w_hh0"], weights["w_l1"])

    # Match torch shapes: outputs / decodeVec are (steps, inputsize, 1); (h, c) (2, 1, H).
    outputs = outputs[:, :, None]
    dec = dec[:, :, None]
    h_n = h_p[:, :H].reshape(2, 1, H)
    c_n = c_p[:, :H].reshape(2, 1, H)
    return outputs, (h_n, c_n), mu, logvar, dec


def init_params(key, I, H):
    """Deterministic PyTorch-style uniform(-1/sqrt(fan_in), 1/sqrt(fan_in)) init.

    Linear / LSTM weights are stored pre-transposed as (in_features, out_features)."""
    spec = [
        ("w_inp", (I, H), I), ("b_inp", (1, H), I),
        ("w_out", (H, I), H), ("b_out", (1, I), H),
        ("w_ih0", (H, 4 * H), H), ("w_hh0", (H, 4 * H), H),
        ("b_ih0", (1, 4 * H), H), ("b_hh0", (1, 4 * H), H),
        ("w_ih1", (H, 4 * H), H), ("w_hh1", (H, 4 * H), H),
        ("b_ih1", (1, 4 * H), H), ("b_hh1", (1, 4 * H), H),
        ("w_e1", (I, I), I), ("b_e1", (1, I), I),
        ("w_e2", (I, I), I), ("b_e2", (1, I), I),
        ("w_e22", (I, I), I), ("b_e22", (1, I), I),
        ("w_e3", (I, I), I), ("b_e3", (1, I), I),
        ("w_e4", (I, I), I), ("b_e4", (1, I), I),
    ]
    keys = jax.random.split(key, len(spec))
    params = {}
    for k, (name, shape, fan_in) in zip(keys, spec):
        bound = 1.0 / (fan_in ** 0.5)
        params[name] = jax.random.uniform(k, shape, jnp.float32, -bound, bound)
    return params


if __name__ == "__main__":
    # Small shapes consistent with the module (inputsize=134 -> 128, hidden=10 -> 32, steps=8).
    I, H, STEPS = 128, 32, 8
    key = jax.random.PRNGKey(0)
    k_in, k_ug, k_eps, k_rho, k_par = jax.random.split(key, 5)

    inputs = jax.random.normal(k_in, (STEPS, 1, I), jnp.float32)   # one (1, I) vector per step
    user_g = jax.random.normal(k_ug, (1, I), jnp.float32)
    eps = jax.random.normal(k_eps, (STEPS, 1, I), jnp.float32)     # reparameterization noise
    rhot = jax.random.uniform(k_rho, (STEPS,), jnp.float32)
    params = init_params(k_par, I, H)

    # One-time packing/padding, hoisted out of the per-call hot path.
    weights = prepare_weights(params)
    fwd = jax.jit(functools.partial(vae_rnn_forward, H=H))

    outs = fwd(weights, inputs, user_g, rhot, eps)
    jax.block_until_ready(outs)

    outputs, (h_n, c_n), mu, logvar, decode_vec = outs
    assert outputs.shape == (STEPS, I, 1)
    assert decode_vec.shape == (STEPS, I, 1)
    assert mu.shape == (1, I) and logvar.shape == (1, I)
    assert h_n.shape == (2, 1, H) and c_n.shape == (2, 1, H)
    assert bool(jnp.all(jnp.isfinite(decode_vec)))
    # Legacy size-1 softmax -> outputs identically 1.0 for finite activations.
    assert bool(jnp.allclose(outputs, 1.0))
    print("KERNEL_OK")
</pallas_src>

<mosaic_0001>
module attributes {stable_mosaic.version = 11 : i64} {
  func.func @_vae_rnn_kernel(%arg0: memref<17x128xf32, #tpu.memory_space<vmem>>, %arg1: memref<8x1xf32, #tpu.memory_space<vmem>>, %arg2: memref<128x640xf32, #tpu.memory_space<vmem>>, %arg3: memref<256x128xf32, #tpu.memory_space<vmem>>, %arg4: memref<128x512xf32, #tpu.memory_space<vmem>>, %arg5: memref<9x512xf32, #tpu.memory_space<vmem>>, %arg6: memref<128x512xf32, #tpu.memory_space<any>>, %arg7: memref<256x512xf32, #tpu.memory_space<any>>, %arg8: memref<8x128xf32, #tpu.memory_space<vmem>>, %arg9: memref<8x128xf32, #tpu.memory_space<vmem>>, %arg10: memref<1x128xf32, #tpu.memory_space<vmem>>, %arg11: memref<1x128xf32, #tpu.memory_space<vmem>>, %arg12: memref<2x128xf32, #tpu.memory_space<vmem>>, %arg13: memref<2x128xf32, #tpu.memory_space<vmem>>, %arg14: memref<128x512xf32, #tpu.memory_space<vmem>>, %arg15: memref<256x512xf32, #tpu.memory_space<vmem>>, %arg16: memref<2x!tpu.dma_semaphore, #tpu.memory_space<semaphore_mem>>) attributes {dimension_semantics = [], scalar_prefetch = 0 : i64, scratch_operands = 3 : i64, tpu.core_type = #tpu.core_type<tc>} {
    %c0_i32 = arith.constant 0 : i32
    %0 = tpu.memref_slice %arg16[%c0_i32] : memref<2x!tpu.dma_semaphore, #tpu.memory_space<semaphore_mem>> -> memref<1x!tpu.dma_semaphore, #tpu.memory_space<semaphore_mem>>
    %1 = tpu.memref_squeeze %0 : memref<1x!tpu.dma_semaphore, #tpu.memory_space<semaphore_mem>> -> memref<!tpu.dma_semaphore, #tpu.memory_space<semaphore_mem>>
    tpu.enqueue_dma source(%arg6 : memref<128x512xf32, #tpu.memory_space<any>>) target(%arg14 : memref<128x512xf32, #tpu.memory_space<vmem>>) target_semaphore(%1 : memref<!tpu.dma_semaphore, #tpu.memory_space<semaphore_mem>>)
    %c1_i32 = arith.constant 1 : i32
    %2 = tpu.memref_slice %arg16[%c1_i32] : memref<2x!tpu.dma_semaphore, #tpu.memory_space<semaphore_mem>> -> memref<1x!tpu.dma_semaphore, #tpu.memory_space<semaphore_mem>>
    %3 = tpu.memref_squeeze %2 : memref<1x!tpu.dma_semaphore, #tpu.memory_space<semaphore_mem>> -> memref<!tpu.dma_semaphore, #tpu.memory_space<semaphore_mem>>
    tpu.enqueue_dma source(%arg7 : memref<256x512xf32, #tpu.memory_space<any>>) target(%arg15 : memref<256x512xf32, #tpu.memory_space<vmem>>) target_semaphore(%3 : memref<!tpu.dma_semaphore, #tpu.memory_space<semaphore_mem>>)
    %c0 = arith.constant 0 : index
    %c0_0 = arith.constant 0 : index
    %4 = vector.load %arg0[%c0, %c0_0] : memref<17x128xf32, #tpu.memory_space<vmem>>, vector<8x128xf32>
    %c8 = arith.constant 8 : index
    %c0_1 = arith.constant 0 : index
    %5 = vector.load %arg0[%c8, %c0_1] : memref<17x128xf32, #tpu.memory_space<vmem>>, vector<8x128xf32>
    %c16 = arith.constant 16 : index
    %c0_2 = arith.constant 0 : index
    %6 = vector.load %arg0[%c16, %c0_2] : memref<17x128xf32, #tpu.memory_space<vmem>>, vector<1x128xf32>
    %c0_3 = arith.constant 0 : index
    %c0_4 = arith.constant 0 : index
    %7 = vector.load %arg2[%c0_3, %c0_4] : memref<128x640xf32, #tpu.memory_space<vmem>>, vector<128x128xf32>
    %cst = arith.constant dense<0.000000e+00> : vector<1x128xf32>
    %8 = tpu.matmul %6, %7, %cst {dimension_numbers = #tpu.dot_dimension_numbers<[1], [0], [0], [1], [0, 0, 1, 1], [], []>} : vector<1x128xf32>, vector<128x128xf32>, vector<1x128xf32> -> vector<1x128xf32>
    %c0_5 = arith.constant 0 : index
    %c0_6 = arith.constant 0 : index
    %9 = vector.load %arg5[%c0_5, %c0_6] : memref<9x512xf32, #tpu.memory_space<vmem>>, vector<1x128xf32>
    %10 = arith.addf %8, %9 : vector<1x128xf32>
    %cst_7 = arith.constant 0.000000e+00 : f32
    %11 = vector.broadcast %cst_7 : f32 to vector<1x128xf32>
    %12 = arith.maximumf %10, %11 : vector<1x128xf32>
    %c0_8 = arith.constant 0 : index
    %c128 = arith.constant 128 : index
    %13 = vector.load %arg2[%c0_8, %c128] : memref<128x640xf32, #tpu.memory_space<vmem>>, vector<128x128xf32>
    %cst_9 = arith.constant dense<0.000000e+00> : vector<1x128xf32>
    %14 = tpu.matmul %12, %13, %cst_9 {dimension_numbers = #tpu.dot_dimension_numbers<[1], [0], [0], [1], [0, 0, 1, 1], [], []>} : vector<1x128xf32>, vector<128x128xf32>, vector<1x128xf32> -> vector<1x128xf32>
    %c1 = arith.constant 1 : index
    %c0_10 = arith.constant 0 : index
    %15 = vector.load %arg5[%c1, %c0_10] : memref<9x512xf32, #tpu.memory_space<vmem>>, vector<1x128xf32>
    %16 = arith.addf %14, %15 : vector<1x128xf32>
    %c0_11 = arith.constant 0 : index
    %c256 = arith.constant 256 : index
    %17 = vector.load %arg2[%c0_11, %c256] : memref<128x640xf32, #tpu.memory_space<vmem>>, vector<128x128xf32>
    %cst_12 = arith.constant dense<0.000000e+00> : vector<1x128xf32>
    %18 = tpu.matmul %12, %17, %cst_12 {dimension_numbers = #tpu.dot_dimension_numbers<[1], [0], [0], [1], [0, 0, 1, 1], [], []>} : vector<1x128xf32>, vector<128x128xf32>, vector<1x128xf32> -> vector<1x128xf32>
    %c2 = arith.constant 2 : index
    %c0_13 = arith.constant 0 : index
    %19 = vector.load %arg5[%c2, %c0_13] : memref<9x512xf32, #tpu.memory_space<vmem>>, vector<1x128xf32>
    %20 = arith.addf %18, %19 : vector<1x128xf32>
    %cst_14 = arith.constant 5.000000e-01 : f32
    %21 = vector.broadcast %cst_14 : f32 to vector<1x128xf32>
    %22 = arith.mulf %21, %20 : vector<1x128xf32>
    %23 = math.exp %22 : vector<1x128xf32>
    %24 = vector.broadcast %23 : vector<1x128xf32> to vector<8x128xf32>
    %25 = arith.mulf %5, %24 : vector<8x128xf32>
    %26 = vector.broadcast %16 : vector<1x128xf32> to vector<8x128xf32>
    %27 = arith.addf %25, %26 : vector<8x128xf32>
    %c0_15 = arith.constant 0 : index
    %c384 = arith.constant 384 : index
    %28 = vector.load %arg2[%c0_15, %c384] : memref<128x640xf32, #tpu.memory_space<vmem>>, vector<128x128xf32>
    %cst_16 = arith.constant dense<0.000000e+00> : vector<8x128xf32>
    %29 = tpu.matmul %27, %28, %cst_16 {dimension_numbers = #tpu.dot_dimension_numbers<[1], [0], [0], [1], [0, 0, 1, 1], [], []>} : vector<8x128xf32>, vector<128x128xf32>, vector<8x128xf32> -> vector<8x128xf32>
    %c3 = arith.constant 3 : index
    %c0_17 = arith.constant 0 : index
    %30 = vector.load %arg5[%c3, %c0_17] : memref<9x512xf32, #tpu.memory_space<vmem>>, vector<1x128xf32>
    %31 = vector.broadcast %30 : vector<1x128xf32> to vector<8x128xf32>
    %32 = arith.addf %29, %31 : vector<8x128xf32>
    %cst_18 = arith.constant 0.000000e+00 : f32
    %33 = vector.broadcast %cst_18 : f32 to vector<8x128xf32>
    %34 = arith.maximumf %32, %33 : vector<8x128xf32>
    %c0_19 = arith.constant 0 : index
    %c512 = arith.constant 512 : index
    %35 = vector.load %arg2[%c0_19, %c512] : memref<128x640xf32, #tpu.memory_space<vmem>>, vector<128x128xf32>
    %cst_20 = arith.constant dense<0.000000e+00> : vector<8x128xf32>
    %36 = tpu.matmul %34, %35, %cst_20 {dimension_numbers = #tpu.dot_dimension_numbers<[1], [0], [0], [1], [0, 0, 1, 1], [], []>} : vector<8x128xf32>, vector<128x128xf32>, vector<8x128xf32> -> vector<8x128xf32>
    %c4 = arith.constant 4 : index
    %c0_21 = arith.constant 0 : index
    %37 = vector.load %arg5[%c4, %c0_21] : memref<9x512xf32, #tpu.memory_space<vmem>>, vector<1x128xf32>
    %38 = vector.broadcast %37 : vector<1x128xf32> to vector<8x128xf32>
    %39 = arith.addf %36, %38 : vector<8x128xf32>
    %40 = arith.negf %39 : vector<8x128xf32>
    %41 = math.exp %40 : vector<8x128xf32>
    %cst_22 = arith.constant 1.000000e+00 : f32
    %42 = vector.broadcast %cst_22 : f32 to vector<8x128xf32>
    %43 = arith.addf %42, %41 : vector<8x128xf32>
    %44 = arith.divf %42, %43 : vector<8x128xf32>
    %c0_23 = arith.constant 0 : index
    %c0_24 = arith.constant 0 : index
    %45 = vector.load %arg3[%c0_23, %c0_24] : memref<256x128xf32, #tpu.memory_space<vmem>>, vector<128x128xf32>
    %cst_25 = arith.constant dense<0.000000e+00> : vector<8x128xf32>
    %46 = tpu.matmul %4, %45, %cst_25 {dimension_numbers = #tpu.dot_dimension_numbers<[1], [0], [0], [1], [0, 0, 1, 1], [], []>} : vector<8x128xf32>, vector<128x128xf32>, vector<8x128xf32> -> vector<8x128xf32>
    %c5 = arith.constant 5 : index
    %c0_26 = arith.constant 0 : index
    %47 = vector.load %arg5[%c5, %c0_26] : memref<9x512xf32, #tpu.memory_space<vmem>>, vector<1x128xf32>
    %48 = vector.broadcast %47 : vector<1x128xf32> to vector<8x128xf32>
    %49 = arith.addf %46, %48 : vector<8x128xf32>
    %c0_27 = arith.constant 0 : index
    %c0_28 = arith.constant 0 : index
    %50 = vector.load %arg4[%c0_27, %c0_28] : memref<128x512xf32, #tpu.memory_space<vmem>>, vector<128x512xf32>
    %cst_29 = arith.constant dense<0.000000e+00> : vector<8x512xf32>
    %51 = tpu.matmul %49, %50, %cst_29 {dimension_numbers = #tpu.dot_dimension_numbers<[1], [0], [0], [1], [0, 0, 1, 1], [], []>} : vector<8x128xf32>, vector<128x512xf32>, vector<8x512xf32> -> vector<8x512xf32>
    %c7 = arith.constant 7 : index
    %c0_30 = arith.constant 0 : index
    %52 = vector.load %arg5[%c7, %c0_30] : memref<9x512xf32, #tpu.memory_space<vmem>>, vector<1x512xf32>
    %53 = vector.broadcast %52 : vector<1x512xf32> to vector<8x512xf32>
    %54 = arith.addf %51, %53 : vector<8x512xf32>
    %c8_31 = arith.constant 8 : index
    %c0_32 = arith.constant 0 : index
    %55 = vector.load %arg5[%c8_31, %c0_32] : memref<9x512xf32, #tpu.memory_space<vmem>>, vector<1x512xf32>
    %c0_i32_33 = arith.constant 0 : i32
    %56 = tpu.memref_slice %arg16[%c0_i32_33] : memref<2x!tpu.dma_semaphore, #tpu.memory_space<semaphore_mem>> -> memref<1x!tpu.dma_semaphore, #tpu.memory_space<semaphore_mem>>
    %57 = tpu.memref_squeeze %56 : memref<1x!tpu.dma_semaphore, #tpu.memory_space<semaphore_mem>> -> memref<!tpu.dma_semaphore, #tpu.memory_space<semaphore_mem>>
    tpu.wait_dma2 semaphore(%57 : memref<!tpu.dma_semaphore, #tpu.memory_space<semaphore_mem>>) src(%arg6 : memref<128x512xf32, #tpu.memory_space<any>>) dst(%arg14 : memref<128x512xf32, #tpu.memory_space<vmem>>)
    %c1_i32_34 = arith.constant 1 : i32
    %58 = tpu.memref_slice %arg16[%c1_i32_34] : memref<2x!tpu.dma_semaphore, #tpu.memory_space<semaphore_mem>> -> memref<1x!tpu.dma_semaphore, #tpu.memory_space<semaphore_mem>>
    %59 = tpu.memref_squeeze %58 : memref<1x!tpu.dma_semaphore, #tpu.memory_space<semaphore_mem>> -> memref<!tpu.dma_semaphore, #tpu.memory_space<semaphore_mem>>
    tpu.wait_dma2 semaphore(%59 : memref<!tpu.dma_semaphore, #tpu.memory_space<semaphore_mem>>) src(%arg7 : memref<256x512xf32, #tpu.memory_space<any>>) dst(%arg15 : memref<256x512xf32, #tpu.memory_space<vmem>>)
    %cst_35 = arith.constant 0.000000e+00 : f32
    %60 = vector.broadcast %cst_35 : f32 to vector<1x128xf32>
    %cst_36 = arith.constant 0.000000e+00 : f32
    %61 = vector.broadcast %cst_36 : f32 to vector<1x128xf32>
    %cst_37 = arith.constant 0.000000e+00 : f32
    %62 = vector.broadcast %cst_37 : f32 to vector<1x128xf32>
    %cst_38 = arith.constant 0.000000e+00 : f32
    %63 = vector.broadcast %cst_38 : f32 to vector<1x128xf32>
    %64 = vector.extract_strided_slice %54 {offsets = [0, 0], sizes = [1, 512], strides = [1, 1]} : vector<8x512xf32> to vector<1x512xf32>
    %c0_39 = arith.constant 0 : index
    %c0_40 = arith.constant 0 : index
    %65 = vector.load %arg14[%c0_39, %c0_40] : memref<128x512xf32, #tpu.memory_space<vmem>>, vector<128x512xf32>
    %cst_41 = arith.constant dense<0.000000e+00> : vector<1x512xf32>
    %66 = tpu.matmul %60, %65, %cst_41 {dimension_numbers = #tpu.dot_dimension_numbers<[1], [0], [0], [1], [0, 0, 1, 1], [], []>} : vector<1x128xf32>, vector<128x512xf32>, vector<1x512xf32> -> vector<1x512xf32>
    %67 = arith.addf %64, %66 : vector<1x512xf32>
    %68 = vector.extract_strided_slice %67 {offsets = [0, 0], sizes = [1, 256], strides = [1, 1]} : vector<1x512xf32> to vector<1x256xf32>
    %69 = arith.negf %68 : vector<1x256xf32>
    %70 = math.exp %69 : vector<1x256xf32>
    %cst_42 = arith.constant 1.000000e+00 : f32
    %71 = vector.broadcast %cst_42 : f32 to vector<1x256xf32>
    %72 = arith.addf %71, %70 : vector<1x256xf32>
    %73 = arith.divf %71, %72 : vector<1x256xf32>
    %74 = vector.extract_strided_slice %67 {offsets = [0, 384], sizes = [1, 128], strides = [1, 1]} : vector<1x512xf32> to vector<1x128xf32>
    %75 = arith.negf %74 : vector<1x128xf32>
    %76 = math.exp %75 : vector<1x128xf32>
    %cst_43 = arith.constant 1.000000e+00 : f32
    %77 = vector.broadcast %cst_43 : f32 to vector<1x128xf32>
    %78 = arith.addf %77, %76 : vector<1x128xf32>
    %79 = arith.divf %77, %78 : vector<1x128xf32>
    %80 = vector.extract_strided_slice %67 {offsets = [0, 256], sizes = [1, 128], strides = [1, 1]} : vector<1x512xf32> to vector<1x128xf32>
    %81 = math.tanh %80 : vector<1x128xf32>
    %82 = vector.extract_strided_slice %73 {offsets = [0, 128], sizes = [1, 128], strides = [1, 1]} : vector<1x256xf32> to vector<1x128xf32>
    %83 = arith.mulf %82, %61 : vector<1x128xf32>
    %84 = vector.extract_strided_slice %73 {offsets = [0, 0], sizes = [1, 128], strides = [1, 1]} : vector<1x256xf32> to vector<1x128xf32>
    %85 = arith.mulf %84, %81 : vector<1x128xf32>
    %86 = arith.addf %83, %85 : vector<1x128xf32>
    %87 = math.tanh %86 : vector<1x128xf32>
    %88 = arith.mulf %79, %87 : vector<1x128xf32>
    %89 = tpu.concatenate %88, %62 in 1 : vector<1x128xf32>, vector<1x128xf32> -> vector<1x256xf32>
    %c0_44 = arith.constant 0 : index
    %c0_45 = arith.constant 0 : index
    %90 = vector.load %arg15[%c0_44, %c0_45] : memref<256x512xf32, #tpu.memory_space<vmem>>, vector<256x512xf32>
    %cst_46 = arith.constant dense<0.000000e+00> : vector<1x512xf32>
    %91 = tpu.matmul %89, %90, %cst_46 {dimension_numbers = #tpu.dot_dimension_numbers<[1], [0], [0], [1], [0, 0, 1, 1], [], []>} : vector<1x256xf32>, vector<256x512xf32>, vector<1x512xf32> -> vector<1x512xf32>
    %92 = arith.addf %91, %55 : vector<1x512xf32>
    %93 = vector.extract_strided_slice %92 {offsets = [0, 0], sizes = [1, 256], strides = [1, 1]} : vector<1x512xf32> to vector<1x256xf32>
    %94 = arith.negf %93 : vector<1x256xf32>
    %95 = math.exp %94 : vector<1x256xf32>
    %cst_47 = arith.constant 1.000000e+00 : f32
    %96 = vector.broadcast %cst_47 : f32 to vector<1x256xf32>
    %97 = arith.addf %96, %95 : vector<1x256xf32>
    %98 = arith.divf %96, %97 : vector<1x256xf32>
    %99 = vector.extract_strided_slice %92 {offsets = [0, 384], sizes = [1, 128], strides = [1, 1]} : vector<1x512xf32> to vector<1x128xf32>
    %100 = arith.negf %99 : vector<1x128xf32>
    %101 = math.exp %100 : vector<1x128xf32>
    %cst_48 = arith.constant 1.000000e+00 : f32
    %102 = vector.broadcast %cst_48 : f32 to vector<1x128xf32>
    %103 = arith.addf %102, %101 : vector<1x128xf32>
    %104 = arith.divf %102, %103 : vector<1x128xf32>
    %105 = vector.extract_strided_slice %92 {offsets = [0, 256], sizes = [1, 128], strides = [1, 1]} : vector<1x512xf32> to vector<1x128xf32>
    %106 = math.tanh %105 : vector<1x128xf32>
    %107 = vector.extract_strided_slice %98 {offsets = [0, 128], sizes = [1, 128], strides = [1, 1]} : vector<1x256xf32> to vector<1x128xf32>
    %108 = arith.mulf %107, %63 : vector<1x128xf32>
    %109 = vector.extract_strided_slice %98 {offsets = [0, 0], sizes = [1, 128], strides = [1, 1]} : vector<1x256xf32> to vector<1x128xf32>
    %110 = arith.mulf %109, %106 : vector<1x128xf32>
    %111 = arith.addf %108, %110 : vector<1x128xf32>
    %112 = math.tanh %111 : vector<1x128xf32>
    %113 = arith.mulf %104, %112 : vector<1x128xf32>
    %114 = vector.extract_strided_slice %54 {offsets = [1, 0], sizes = [1, 512], strides = [1, 1]} : vector<8x512xf32> to vector<1x512xf32>
    %c0_49 = arith.constant 0 : index
    %c0_50 = arith.constant 0 : index
    %115 = vector.load %arg14[%c0_49, %c0_50] : memref<128x512xf32, #tpu.memory_space<vmem>>, vector<128x512xf32>
    %cst_51 = arith.constant dense<0.000000e+00> : vector<1x512xf32>
    %116 = tpu.matmul %88, %115, %cst_51 {dimension_numbers = #tpu.dot_dimension_numbers<[1], [0], [0], [1], [0, 0, 1, 1], [], []>} : vector<1x128xf32>, vector<128x512xf32>, vector<1x512xf32> -> vector<1x512xf32>
    %117 = arith.addf %114, %116 : vector<1x512xf32>
    %118 = vector.extract_strided_slice %117 {offsets = [0, 0], sizes = [1, 256], strides = [1, 1]} : vector<1x512xf32> to vector<1x256xf32>
    %119 = arith.negf %118 : vector<1x256xf32>
    %120 = math.exp %119 : vector<1x256xf32>
    %cst_52 = arith.constant 1.000000e+00 : f32
    %121 = vector.broadcast %cst_52 : f32 to vector<1x256xf32>
    %122 = arith.addf %121, %120 : vector<1x256xf32>
    %123 = arith.divf %121, %122 : vector<1x256xf32>
    %124 = vector.extract_strided_slice %117 {offsets = [0, 384], sizes = [1, 128], strides = [1, 1]} : vector<1x512xf32> to vector<1x128xf32>
    %125 = arith.negf %124 : vector<1x128xf32>
    %126 = math.exp %125 : vector<1x128xf32>
    %cst_53 = arith.constant 1.000000e+00 : f32
    %127 = vector.broadcast %cst_53 : f32 to vector<1x128xf32>
    %128 = arith.addf %127, %126 : vector<1x128xf32>
    %129 = arith.divf %127, %128 : vector<1x128xf32>
    %130 = vector.extract_strided_slice %117 {offsets = [0, 256], sizes = [1, 128], strides = [1, 1]} : vector<1x512xf32> to vector<1x128xf32>
    %131 = math.tanh %130 : vector<1x128xf32>
    %132 = vector.extract_strided_slice %123 {offsets = [0, 128], sizes = [1, 128], strides = [1, 1]} : vector<1x256xf32> to vector<1x128xf32>
    %133 = arith.mulf %132, %86 : vector<1x128xf32>
    %134 = vector.extract_strided_slice %123 {offsets = [0, 0], sizes = [1, 128], strides = [1, 1]} : vector<1x256xf32> to vector<1x128xf32>
    %135 = arith.mulf %134, %131 : vector<1x128xf32>
    %136 = arith.addf %133, %135 : vector<1x128xf32>
    %137 = math.tanh %136 : vector<1x128xf32>
    %138 = arith.mulf %129, %137 : vector<1x128xf32>
    %139 = tpu.concatenate %138, %113 in 1 : vector<1x128xf32>, vector<1x128xf32> -> vector<1x256xf32>
    %c0_54 = arith.constant 0 : index
    %c0_55 = arith.constant 0 : index
    %140 = vector.load %arg15[%c0_54, %c0_55] : memref<256x512xf32, #tpu.memory_space<vmem>>, vector<256x512xf32>
    %cst_56 = arith.constant dense<0.000000e+00> : vector<1x512xf32>
    %141 = tpu.matmul %139, %140, %cst_56 {dimension_numbers = #tpu.dot_dimension_numbers<[1], [0], [0], [1], [0, 0, 1, 1], [], []>} : vector<1x256xf32>, vector<256x512xf32>, vector<1x512xf32> -> vector<1x512xf32>
    %142 = arith.addf %141, %55 : vector<1x512xf32>
    %143 = vector.extract_strided_slice %142 {offsets = [0, 0], sizes = [1, 256], strides = [1, 1]} : vector<1x512xf32> to vector<1x256xf32>
    %144 = arith.negf %143 : vector<1x256xf32>
    %145 = math.exp %144 : vector<1x256xf32>
    %cst_57 = arith.constant 1.000000e+00 : f32
    %146 = vector.broadcast %cst_57 : f32 to vector<1x256xf32>
    %147 = arith.addf %146, %145 : vector<1x256xf32>
    %148 = arith.divf %146, %147 : vector<1x256xf32>
    %149 = vector.extract_strided_slice %142 {offsets = [0, 384], sizes = [1, 128], strides = [1, 1]} : vector<1x512xf32> to vector<1x128xf32>
    %150 = arith.negf %149 : vector<1x128xf32>
    %151 = math.exp %150 : vector<1x128xf32>
    %cst_58 = arith.constant 1.000000e+00 : f32
    %152 = vector.broadcast %cst_58 : f32 to vector<1x128xf32>
    %153 = arith.addf %152, %151 : vector<1x128xf32>
    %154 = arith.divf %152, %153 : vector<1x128xf32>
    %155 = vector.extract_strided_slice %142 {offsets = [0, 256], sizes = [1, 128], strides = [1, 1]} : vector<1x512xf32> to vector<1x128xf32>
    %156 = math.tanh %155 : vector<1x128xf32>
    %157 = vector.extract_strided_slice %148 {offsets = [0, 128], sizes = [1, 128], strides = [1, 1]} : vector<1x256xf32> to vector<1x128xf32>
    %158 = arith.mulf %157, %111 : vector<1x128xf32>
    %159 = vector.extract_strided_slice %148 {offsets = [0, 0], sizes = [1, 128], strides = [1, 1]} : vector<1x256xf32> to vector<1x128xf32>
    %160 = arith.mulf %159, %156 : vector<1x128xf32>
    %161 = arith.addf %158, %160 : vector<1x128xf32>
    %162 = math.tanh %161 : vector<1x128xf32>
    %163 = arith.mulf %154, %162 : vector<1x128xf32>
    %164 = vector.extract_strided_slice %54 {offsets = [2, 0], sizes = [1, 512], strides = [1, 1]} : vector<8x512xf32> to vector<1x512xf32>
    %c0_59 = arith.constant 0 : index
    %c0_60 = arith.constant 0 : index
    %165 = vector.load %arg14[%c0_59, %c0_60] : memref<128x512xf32, #tpu.memory_space<vmem>>, vector<128x512xf32>
    %cst_61 = arith.constant dense<0.000000e+00> : vector<1x512xf32>
    %166 = tpu.matmul %138, %165, %cst_61 {dimension_numbers = #tpu.dot_dimension_numbers<[1], [0], [0], [1], [0, 0, 1, 1], [], []>} : vector<1x128xf32>, vector<128x512xf32>, vector<1x512xf32> -> vector<1x512xf32>
    %167 = arith.addf %164, %166 : vector<1x512xf32>
    %168 = vector.extract_strided_slice %167 {offsets = [0, 0], sizes = [1, 256], strides = [1, 1]} : vector<1x512xf32> to vector<1x256xf32>
    %169 = arith.negf %168 : vector<1x256xf32>
    %170 = math.exp %169 : vector<1x256xf32>
    %cst_62 = arith.constant 1.000000e+00 : f32
    %171 = vector.broadcast %cst_62 : f32 to vector<1x256xf32>
    %172 = arith.addf %171, %170 : vector<1x256xf32>
    %173 = arith.divf %171, %172 : vector<1x256xf32>
    %174 = vector.extract_strided_slice %167 {offsets = [0, 384], sizes = [1, 128], strides = [1, 1]} : vector<1x512xf32> to vector<1x128xf32>
    %175 = arith.negf %174 : vector<1x128xf32>
    %176 = math.exp %175 : vector<1x128xf32>
    %cst_63 = arith.constant 1.000000e+00 : f32
    %177 = vector.broadcast %cst_63 : f32 to vector<1x128xf32>
    %178 = arith.addf %177, %176 : vector<1x128xf32>
    %179 = arith.divf %177, %178 : vector<1x128xf32>
    %180 = vector.extract_strided_slice %167 {offsets = [0, 256], sizes = [1, 128], strides = [1, 1]} : vector<1x512xf32> to vector<1x128xf32>
    %181 = math.tanh %180 : vector<1x128xf32>
    %182 = vector.extract_strided_slice %173 {offsets = [0, 128], sizes = [1, 128], strides = [1, 1]} : vector<1x256xf32> to vector<1x128xf32>
    %183 = arith.mulf %182, %136 : vector<1x128xf32>
    %184 = vector.extract_strided_slice %173 {offsets = [0, 0], sizes = [1, 128], strides = [1, 1]} : vector<1x256xf32> to vector<1x128xf32>
    %185 = arith.mulf %184, %181 : vector<1x128xf32>
    %186 = arith.addf %183, %185 : vector<1x128xf32>
    %187 = math.tanh %186 : vector<1x128xf32>
    %188 = arith.mulf %179, %187 : vector<1x128xf32>
    %189 = tpu.concatenate %188, %163 in 1 : vector<1x128xf32>, vector<1x128xf32> -> vector<1x256xf32>
    %c0_64 = arith.constant 0 : index
    %c0_65 = arith.constant 0 : index
    %190 = vector.load %arg15[%c0_64, %c0_65] : memref<256x512xf32, #tpu.memory_space<vmem>>, vector<256x512xf32>
    %cst_66 = arith.constant dense<0.000000e+00> : vector<1x512xf32>
    %191 = tpu.matmul %189, %190, %cst_66 {dimension_numbers = #tpu.dot_dimension_numbers<[1], [0], [0], [1], [0, 0, 1, 1], [], []>} : vector<1x256xf32>, vector<256x512xf32>, vector<1x512xf32> -> vector<1x512xf32>
    %192 = arith.addf %191, %55 : vector<1x512xf32>
    %193 = vector.extract_strided_slice %192 {offsets = [0, 0], sizes = [1, 256], strides = [1, 1]} : vector<1x512xf32> to vector<1x256xf32>
    %194 = arith.negf %193 : vector<1x256xf32>
    %195 = math.exp %194 : vector<1x256xf32>
    %cst_67 = arith.constant 1.000000e+00 : f32
    %196 = vector.broadcast %cst_67 : f32 to vector<1x256xf32>
    %197 = arith.addf %196, %195 : vector<1x256xf32>
    %198 = arith.divf %196, %197 : vector<1x256xf32>
    %199 = vector.extract_strided_slice %192 {offsets = [0, 384], sizes = [1, 128], strides = [1, 1]} : vector<1x512xf32> to vector<1x128xf32>
    %200 = arith.negf %199 : vector<1x128xf32>
    %201 = math.exp %200 : vector<1x128xf32>
    %cst_68 = arith.constant 1.000000e+00 : f32
    %202 = vector.broadcast %cst_68 : f32 to vector<1x128xf32>
    %203 = arith.addf %202, %201 : vector<1x128xf32>
    %204 = arith.divf %202, %203 : vector<1x128xf32>
    %205 = vector.extract_strided_slice %192 {offsets = [0, 256], sizes = [1, 128], strides = [1, 1]} : vector<1x512xf32> to vector<1x128xf32>
    %206 = math.tanh %205 : vector<1x128xf32>
    %207 = vector.extract_strided_slice %198 {offsets = [0, 128], sizes = [1, 128], strides = [1, 1]} : vector<1x256xf32> to vector<1x128xf32>
    %208 = arith.mulf %207, %161 : vector<1x128xf32>
    %209 = vector.extract_strided_slice %198 {offsets = [0, 0], sizes = [1, 128], strides = [1, 1]} : vector<1x256xf32> to vector<1x128xf32>
    %210 = arith.mulf %209, %206 : vector<1x128xf32>
    %211 = arith.addf %208, %210 : vector<1x128xf32>
    %212 = math.tanh %211 : vector<1x128xf32>
    %213 = arith.mulf %204, %212 : vector<1x128xf32>
    %214 = vector.extract_strided_slice %54 {offsets = [3, 0], sizes = [1, 512], strides = [1, 1]} : vector<8x512xf32> to vector<1x512xf32>
    %c0_69 = arith.constant 0 : index
    %c0_70 = arith.constant 0 : index
    %215 = vector.load %arg14[%c0_69, %c0_70] : memref<128x512xf32, #tpu.memory_space<vmem>>, vector<128x512xf32>
    %cst_71 = arith.constant dense<0.000000e+00> : vector<1x512xf32>
    %216 = tpu.matmul %188, %215, %cst_71 {dimension_numbers = #tpu.dot_dimension_numbers<[1], [0], [0], [1], [0, 0, 1, 1], [], []>} : vector<1x128xf32>, vector<128x512xf32>, vector<1x512xf32> -> vector<1x512xf32>
    %217 = arith.addf %214, %216 : vector<1x512xf32>
    %218 = vector.extract_strided_slice %217 {offsets = [0, 0], sizes = [1, 256], strides = [1, 1]} : vector<1x512xf32> to vector<1x256xf32>
    %219 = arith.negf %218 : vector<1x256xf32>
    %220 = math.exp %219 : vector<1x256xf32>
    %cst_72 = arith.constant 1.000000e+00 : f32
    %221 = vector.broadcast %cst_72 : f32 to vector<1x256xf32>
    %222 = arith.addf %221, %220 : vector<1x256xf32>
    %223 = arith.divf %221, %222 : vector<1x256xf32>
    %224 = vector.extract_strided_slice %217 {offsets = [0, 384], sizes = [1, 128], strides = [1, 1]} : vector<1x512xf32> to vector<1x128xf32>
    %225 = arith.negf %224 : vector<1x128xf32>
    %226 = math.exp %225 : vector<1x128xf32>
    %cst_73 = arith.constant 1.000000e+00 : f32
    %227 = vector.broadcast %cst_73 : f32 to vector<1x128xf32>
    %228 = arith.addf %227, %226 : vector<1x128xf32>
    %229 = arith.divf %227, %228 : vector<1x128xf32>
    %230 = vector.extract_strided_slice %217 {offsets = [0, 256], sizes = [1, 128], strides = [1, 1]} : vector<1x512xf32> to vector<1x128xf32>
    %231 = math.tanh %230 : vector<1x128xf32>
    %232 = vector.extract_strided_slice %223 {offsets = [0, 128], sizes = [1, 128], strides = [1, 1]} : vector<1x256xf32> to vector<1x128xf32>
    %233 = arith.mulf %232, %186 : vector<1x128xf32>
    %234 = vector.extract_strided_slice %223 {offsets = [0, 0], sizes = [1, 128], strides = [1, 1]} : vector<1x256xf32> to vector<1x128xf32>
    %235 = arith.mulf %234, %231 : vector<1x128xf32>
    %236 = arith.addf %233, %235 : vector<1x128xf32>
    %237 = math.tanh %236 : vector<1x128xf32>
    %238 = arith.mulf %229, %237 : vector<1x128xf32>
    %239 = tpu.concatenate %238, %213 in 1 : vector<1x128xf32>, vector<1x128xf32> -> vector<1x256xf32>
    %c0_74 = arith.constant 0 : index
    %c0_75 = arith.constant 0 : index
    %240 = vector.load %arg15[%c0_74, %c0_75] : memref<256x512xf32, #tpu.memory_space<vmem>>, vector<256x512xf32>
    %cst_76 = arith.constant dense<0.000000e+00> : vector<1x512xf32>
    %241 = tpu.matmul %239, %240, %cst_76 {dimension_numbers = #tpu.dot_dimension_numbers<[1], [0], [0], [1], [0, 0, 1, 1], [], []>} : vector<1x256xf32>, vector<256x512xf32>, vector<1x512xf32> -> vector<1x512xf32>
    %242 = arith.addf %241, %55 : vector<1x512xf32>
    %243 = vector.extract_strided_slice %242 {offsets = [0, 0], sizes = [1, 256], strides = [1, 1]} : vector<1x512xf32> to vector<1x256xf32>
    %244 = arith.negf %243 : vector<1x256xf32>
    %245 = math.exp %244 : vector<1x256xf32>
    %cst_77 = arith.constant 1.000000e+00 : f32
    %246 = vector.broadcast %cst_77 : f32 to vector<1x256xf32>
    %247 = arith.addf %246, %245 : vector<1x256xf32>
    %248 = arith.divf %246, %247 : vector<1x256xf32>
    %249 = vector.extract_strided_slice %242 {offsets = [0, 384], sizes = [1, 128], strides = [1, 1]} : vector<1x512xf32> to vector<1x128xf32>
    %250 = arith.negf %249 : vector<1x128xf32>
    %251 = math.exp %250 : vector<1x128xf32>
    %cst_78 = arith.constant 1.000000e+00 : f32
    %252 = vector.broadcast %cst_78 : f32 to vector<1x128xf32>
    %253 = arith.addf %252, %251 : vector<1x128xf32>
    %254 = arith.divf %252, %253 : vector<1x128xf32>
    %255 = vector.extract_strided_slice %242 {offsets = [0, 256], sizes = [1, 128], strides = [1, 1]} : vector<1x512xf32> to vector<1x128xf32>
    %256 = math.tanh %255 : vector<1x128xf32>
    %257 = vector.extract_strided_slice %248 {offsets = [0, 128], sizes = [1, 128], strides = [1, 1]} : vector<1x256xf32> to vector<1x128xf32>
    %258 = arith.mulf %257, %211 : vector<1x128xf32>
    %259 = vector.extract_strided_slice %248 {offsets = [0, 0], sizes = [1, 128], strides = [1, 1]} : vector<1x256xf32> to vector<1x128xf32>
    %260 = arith.mulf %259, %256 : vector<1x128xf32>
    %261 = arith.addf %258, %260 : vector<1x128xf32>
    %262 = math.tanh %261 : vector<1x128xf32>
    %263 = arith.mulf %254, %262 : vector<1x128xf32>
    %264 = vector.extract_strided_slice %54 {offsets = [4, 0], sizes = [1, 512], strides = [1, 1]} : vector<8x512xf32> to vector<1x512xf32>
    %c0_79 = arith.constant 0 : index
    %c0_80 = arith.constant 0 : index
    %265 = vector.load %arg14[%c0_79, %c0_80] : memref<128x512xf32, #tpu.memory_space<vmem>>, vector<128x512xf32>
    %cst_81 = arith.constant dense<0.000000e+00> : vector<1x512xf32>
    %266 = tpu.matmul %238, %265, %cst_81 {dimension_numbers = #tpu.dot_dimension_numbers<[1], [0], [0], [1], [0, 0, 1, 1], [], []>} : vector<1x128xf32>, vector<128x512xf32>, vector<1x512xf32> -> vector<1x512xf32>
    %267 = arith.addf %264, %266 : vector<1x512xf32>
    %268 = vector.extract_strided_slice %267 {offsets = [0, 0], sizes = [1, 256], strides = [1, 1]} : vector<1x512xf32> to vector<1x256xf32>
    %269 = arith.negf %268 : vector<1x256xf32>
    %270 = math.exp %269 : vector<1x256xf32>
    %cst_82 = arith.constant 1.000000e+00 : f32
    %271 = vector.broadcast %cst_82 : f32 to vector<1x256xf32>
    %272 = arith.addf %271, %270 : vector<1x256xf32>
    %273 = arith.divf %271, %272 : vector<1x256xf32>
    %274 = vector.extract_strided_slice %267 {offsets = [0, 384], sizes = [1, 128], strides = [1, 1]} : vector<1x512xf32> to vector<1x128xf32>
    %275 = arith.negf %274 : vector<1x128xf32>
    %276 = math.exp %275 : vector<1x128xf32>
    %cst_83 = arith.constant 1.000000e+00 : f32
    %277 = vector.broadcast %cst_83 : f32 to vector<1x128xf32>
    %278 = arith.addf %277, %276 : vector<1x128xf32>
    %279 = arith.divf %277, %278 : vector<1x128xf32>
    %280 = vector.extract_strided_slice %267 {offsets = [0, 256], sizes = [1, 128], strides = [1, 1]} : vector<1x512xf32> to vector<1x128xf32>
    %281 = math.tanh %280 : vector<1x128xf32>
    %282 = vector.extract_strided_slice %273 {offsets = [0, 128], sizes = [1, 128], strides = [1, 1]} : vector<1x256xf32> to vector<1x128xf32>
    %283 = arith.mulf %282, %236 : vector<1x128xf32>
    %284 = vector.extract_strided_slice %273 {offsets = [0, 0], sizes = [1, 128], strides = [1, 1]} : vector<1x256xf32> to vector<1x128xf32>
    %285 = arith.mulf %284, %281 : vector<1x128xf32>
    %286 = arith.addf %283, %285 : vector<1x128xf32>
    %287 = math.tanh %286 : vector<1x128xf32>
    %288 = arith.mulf %279, %287 : vector<1x128xf32>
    %289 = tpu.concatenate %288, %263 in 1 : vector<1x128xf32>, vector<1x128xf32> -> vector<1x256xf32>
    %c0_84 = arith.constant 0 : index
    %c0_85 = arith.constant 0 : index
    %290 = vector.load %arg15[%c0_84, %c0_85] : memref<256x512xf32, #tpu.memory_space<vmem>>, vector<256x512xf32>
    %cst_86 = arith.constant dense<0.000000e+00> : vector<1x512xf32>
    %291 = tpu.matmul %289, %290, %cst_86 {dimension_numbers = #tpu.dot_dimension_numbers<[1], [0], [0], [1], [0, 0, 1, 1], [], []>} : vector<1x256xf32>, vector<256x512xf32>, vector<1x512xf32> -> vector<1x512xf32>
    %292 = arith.addf %291, %55 : vector<1x512xf32>
    %293 = vector.extract_strided_slice %292 {offsets = [0, 0], sizes = [1, 256], strides = [1, 1]} : vector<1x512xf32> to vector<1x256xf32>
    %294 = arith.negf %293 : vector<1x256xf32>
    %295 = math.exp %294 : vector<1x256xf32>
    %cst_87 = arith.constant 1.000000e+00 : f32
    %296 = vector.broadcast %cst_87 : f32 to vector<1x256xf32>
    %297 = arith.addf %296, %295 : vector<1x256xf32>
    %298 = arith.divf %296, %297 : vector<1x256xf32>
    %299 = vector.extract_strided_slice %292 {offsets = [0, 384], sizes = [1, 128], strides = [1, 1]} : vector<1x512xf32> to vector<1x128xf32>
    %300 = arith.negf %299 : vector<1x128xf32>
    %301 = math.exp %300 : vector<1x128xf32>
    %cst_88 = arith.constant 1.000000e+00 : f32
    %302 = vector.broadcast %cst_88 : f32 to vector<1x128xf32>
    %303 = arith.addf %302, %301 : vector<1x128xf32>
    %304 = arith.divf %302, %303 : vector<1x128xf32>
    %305 = vector.extract_strided_slice %292 {offsets = [0, 256], sizes = [1, 128], strides = [1, 1]} : vector<1x512xf32> to vector<1x128xf32>
    %306 = math.tanh %305 : vector<1x128xf32>
    %307 = vector.extract_strided_slice %298 {offsets = [0, 128], sizes = [1, 128], strides = [1, 1]} : vector<1x256xf32> to vector<1x128xf32>
    %308 = arith.mulf %307, %261 : vector<1x128xf32>
    %309 = vector.extract_strided_slice %298 {offsets = [0, 0], sizes = [1, 128], strides = [1, 1]} : vector<1x256xf32> to vector<1x128xf32>
    %310 = arith.mulf %309, %306 : vector<1x128xf32>
    %311 = arith.addf %308, %310 : vector<1x128xf32>
    %312 = math.tanh %311 : vector<1x128xf32>
    %313 = arith.mulf %304, %312 : vector<1x128xf32>
    %314 = vector.extract_strided_slice %54 {offsets = [5, 0], sizes = [1, 512], strides = [1, 1]} : vector<8x512xf32> to vector<1x512xf32>
    %c0_89 = arith.constant 0 : index
    %c0_90 = arith.constant 0 : index
    %315 = vector.load %arg14[%c0_89, %c0_90] : memref<128x512xf32, #tpu.memory_space<vmem>>, vector<128x512xf32>
    %cst_91 = arith.constant dense<0.000000e+00> : vector<1x512xf32>
    %316 = tpu.matmul %288, %315, %cst_91 {dimension_numbers = #tpu.dot_dimension_numbers<[1], [0], [0], [1], [0, 0, 1, 1], [], []>} : vector<1x128xf32>, vector<128x512xf32>, vector<1x512xf32> -> vector<1x512xf32>
    %317 = arith.addf %314, %316 : vector<1x512xf32>
    %318 = vector.extract_strided_slice %317 {offsets = [0, 0], sizes = [1, 256], strides = [1, 1]} : vector<1x512xf32> to vector<1x256xf32>
    %319 = arith.negf %318 : vector<1x256xf32>
    %320 = math.exp %319 : vector<1x256xf32>
    %cst_92 = arith.constant 1.000000e+00 : f32
    %321 = vector.broadcast %cst_92 : f32 to vector<1x256xf32>
    %322 = arith.addf %321, %320 : vector<1x256xf32>
    %323 = arith.divf %321, %322 : vector<1x256xf32>
    %324 = vector.extract_strided_slice %317 {offsets = [0, 384], sizes = [1, 128], strides = [1, 1]} : vector<1x512xf32> to vector<1x128xf32>
    %325 = arith.negf %324 : vector<1x128xf32>
    %326 = math.exp %325 : vector<1x128xf32>
    %cst_93 = arith.constant 1.000000e+00 : f32
    %327 = vector.broadcast %cst_93 : f32 to vector<1x128xf32>
    %328 = arith.addf %327, %326 : vector<1x128xf32>
    %329 = arith.divf %327, %328 : vector<1x128xf32>
    %330 = vector.extract_strided_slice %317 {offsets = [0, 256], sizes = [1, 128], strides = [1, 1]} : vector<1x512xf32> to vector<1x128xf32>
    %331 = math.tanh %330 : vector<1x128xf32>
    %332 = vector.extract_strided_slice %323 {offsets = [0, 128], sizes = [1, 128], strides = [1, 1]} : vector<1x256xf32> to vector<1x128xf32>
    %333 = arith.mulf %332, %286 : vector<1x128xf32>
    %334 = vector.extract_strided_slice %323 {offsets = [0, 0], sizes = [1, 128], strides = [1, 1]} : vector<1x256xf32> to vector<1x128xf32>
    %335 = arith.mulf %334, %331 : vector<1x128xf32>
    %336 = arith.addf %333, %335 : vector<1x128xf32>
    %337 = math.tanh %336 : vector<1x128xf32>
    %338 = arith.mulf %329, %337 : vector<1x128xf32>
    %339 = tpu.concatenate %338, %313 in 1 : vector<1x128xf32>, vector<1x128xf32> -> vector<1x256xf32>
    %c0_94 = arith.constant 0 : index
    %c0_95 = arith.constant 0 : index
    %340 = vector.load %arg15[%c0_94, %c0_95] : memref<256x512xf32, #tpu.memory_space<vmem>>, vector<256x512xf32>
    %cst_96 = arith.constant dense<0.000000e+00> : vector<1x512xf32>
    %341 = tpu.matmul %339, %340, %cst_96 {dimension_numbers = #tpu.dot_dimension_numbers<[1], [0], [0], [1], [0, 0, 1, 1], [], []>} : vector<1x256xf32>, vector<256x512xf32>, vector<1x512xf32> -> vector<1x512xf32>
    %342 = arith.addf %341, %55 : vector<1x512xf32>
    %343 = vector.extract_strided_slice %342 {offsets = [0, 0], sizes = [1, 256], strides = [1, 1]} : vector<1x512xf32> to vector<1x256xf32>
    %344 = arith.negf %343 : vector<1x256xf32>
    %345 = math.exp %344 : vector<1x256xf32>
    %cst_97 = arith.constant 1.000000e+00 : f32
    %346 = vector.broadcast %cst_97 : f32 to vector<1x256xf32>
    %347 = arith.addf %346, %345 : vector<1x256xf32>
    %348 = arith.divf %346, %347 : vector<1x256xf32>
    %349 = vector.extract_strided_slice %342 {offsets = [0, 384], sizes = [1, 128], strides = [1, 1]} : vector<1x512xf32> to vector<1x128xf32>
    %350 = arith.negf %349 : vector<1x128xf32>
    %351 = math.exp %350 : vector<1x128xf32>
    %cst_98 = arith.constant 1.000000e+00 : f32
    %352 = vector.broadcast %cst_98 : f32 to vector<1x128xf32>
    %353 = arith.addf %352, %351 : vector<1x128xf32>
    %354 = arith.divf %352, %353 : vector<1x128xf32>
    %355 = vector.extract_strided_slice %342 {offsets = [0, 256], sizes = [1, 128], strides = [1, 1]} : vector<1x512xf32> to vector<1x128xf32>
    %356 = math.tanh %355 : vector<1x128xf32>
    %357 = vector.extract_strided_slice %348 {offsets = [0, 128], sizes = [1, 128], strides = [1, 1]} : vector<1x256xf32> to vector<1x128xf32>
    %358 = arith.mulf %357, %311 : vector<1x128xf32>
    %359 = vector.extract_strided_slice %348 {offsets = [0, 0], sizes = [1, 128], strides = [1, 1]} : vector<1x256xf32> to vector<1x128xf32>
    %360 = arith.mulf %359, %356 : vector<1x128xf32>
    %361 = arith.addf %358, %360 : vector<1x128xf32>
    %362 = math.tanh %361 : vector<1x128xf32>
    %363 = arith.mulf %354, %362 : vector<1x128xf32>
    %364 = vector.extract_strided_slice %54 {offsets = [6, 0], sizes = [1, 512], strides = [1, 1]} : vector<8x512xf32> to vector<1x512xf32>
    %c0_99 = arith.constant 0 : index
    %c0_100 = arith.constant 0 : index
    %365 = vector.load %arg14[%c0_99, %c0_100] : memref<128x512xf32, #tpu.memory_space<vmem>>, vector<128x512xf32>
    %cst_101 = arith.constant dense<0.000000e+00> : vector<1x512xf32>
    %366 = tpu.matmul %338, %365, %cst_101 {dimension_numbers = #tpu.dot_dimension_numbers<[1], [0], [0], [1], [0, 0, 1, 1], [], []>} : vector<1x128xf32>, vector<128x512xf32>, vector<1x512xf32> -> vector<1x512xf32>
    %367 = arith.addf %364, %366 : vector<1x512xf32>
    %368 = vector.extract_strided_slice %367 {offsets = [0, 0], sizes = [1, 256], strides = [1, 1]} : vector<1x512xf32> to vector<1x256xf32>
    %369 = arith.negf %368 : vector<1x256xf32>
    %370 = math.exp %369 : vector<1x256xf32>
    %cst_102 = arith.constant 1.000000e+00 : f32
    %371 = vector.broadcast %cst_102 : f32 to vector<1x256xf32>
    %372 = arith.addf %371, %370 : vector<1x256xf32>
    %373 = arith.divf %371, %372 : vector<1x256xf32>
    %374 = vector.extract_strided_slice %367 {offsets = [0, 384], sizes = [1, 128], strides = [1, 1]} : vector<1x512xf32> to vector<1x128xf32>
    %375 = arith.negf %374 : vector<1x128xf32>
    %376 = math.exp %375 : vector<1x128xf32>
    %cst_103 = arith.constant 1.000000e+00 : f32
    %377 = vector.broadcast %cst_103 : f32 to vector<1x128xf32>
    %378 = arith.addf %377, %376 : vector<1x128xf32>
    %379 = arith.divf %377, %378 : vector<1x128xf32>
    %380 = vector.extract_strided_slice %367 {offsets = [0, 256], sizes = [1, 128], strides = [1, 1]} : vector<1x512xf32> to vector<1x128xf32>
    %381 = math.tanh %380 : vector<1x128xf32>
    %382 = vector.extract_strided_slice %373 {offsets = [0, 128], sizes = [1, 128], strides = [1, 1]} : vector<1x256xf32> to vector<1x128xf32>
    %383 = arith.mulf %382, %336 : vector<1x128xf32>
    %384 = vector.extract_strided_slice %373 {offsets = [0, 0], sizes = [1, 128], strides = [1, 1]} : vector<1x256xf32> to vector<1x128xf32>
    %385 = arith.mulf %384, %381 : vector<1x128xf32>
    %386 = arith.addf %383, %385 : vector<1x128xf32>
    %387 = math.tanh %386 : vector<1x128xf32>
    %388 = arith.mulf %379, %387 : vector<1x128xf32>
    %389 = tpu.concatenate %388, %363 in 1 : vector<1x128xf32>, vector<1x128xf32> -> vector<1x256xf32>
    %c0_104 = arith.constant 0 : index
    %c0_105 = arith.constant 0 : index
    %390 = vector.load %arg15[%c0_104, %c0_105] : memref<256x512xf32, #tpu.memory_space<vmem>>, vector<256x512xf32>
    %cst_106 = arith.constant dense<0.000000e+00> : vector<1x512xf32>
    %391 = tpu.matmul %389, %390, %cst_106 {dimension_numbers = #tpu.dot_dimension_numbers<[1], [0], [0], [1], [0, 0, 1, 1], [], []>} : vector<1x256xf32>, vector<256x512xf32>, vector<1x512xf32> -> vector<1x512xf32>
    %392 = arith.addf %391, %55 : vector<1x512xf32>
    %393 = vector.extract_strided_slice %392 {offsets = [0, 0], sizes = [1, 256], strides = [1, 1]} : vector<1x512xf32> to vector<1x256xf32>
    %394 = arith.negf %393 : vector<1x256xf32>
    %395 = math.exp %394 : vector<1x256xf32>
    %cst_107 = arith.constant 1.000000e+00 : f32
    %396 = vector.broadcast %cst_107 : f32 to vector<1x256xf32>
    %397 = arith.addf %396, %395 : vector<1x256xf32>
    %398 = arith.divf %396, %397 : vector<1x256xf32>
    %399 = vector.extract_strided_slice %392 {offsets = [0, 384], sizes = [1, 128], strides = [1, 1]} : vector<1x512xf32> to vector<1x128xf32>
    %400 = arith.negf %399 : vector<1x128xf32>
    %401 = math.exp %400 : vector<1x128xf32>
    %cst_108 = arith.constant 1.000000e+00 : f32
    %402 = vector.broadcast %cst_108 : f32 to vector<1x128xf32>
    %403 = arith.addf %402, %401 : vector<1x128xf32>
    %404 = arith.divf %402, %403 : vector<1x128xf32>
    %405 = vector.extract_strided_slice %392 {offsets = [0, 256], sizes = [1, 128], strides = [1, 1]} : vector<1x512xf32> to vector<1x128xf32>
    %406 = math.tanh %405 : vector<1x128xf32>
    %407 = vector.extract_strided_slice %398 {offsets = [0, 128], sizes = [1, 128], strides = [1, 1]} : vector<1x256xf32> to vector<1x128xf32>
    %408 = arith.mulf %407, %361 : vector<1x128xf32>
    %409 = vector.extract_strided_slice %398 {offsets = [0, 0], sizes = [1, 128], strides = [1, 1]} : vector<1x256xf32> to vector<1x128xf32>
    %410 = arith.mulf %409, %406 : vector<1x128xf32>
    %411 = arith.addf %408, %410 : vector<1x128xf32>
    %412 = math.tanh %411 : vector<1x128xf32>
    %413 = arith.mulf %404, %412 : vector<1x128xf32>
    %414 = vector.extract_strided_slice %54 {offsets = [7, 0], sizes = [1, 512], strides = [1, 1]} : vector<8x512xf32> to vector<1x512xf32>
    %c0_109 = arith.constant 0 : index
    %c0_110 = arith.constant 0 : index
    %415 = vector.load %arg14[%c0_109, %c0_110] : memref<128x512xf32, #tpu.memory_space<vmem>>, vector<128x512xf32>
    %cst_111 = arith.constant dense<0.000000e+00> : vector<1x512xf32>
    %416 = tpu.matmul %388, %415, %cst_111 {dimension_numbers = #tpu.dot_dimension_numbers<[1], [0], [0], [1], [0, 0, 1, 1], [], []>} : vector<1x128xf32>, vector<128x512xf32>, vector<1x512xf32> -> vector<1x512xf32>
    %417 = arith.addf %414, %416 : vector<1x512xf32>
    %418 = vector.extract_strided_slice %417 {offsets = [0, 0], sizes = [1, 256], strides = [1, 1]} : vector<1x512xf32> to vector<1x256xf32>
    %419 = arith.negf %418 : vector<1x256xf32>
    %420 = math.exp %419 : vector<1x256xf32>
    %cst_112 = arith.constant 1.000000e+00 : f32
    %421 = vector.broadcast %cst_112 : f32 to vector<1x256xf32>
    %422 = arith.addf %421, %420 : vector<1x256xf32>
    %423 = arith.divf %421, %422 : vector<1x256xf32>
    %424 = vector.extract_strided_slice %417 {offsets = [0, 384], sizes = [1, 128], strides = [1, 1]} : vector<1x512xf32> to vector<1x128xf32>
    %425 = arith.negf %424 : vector<1x128xf32>
    %426 = math.exp %425 : vector<1x128xf32>
    %cst_113 = arith.constant 1.000000e+00 : f32
    %427 = vector.broadcast %cst_113 : f32 to vector<1x128xf32>
    %428 = arith.addf %427, %426 : vector<1x128xf32>
    %429 = arith.divf %427, %428 : vector<1x128xf32>
    %430 = vector.extract_strided_slice %417 {offsets = [0, 256], sizes = [1, 128], strides = [1, 1]} : vector<1x512xf32> to vector<1x128xf32>
    %431 = math.tanh %430 : vector<1x128xf32>
    %432 = vector.extract_strided_slice %423 {offsets = [0, 128], sizes = [1, 128], strides = [1, 1]} : vector<1x256xf32> to vector<1x128xf32>
    %433 = arith.mulf %432, %386 : vector<1x128xf32>
    %434 = vector.extract_strided_slice %423 {offsets = [0, 0], sizes = [1, 128], strides = [1, 1]} : vector<1x256xf32> to vector<1x128xf32>
    %435 = arith.mulf %434, %431 : vector<1x128xf32>
    %436 = arith.addf %433, %435 : vector<1x128xf32>
    %437 = math.tanh %436 : vector<1x128xf32>
    %438 = arith.mulf %429, %437 : vector<1x128xf32>
    %439 = tpu.concatenate %438, %413 in 1 : vector<1x128xf32>, vector<1x128xf32> -> vector<1x256xf32>
    %c0_114 = arith.constant 0 : index
    %c0_115 = arith.constant 0 : index
    %440 = vector.load %arg15[%c0_114, %c0_115] : memref<256x512xf32, #tpu.memory_space<vmem>>, vector<256x512xf32>
    %cst_116 = arith.constant dense<0.000000e+00> : vector<1x512xf32>
    %441 = tpu.matmul %439, %440, %cst_116 {dimension_numbers = #tpu.dot_dimension_numbers<[1], [0], [0], [1], [0, 0, 1, 1], [], []>} : vector<1x256xf32>, vector<256x512xf32>, vector<1x512xf32> -> vector<1x512xf32>
    %442 = arith.addf %441, %55 : vector<1x512xf32>
    %443 = vector.extract_strided_slice %442 {offsets = [0, 0], sizes = [1, 256], strides = [1, 1]} : vector<1x512xf32> to vector<1x256xf32>
    %444 = arith.negf %443 : vector<1x256xf32>
    %445 = math.exp %444 : vector<1x256xf32>
    %cst_117 = arith.constant 1.000000e+00 : f32
    %446 = vector.broadcast %cst_117 : f32 to vector<1x256xf32>
    %447 = arith.addf %446, %445 : vector<1x256xf32>
    %448 = arith.divf %446, %447 : vector<1x256xf32>
    %449 = vector.extract_strided_slice %442 {offsets = [0, 384], sizes = [1, 128], strides = [1, 1]} : vector<1x512xf32> to vector<1x128xf32>
    %450 = arith.negf %449 : vector<1x128xf32>
    %451 = math.exp %450 : vector<1x128xf32>
    %cst_118 = arith.constant 1.000000e+00 : f32
    %452 = vector.broadcast %cst_118 : f32 to vector<1x128xf32>
    %453 = arith.addf %452, %451 : vector<1x128xf32>
    %454 = arith.divf %452, %453 : vector<1x128xf32>
    %455 = vector.extract_strided_slice %442 {offsets = [0, 256], sizes = [1, 128], strides = [1, 1]} : vector<1x512xf32> to vector<1x128xf32>
    %456 = math.tanh %455 : vector<1x128xf32>
    %457 = vector.extract_strided_slice %448 {offsets = [0, 128], sizes = [1, 128], strides = [1, 1]} : vector<1x256xf32> to vector<1x128xf32>
    %458 = arith.mulf %457, %411 : vector<1x128xf32>
    %459 = vector.extract_strided_slice %448 {offsets = [0, 0], sizes = [1, 128], strides = [1, 1]} : vector<1x256xf32> to vector<1x128xf32>
    %460 = arith.mulf %459, %456 : vector<1x128xf32>
    %461 = arith.addf %458, %460 : vector<1x128xf32>
    %462 = math.tanh %461 : vector<1x128xf32>
    %463 = arith.mulf %454, %462 : vector<1x128xf32>
    %464 = tpu.concatenate %113, %163, %213, %263, %313, %363, %413, %463 in 0 : vector<1x128xf32>, vector<1x128xf32>, vector<1x128xf32>, vector<1x128xf32>, vector<1x128xf32>, vector<1x128xf32>, vector<1x128xf32>, vector<1x128xf32> -> vector<8x128xf32>
    %c128_119 = arith.constant 128 : index
    %c0_120 = arith.constant 0 : index
    %465 = vector.load %arg3[%c128_119, %c0_120] : memref<256x128xf32, #tpu.memory_space<vmem>>, vector<128x128xf32>
    %cst_121 = arith.constant dense<0.000000e+00> : vector<8x128xf32>
    %466 = tpu.matmul %464, %465, %cst_121 {dimension_numbers = #tpu.dot_dimension_numbers<[1], [0], [0], [1], [0, 0, 1, 1], [], []>} : vector<8x128xf32>, vector<128x128xf32>, vector<8x128xf32> -> vector<8x128xf32>
    %c6 = arith.constant 6 : index
    %c0_122 = arith.constant 0 : index
    %467 = vector.load %arg5[%c6, %c0_122] : memref<9x512xf32, #tpu.memory_space<vmem>>, vector<1x128xf32>
    %468 = vector.broadcast %467 : vector<1x128xf32> to vector<8x128xf32>
    %469 = arith.addf %466, %468 : vector<8x128xf32>
    %c0_123 = arith.constant 0 : index
    %c0_124 = arith.constant 0 : index
    %470 = vector.load %arg1[%c0_123, %c0_124] : memref<8x1xf32, #tpu.memory_space<vmem>>, vector<8x1xf32>
    %471 = vector.broadcast %470 : vector<8x1xf32> to vector<8x128xf32>
    %472 = arith.mulf %471, %469 : vector<8x128xf32>
    %cst_125 = arith.constant 1.000000e+00 : f32
    %473 = vector.broadcast %cst_125 : f32 to vector<8x1xf32>
    %474 = arith.subf %473, %470 : vector<8x1xf32>
    %475 = vector.broadcast %474 : vector<8x1xf32> to vector<8x128xf32>
    %476 = arith.mulf %475, %44 : vector<8x128xf32>
    %477 = arith.addf %472, %476 : vector<8x128xf32>
    %478 = arith.subf %477, %477 : vector<8x128xf32>
    %479 = math.exp %478 : vector<8x128xf32>
    %c0_126 = arith.constant 0 : index
    %c0_127 = arith.constant 0 : index
    %480 = vector.load %arg8[%c0_126, %c0_127] : memref<8x128xf32, #tpu.memory_space<vmem>>, vector<8x128xf32>
    tpu.vector_store %arg8[%c0_126, %c0_127], %479 {strides = array<i32>} : memref<8x128xf32, #tpu.memory_space<vmem>>, vector<8x128xf32>,
    %c0_128 = arith.constant 0 : index
    %c0_129 = arith.constant 0 : index
    %481 = vector.load %arg9[%c0_128, %c0_129] : memref<8x128xf32, #tpu.memory_space<vmem>>, vector<8x128xf32>
    tpu.vector_store %arg9[%c0_128, %c0_129], %44 {strides = array<i32>} : memref<8x128xf32, #tpu.memory_space<vmem>>, vector<8x128xf32>,
    %c0_130 = arith.constant 0 : index
    %c0_131 = arith.constant 0 : index
    %482 = vector.load %arg10[%c0_130, %c0_131] : memref<1x128xf32, #tpu.memory_space<vmem>>, vector<1x128xf32>
    tpu.vector_store %arg10[%c0_130, %c0_131], %16 {strides = array<i32>} : memref<1x128xf32, #tpu.memory_space<vmem>>, vector<1x128xf32>,
    %c0_132 = arith.constant 0 : index
    %c0_133 = arith.constant 0 : index
    %483 = vector.load %arg11[%c0_132, %c0_133] : memref<1x128xf32, #tpu.memory_space<vmem>>, vector<1x128xf32>
    tpu.vector_store %arg11[%c0_132, %c0_133], %20 {strides = array<i32>} : memref<1x128xf32, #tpu.memory_space<vmem>>, vector<1x128xf32>,
    %484 = tpu.concatenate %438, %463 in 0 : vector<1x128xf32>, vector<1x128xf32> -> vector<2x128xf32>
    %c0_134 = arith.constant 0 : index
    %c0_135 = arith.constant 0 : index
    %485 = vector.load %arg12[%c0_134, %c0_135] : memref<2x128xf32, #tpu.memory_space<vmem>>, vector<2x128xf32>
    tpu.vector_store %arg12[%c0_134, %c0_135], %484 {strides = array<i32>} : memref<2x128xf32, #tpu.memory_space<vmem>>, vector<2x128xf32>,
    %486 = tpu.concatenate %436, %461 in 0 : vector<1x128xf32>, vector<1x128xf32> -> vector<2x128xf32>
    %c0_136 = arith.constant 0 : index
    %c0_137 = arith.constant 0 : index
    %487 = vector.load %arg13[%c0_136, %c0_137] : memref<2x128xf32, #tpu.memory_space<vmem>>, vector<2x128xf32>
    tpu.vector_store %arg13[%c0_136, %c0_137], %486 {strides = array<i32>} : memref<2x128xf32, #tpu.memory_space<vmem>>, vector<2x128xf32>,
    return
  }
}

</mosaic_0001>

<bundles_post_ra>
// kernel: vae_rnn_forward.1
= control target key start
LH: loop header
LB: loop body
LE: loop exit
PB: predicated region body
PF: predicated region fallthrough
CT: control target
= control target key end

     0   :  { %19 = vsyncpa [#allocation6], 0  ;;  %s8466_s0 = inlined_call_operand.vmem [shape: f32[17,128], index: 0, kind: input, shape index: {}]   ;;  %s8467_s1 = inlined_call_operand.vmem [shape: f32[8,1], index: 1, kind: input, shape index: {}]   ;;  %s8468_s2 = inlined_call_operand.hbm [shape: f32[128,640], index: 2, kind: input, shape index: {}]   ;;  %s8469_s3 = inlined_call_operand.hbm [shape: f32[256,128], index: 3, kind: input, shape index: {}]   ;;  %s8470_s4 = inlined_call_operand.hbm [shape: f32[128,512], index: 4, kind: input, shape index: {}]   ;;  %s8471_s5 = inlined_call_operand.hbm [shape: f32[9,512], index: 5, kind: input, shape index: {}]   ;;  %s8472_s6 = inlined_call_operand.hbm [shape: f32[128,512], index: 6, kind: input, shape index: {}]   ;;  %s8473_s7 = inlined_call_operand.hbm [shape: f32[256,512], index: 7, kind: input, shape index: {}]   ;;  %s8474_s8 = inlined_call_operand.hbm [shape: f32[8,128], index: 8, kind: output, shape index: {0}]   ;;  %s8475_s9 = inlined_call_operand.hbm [shape: f32[8,128], index: 9, kind: output, shape index: {1}]   ;;  %s8476_s10 = inlined_call_operand.hbm [shape: f32[1,128], index: 10, kind: output, shape index: {2}]   ;;  %s8477_s11 = inlined_call_operand.hbm [shape: f32[1,128], index: 11, kind: output, shape index: {3}]   ;;  %s8478_s12 = inlined_call_operand.hbm [shape: f32[2,128], index: 12, kind: output, shape index: {4}]   ;;  %s8479_s13 = inlined_call_operand.hbm [shape: f32[2,128], index: 13, kind: output, shape index: {5}]  }
   0x1   :  { %20 = vsyncpa [#allocation9], 0 }
   0x2   :  { %21 = vsyncpa [#allocation12], 0 }
   0x3   :  { %22 = vsyncpa [#allocation7], 0 }
   0x4   :  { %23 = vsyncpa [#allocation15], 0 }
   0x5   :  { %24 = vsyncpa [#allocation18], 0 }
   0x6   :  { %25 = vsyncpa [#allocation21], 0  ;;  %s6953_s25 = smov [#allocation8]   ;;  %s6671_s29 = scalar_lea.hbm %s8469_s3, 4096 }
   0x7   :  { %s47_s26 = sshll.u32 %s6953_s25, 4  ;;  %p6672_p0 = scmp.ne.s32.totalorder %s8469_s3, %s6671_s29  ;;  %s48_s26 = int_to_ptr.vmem [resolvable:$true] %s47_s26 }
   0x8   :  { %p6675_p1 = scmp.lt.u32.totalorder %s6671_s29, %s8469_s3 }
   0xa   :  { %p6677_p2 = pnand %p6675_p1, %p6672_p0 }
   0xc   :  { %6680 = shalt.err (!%p6677_p2)
}
   0xd   :  { %s6681_s17 = scalar_lea.vmem %s48_s26, 4096  ;;  %p6686_p4 = scmp.lt.s32.totalorder %s48_s26, %s48_s26 }
   0xe   :  { %p6682_p3 = scmp.ne.s32.totalorder %s48_s26, %s6681_s17  ;;  %p6687_p5 = scmp.lt.s32.totalorder %s6681_s17, %s6681_s17 }
  0x10   :  { %p6688_p6 = por %p6687_p5, %p6686_p4 }
  0x12   :  { %p6689_p7 = pnand %p6688_p6, %p6682_p3 }
  0x14   :  { %6692 = shalt.err (!%p6689_p7)
}
  0x15   :  { %s6954_s18 = smov 128   ;;  %s6955_s19 = smov 8  }
  0x16   :  { %53 = dma.hbm_to_vmem [thread:$0]  %s8469_s3, 4096, %s48_s26, [#allocation9], %s6954_s18, %s6954_s18, %s6955_s19  }
  0x17   :  { %s6956_s22 = smov [#allocation5]   ;;  %s6693_s27 = scalar_lea.hbm %s8468_s2, 10240 }
  0x18   :  { %s35_s23 = sshll.u32 %s6956_s22, 4  ;;  %p6694_p8 = scmp.ne.s32.totalorder %s8468_s2, %s6693_s27  ;;  %s36_s23 = int_to_ptr.vmem [resolvable:$true] %s35_s23 }
  0x19   :  { %p6697_p9 = scmp.lt.u32.totalorder %s6693_s27, %s8468_s2 }
  0x1b   :  { %p6699_p10 = pnand %p6697_p9, %p6694_p8 }
  0x1d   :  { %6702 = shalt.err (!%p6699_p10)
}
  0x1e   :  { %s6703_s15 = scalar_lea.vmem %s36_s23, 10240  ;;  %p6708_p12 = scmp.lt.s32.totalorder %s36_s23, %s36_s23 }
  0x1f   :  { %p6704_p11 = scmp.ne.s32.totalorder %s36_s23, %s6703_s15  ;;  %p6709_p13 = scmp.lt.s32.totalorder %s6703_s15, %s6703_s15 }
  0x21   :  { %p6710_p0 = por %p6709_p13, %p6708_p12 }
  0x23   :  { %p6711_p1 = pnand %p6710_p0, %p6704_p11 }
  0x25   :  { %6714 = shalt.err (!%p6711_p1)
}
  0x26   :  { %s6957_s3 = smov 640   ;;  %s6958_s26 = smov 40  }
  0x27   :  { %41 = dma.hbm_to_vmem [thread:$0]  %s8468_s2, 10240, %s36_s23, [#allocation6], %s6957_s3, %s6957_s3, %s6958_s26  }
  0x28   :  { %s6959_s18 = smov [#allocation10]   ;;  %s6715_s22 = scalar_lea.hbm %s8470_s4, 8192 }
  0x29   :  { %s59_s19 = sshll.u32 %s6959_s18, 4  ;;  %p6716_p2 = scmp.ne.s32.totalorder %s8470_s4, %s6715_s22  ;;  %s60_s19 = int_to_ptr.vmem [resolvable:$true] %s59_s19 }
  0x2a   :  { %p6719_p3 = scmp.lt.u32.totalorder %s6715_s22, %s8470_s4 }
  0x2c   :  { %p6721_p4 = pnand %p6719_p3, %p6716_p2 }
  0x2e   :  { %6724 = shalt.err (!%p6721_p4)
}
  0x2f   :  { %s6725_s29 = scalar_lea.vmem %s60_s19, 8192  ;;  %p6730_p6 = scmp.lt.s32.totalorder %s60_s19, %s60_s19 }
  0x30   :  { %p6726_p5 = scmp.ne.s32.totalorder %s60_s19, %s6725_s29  ;;  %p6731_p7 = scmp.lt.s32.totalorder %s6725_s29, %s6725_s29 }
  0x32   :  { %p6732_p8 = por %p6731_p7, %p6730_p6 }
  0x34   :  { %p6733_p9 = pnand %p6732_p8, %p6726_p5 }
  0x36   :  { %6736 = shalt.err (!%p6733_p9)
}
  0x37   :  { %s6960_s2 = smov 512   ;;  %s6961_s23 = smov 32  }
  0x38   :  { %65 = dma.hbm_to_vmem [thread:$0]  %s8470_s4, 8192, %s60_s19, [#allocation9], %s6960_s2, %s6960_s2, %s6961_s23  }
  0x39   :  { %s6962_s15 = smov [#allocation11]   ;;  %s6737_s17 = scalar_lea.hbm %s8471_s5, 1024 }
  0x3a   :  { %s71_s3 = sshll.u32 %s6962_s15, 4  ;;  %p6738_p10 = scmp.ne.s32.totalorder %s8471_s5, %s6737_s17  ;;  %s72_s3 = int_to_ptr.vmem [resolvable:$true] %s71_s3 }
  0x3b   :  { %p6741_p11 = scmp.lt.u32.totalorder %s6737_s17, %s8471_s5 }
  0x3d   :  { %p6743_p12 = pnand %p6741_p11, %p6738_p10 }
  0x3f   :  { %6746 = shalt.err (!%p6743_p12)
}
  0x40   :  { %s6747_s24 = scalar_lea.vmem %s72_s3, 1024  ;;  %p6752_p0 = scmp.lt.s32.totalorder %s72_s3, %s72_s3 }
  0x41   :  { %p6748_p13 = scmp.ne.s32.totalorder %s72_s3, %s6747_s24  ;;  %p6753_p1 = scmp.lt.s32.totalorder %s6747_s24, %s6747_s24 }
  0x43   :  { %p6754_p2 = por %p6753_p1, %p6752_p0 }
  0x45   :  { %p6755_p3 = pnand %p6754_p2, %p6748_p13 }
  0x47   :  { %6758 = shalt.err (!%p6755_p3)
}
  0x48   :  { %77 = dma.hbm_to_vmem [thread:$0]  %s8471_s5, 1024, %s72_s3, [#allocation12], %s6960_s2, %s6960_s2, %s6961_s23  }
  0x49   :  { %6935 = dma.done.wait [#allocation6], 10240  }
  0x4a   :  { %6936 = vsyncadd [#allocation6], 4294957056 }
  0x4b   :  { %6937 = dma.done.wait [#allocation9], 12288  }
  0x4c   :  { %6938 = vsyncadd [#allocation9], 4294955008 }
  0x4d   :  { %6939 = dma.done.wait [#allocation12], 1024  }
  0x4e   :  { %6940 = vsyncadd [#allocation12], 4294966272  ;;  %v8480_v0 = vmov 0.0|0.0   ;;  %vm6964_vm0 = vmmov 0   ;;  %v8485_v1 = vmov 0.0   ;;  %v116_v3 = vld [vmem:[#allocation5] sm:$0xff] }
  0x4f   :  { %4616 = vmatprep.subr.bf16.mxu0 %v8480_v0  ;;  %4403 = vmatprep.mubr.msk.f32.mxu0 %vm6964_vm0, %v8485_v1  ;;  %v7099_v2 = vld [vmem:[#allocation11 + $0x20] ss:$8 sm:$0xf]  ;;  %s6967_s30 = smov [#allocation3]   ;;  %s6759_s26 = scalar_lea.hbm %s8472_s6, 8192 }
  0x50   :  { %4640 = vmatprep.subr.bf16.mxu1 %v8480_v0  ;;  %4438 = vmatprep.mubr.msk.f32.mxu1 %vm6964_vm0, %v8485_v1  ;;  %8632 = vst [vmem:[#allocation37_spill] sm:$0xff] %v7099_v2  ;;  %v117_v4 = vld [vmem:[#allocation5 + $0x28] sm:$0xff]  ;;  %v118_v6 = vld [vmem:[#allocation5 + $0x50] sm:$0xff]  ;;  %v119_v7 = vld [vmem:[#allocation5 + $0x78] sm:$0xff]  ;;  %s109_s14 = sshll.u32 %s6967_s30, 4  ;;  %p6760_p4 = scmp.ne.s32.totalorder %s8472_s6, %s6759_s26  ;;  %s110_s14 = int_to_ptr.vmem [resolvable:$true] %s109_s14 }
  0x51   :  { %v4617_v5 = vpack.c.bf16 %v117_v4, %v116_v3  ;;  %v4620_v8 = vpack.c.bf16 %v119_v7, %v118_v6  ;;  %v120_v9 = vld [vmem:[#allocation5 + $0xa0] sm:$0xff]  ;;  %v121_v10 = vld [vmem:[#allocation5 + $0xc8] sm:$0xff]  ;;  %v205_v12 = vld [vmem:[#allocation5 + $0x30] sm:$0xff]  ;;  %p6763_p5 = scmp.lt.u32.totalorder %s6759_s26, %s8472_s6 }
  0x52   :  { %v204_v11 = vld [vmem:[#allocation5 + $0x8] sm:$0xff]  ;;  %v4623_v13 = vpack.c.bf16 %v121_v10, %v120_v9  ;;  %v206_v15 = vld [vmem:[#allocation5 + $0x58] sm:$0xff]  ;;  %v207_v16 = vld [vmem:[#allocation5 + $0x80] sm:$0xff] }
  0x53   :  { %4618 = vmatpush3.bf16.msra.mxu0 %v4617_v5  ;;  %v4641_v14 = vpack.c.bf16 %v205_v12, %v204_v11  ;;  %v122_v17 = vld [vmem:[#allocation5 + $0xf0] sm:$0xff]  ;;  %v123_v18 = vld [vmem:[#allocation5 + $0x118] sm:$0xff]  ;;  %v4644_v19 = vpack.c.bf16 %v207_v16, %v206_v15  ;;  %v208_v20 = vld [vmem:[#allocation5 + $0xa8] sm:$0xff]  ;;  %p6765_p6 = pnand %p6763_p5, %p6760_p4 }
  0x54   :  { %4619 = vmatprep.subr.bf16.mxu0 %v8480_v0  ;;  %v209_v21 = vld [vmem:[#allocation5 + $0xd0] sm:$0xff]  ;;  %v4626_v22 = vpack.c.bf16 %v123_v18, %v122_v17  ;;  %v124_v23 = vld [vmem:[#allocation5 + $0x140] sm:$0xff]  ;;  %v125_v24 = vld [vmem:[#allocation5 + $0x168] sm:$0xff] }
  0x55   :  { %4642 = vmatpush3.bf16.msra.mxu1 %v4641_v14  ;;  %v4647_v25 = vpack.c.bf16 %v209_v21, %v208_v20  ;;  %v210_v26 = vld [vmem:[#allocation5 + $0xf8] sm:$0xff]  ;;  %v211_v27 = vld [vmem:[#allocation5 + $0x120] sm:$0xff]  ;;  %v4629_v28 = vpack.c.bf16 %v125_v24, %v124_v23  ;;  %v126_v29 = vld [vmem:[#allocation5 + $0x190] sm:$0xff] }
  0x56   :  { %4643 = vmatprep.subr.bf16.mxu1 %v8480_v0  ;;  %v127_v30 = vld [vmem:[#allocation5 + $0x1b8] sm:$0xff]  ;;  %v4650_v31 = vpack.c.bf16 %v211_v27, %v210_v26  ;;  %v212_v32 = vld [vmem:[#allocation5 + $0x148] sm:$0xff]  ;;  %v213_v33 = vld [vmem:[#allocation5 + $0x170] sm:$0xff] }
  0x57   :  { %4621 = vmatpush3.bf16.msra.mxu0 %v4620_v8  ;;  %v4632_v34 = vpack.c.bf16 %v127_v30, %v126_v29  ;;  %v128_v35 = vld [vmem:[#allocation5 + $0x1e0] sm:$0xff]  ;;  %v129_v36 = vld [vmem:[#allocation5 + $0x208] sm:$0xff]  ;;  %v4653_v37 = vpack.c.bf16 %v213_v33, %v212_v32  ;;  %v214_v38 = vld [vmem:[#allocation5 + $0x198] sm:$0xff] }
  0x58   :  { %4622 = vmatprep.subr.bf16.mxu0 %v8480_v0  ;;  %v215_v39 = vld [vmem:[#allocation5 + $0x1c0] sm:$0xff]  ;;  %v4635_v40 = vpack.c.bf16 %v129_v36, %v128_v35  ;;  %v130_v41 = vld [vmem:[#allocation5 + $0x230] sm:$0xff]  ;;  %v131_v42 = vld [vmem:[#allocation5 + $0x258] sm:$0xff] }
  0x59   :  { %4645 = vmatpush3.bf16.msra.mxu1 %v4644_v19  ;;  %v4656_v43 = vpack.c.bf16 %v215_v39, %v214_v38  ;;  %v216_v44 = vld [vmem:[#allocation5 + $0x1e8] sm:$0xff]  ;;  %v217_v45 = vld [vmem:[#allocation5 + $0x210] sm:$0xff]  ;;  %v4638_v46 = vpack.c.bf16 %v131_v42, %v130_v41  ;;  %v292_v48 = vld [vmem:[#allocation5 + $0x38] sm:$0xff] }
  0x5a   :  { %4646 = vmatprep.subr.bf16.mxu1 %v8480_v0  ;;  %v291_v47 = vld [vmem:[#allocation5 + $0x10] sm:$0xff]  ;;  %v4659_v49 = vpack.c.bf16 %v217_v45, %v216_v44  ;;  %v293_v52 = vld [vmem:[#allocation5 + $0x60] sm:$0xff]  ;;  %v294_v53 = vld [vmem:[#allocation5 + $0x88] sm:$0xff] }
  0x5b   :  { %4624 = vmatpush3.bf16.msra.mxu0 %v4623_v13  ;;  %v115_v50 = vld [vmem:[%s8466_s0 + $0x10] sm:$0x1]  ;;  %v4665_v51 = vpack.c.bf16 %v292_v48, %v291_v47  ;;  %v4668_v54 = vpack.c.bf16 %v294_v53, %v293_v52  ;;  %v296_v56 = vld [vmem:[#allocation5 + $0xd8] sm:$0xff]  ;;  %v297_v58 = vld [vmem:[#allocation5 + $0x100] sm:$0xff] }
  0x5c   :  { %4625 = vmatprep.subr.bf16.mxu0 %v8480_v0  ;;  %v295_v55 = vld [vmem:[#allocation5 + $0xb0] sm:$0xff]  ;;  %v298_v59 = vld [vmem:[#allocation5 + $0x128] sm:$0xff]  ;;  %v300_v62 = vld [vmem:[#allocation5 + $0x178] sm:$0xff] }
  0x5d   :  { %4648 = vmatpush3.bf16.msra.mxu1 %v4647_v25  ;;  %v4671_v57 = vpack.c.bf16 %v296_v56, %v295_v55  ;;  %v4674_v60 = vpack.c.bf16 %v298_v59, %v297_v58  ;;  %v299_v61 = vld [vmem:[#allocation5 + $0x150] sm:$0xff]  ;;  %v301_v3 = vld [vmem:[#allocation5 + $0x1a0] sm:$0xff]  ;;  %v302_v4 = vld [vmem:[#allocation5 + $0x1c8] sm:$0xff] }
  0x5e   :  { %4649 = vmatprep.subr.bf16.mxu1 %v8480_v0  ;;  %v4677_v63 = vpack.c.bf16 %v300_v62, %v299_v61  ;;  %v4680_v5 = vpack.c.bf16 %v302_v4, %v301_v3  ;;  %v303_v6 = vld [vmem:[#allocation5 + $0x1f0] sm:$0xff]  ;;  %v304_v7 = vld [vmem:[#allocation5 + $0x218] sm:$0xff]  ;;  %v219_v10 = vld [vmem:[#allocation5 + $0x260] sm:$0xff] }
  0x5f   :  { %4627 = vmatpush3.bf16.msra.mxu0 %v4626_v22  ;;  %v4683_v8 = vpack.c.bf16 %v304_v7, %v303_v6  ;;  %v218_v9 = vld [vmem:[#allocation5 + $0x238] sm:$0xff]  ;;  %v305_v11 = vld [vmem:[#allocation5 + $0x240] sm:$0xff]  ;;  %v306_v13 = vld [vmem:[#allocation5 + $0x268] sm:$0xff] }
  0x60   :  { %4628 = vmatprep.subr.bf16.mxu0 %v8480_v0  ;;  %v4662_v12 = vpack.c.bf16 %v219_v10, %v218_v9  ;;  %v4686_v14 = vpack.c.bf16 %v306_v13, %v305_v11  ;;  %v132_v15 = vld [vmem:[#allocation11] ss:$0 sm:$0xff]  ;;  %v391_v16 = vld [vmem:[#allocation5 + $0x18] sm:$0xff]  ;;  %v393_v23 = vld [vmem:[#allocation5 + $0x68] sm:$0xff] }
  0x61   :  { %4651 = vmatpush3.bf16.msra.mxu1 %v4650_v31  ;;  %v392_v17 = vld [vmem:[#allocation5 + $0x40] sm:$0xff]  ;;  %v394_v24 = vld [vmem:[#allocation5 + $0x90] sm:$0xff]  ;;  %v395_v26 = vld [vmem:[#allocation5 + $0xb8] sm:$0xff] }
  0x62   :  { %4652 = vmatprep.subr.bf16.mxu1 %v8480_v0  ;;  %v4689_v21 = vpack.c.bf16 %v392_v17, %v391_v16  ;;  %v4692_v25 = vpack.c.bf16 %v394_v24, %v393_v23  ;;  %v396_v27 = vld [vmem:[#allocation5 + $0xe0] sm:$0xff]  ;;  %v397_v29 = vld [vmem:[#allocation5 + $0x108] sm:$0xff]  ;;  %v398_v30 = vld [vmem:[#allocation5 + $0x130] sm:$0xff] }
  0x63   :  { %4630 = vmatpush3.bf16.msra.mxu0 %v4629_v28  ;;  %v4695_v28 = vpack.c.bf16 %v396_v27, %v395_v26  ;;  %v4698_v31 = vpack.c.bf16 %v398_v30, %v397_v29  ;;  %v399_v32 = vld [vmem:[#allocation5 + $0x158] sm:$0xff]  ;;  %v400_v33 = vld [vmem:[#allocation5 + $0x180] sm:$0xff]  ;;  %v401_v35 = vld [vmem:[#allocation5 + $0x1a8] sm:$0xff] }
  0x64   :  { %4631 = vmatprep.subr.bf16.mxu0 %v8480_v0  ;;  %v402_v36 = vld [vmem:[#allocation5 + $0x1d0] sm:$0xff]  ;;  %v403_v38 = vld [vmem:[#allocation5 + $0x1f8] sm:$0xff]  ;;  %v404_v39 = vld [vmem:[#allocation5 + $0x220] sm:$0xff] }
  0x65   :  { %4654 = vmatpush3.bf16.msra.mxu1 %v4653_v37  ;;  %v4704_v37 = vpack.c.bf16 %v402_v36, %v401_v35  ;;  %v405_v41 = vld [vmem:[#allocation5 + $0x248] sm:$0xff]  ;;  %v406_v42 = vld [vmem:[#allocation5 + $0x270] sm:$0xff]  ;;  %v479_v44 = vld [vmem:[#allocation5 + $0x20] sm:$0xff] }
  0x66   :  { %4655 = vmatprep.subr.bf16.mxu1 %v8480_v0  ;;  %v480_v45 = vld [vmem:[#allocation5 + $0x48] sm:$0xff]  ;;  %v482_v48 = vld [vmem:[#allocation5 + $0x98] sm:$0xff]  ;;  %v485_v53 = vld [vmem:[#allocation5 + $0x110] sm:$0xff] }
  0x67   :  { %4633 = vmatpush3.bf16.msra.mxu0 %v4632_v34  ;;  %v4701_v34 = vpack.c.bf16 %v400_v33, %v399_v32  ;;  %v4713_v47 = vpack.c.bf16 %v480_v45, %v479_v44  ;;  %v487_v56 = vld [vmem:[#allocation5 + $0x160] sm:$0xff]  ;;  %v489_v59 = vld [vmem:[#allocation5 + $0x1b0] sm:$0xff]  ;;  %v575_v27 = vld [vmem:[#allocation8 + $0x18] sm:$0xff] }
  0x68   :  { %4634 = vmatprep.subr.bf16.mxu0 %v8480_v0  ;;  %v491_v62 = vld [vmem:[#allocation5 + $0x200] sm:$0xff]  ;;  %v574_v26 = vld [vmem:[#allocation8 + $0x10] sm:$0xff]  ;;  %v577_v30 = vld [vmem:[#allocation8 + $0x28] sm:$0xff] }
  0x69   :  { %4657 = vmatpush3.bf16.msra.mxu1 %v4656_v43  ;;  %v4710_v43 = vpack.c.bf16 %v406_v42, %v405_v41  ;;  %v307_v4 = vld [vmem:[#allocation11 + $0x2] ss:$0 sm:$0xff]  ;;  %v578_v32 = vld [vmem:[#allocation8 + $0x30] sm:$0xff]  ;;  %v579_v33 = vld [vmem:[#allocation8 + $0x38] sm:$0xff] }
  0x6a   :  { %4658 = vmatprep.subr.bf16.mxu1 %v8480_v0  ;;  %v576_v29 = vld [vmem:[#allocation8 + $0x20] sm:$0xff]  ;;  %v581_v36 = vld [vmem:[#allocation8 + $0x48] sm:$0xff]  ;;  %v586_v44 = vld [vmem:[#allocation8 + $0x70] sm:$0xff] }
  0x6b   :  { %4636 = vmatpush3.bf16.msra.mxu0 %v4635_v40  ;;  %v4707_v40 = vpack.c.bf16 %v404_v39, %v403_v38  ;;  %v580_v35 = vld [vmem:[#allocation8 + $0x40] sm:$0xff]  ;;  %v582_v38 = vld [vmem:[#allocation8 + $0x50] sm:$0xff]  ;;  %v583_v39 = vld [vmem:[#allocation8 + $0x58] sm:$0xff] }
  0x6c   :  { %4637 = vmatprep.subr.bf16.mxu0 %v8480_v0  ;;  %v584_v41 = vld [vmem:[#allocation8 + $0x60] sm:$0xff]  ;;  %v585_v42 = vld [vmem:[#allocation8 + $0x68] sm:$0xff]  ;;  %v587_v45 = vld [vmem:[#allocation8 + $0x78] sm:$0xff] }
  0x6d   :  { %4660 = vmatpush3.bf16.msra.mxu1 %v4659_v49 }
  0x6e   :  { %4661 = vmatprep.subr.bf16.mxu1 %v8480_v0 }
  0x6f   :  { %4639 = vmatpush3.bf16.msra.mxu0 %v4638_v46  ;;  %v481_v46 = vld [vmem:[#allocation5 + $0x70] sm:$0xff] }
  0x70   :  { %4664 = vmatprep.subr.bf16.mxu0 %v8480_v0  ;;  %v4716_v49 = vpack.c.bf16 %v482_v48, %v481_v46  ;;  %v4758_v46 = vpack.c.bf16 %v587_v45, %v586_v44  ;;  %v493_v48 = vld [vmem:[#allocation5 + $0x250] sm:$0xff]  ;;  %v407_v45 = vld [vmem:[#allocation11 + $0x3] ss:$0 sm:$0xff] }
  0x71   :  { %4663 = vmatpush3.bf16.msra.mxu1 %v4662_v12  ;;  %v381_v12 = vlaneseq }
  0x72   :  { %4404 = vmatmul.mubr.f32.vlgmr.msra.gmra.mrb[0].mxu0 %v115_v50  ;;  %4688 = vmatprep.subr.bf16.mxu1 %v8480_v0  ;;  %v483_v50 = vld [vmem:[#allocation5 + $0xc0] sm:$0xff] }
  0x73   :  { %4666 = vmatpush3.bf16.msra.mxu0 %v4665_v51  ;;  %4473 = vmatprep.mubr.msk.f32.mxu0 %vm6964_vm0, %v8485_v1  ;;  %v484_v51 = vld [vmem:[#allocation5 + $0xe8] sm:$0xff]  ;;  %v7152_v13 = vshrl.u32 %v381_v12, 7  ;;  %v686_v12 = vld [vmem:[#allocation10 + $0xd8] sm:$0xff] }
  0x74   :  { %4667 = vmatprep.subr.bf16.mxu0 %v8480_v0  ;;  %v4719_v52 = vpack.c.bf16 %v484_v51, %v483_v50  ;;  %v662_v51 = vld [vmem:[#allocation10 + $0x18] sm:$0xff] }
  0x75   :  { %8633 = vst [vmem:[#allocation38_spill] sm:$0xff] %v7152_v13  ;;  %v7157_v16 = vsub.s32 0, %v7152_v13 }
  0x77   :  { %4669 = vmatpush3.bf16.msra.mxu0 %v4668_v54  ;;  %v486_v54 = vld [vmem:[#allocation5 + $0x138] sm:$0xff]  ;;  %8634 = vst [vmem:[#allocation39_spill] sm:$0xff] %v7157_v16 }
  0x78   :  { %4670 = vmatprep.subr.bf16.mxu0 %v8480_v0  ;;  %v4722_v55 = vpack.c.bf16 %v486_v54, %v485_v53  ;;  %v660_v54 = vld [vmem:[#allocation10 + $0x8] sm:$0xff] }
  0x7b   :  { %4672 = vmatpush3.bf16.msra.mxu0 %v4671_v57  ;;  %v488_v57 = vld [vmem:[#allocation5 + $0x188] sm:$0xff] }
  0x7c   :  { %4673 = vmatprep.subr.bf16.mxu0 %v8480_v0  ;;  %v4725_v58 = vpack.c.bf16 %v488_v57, %v487_v56  ;;  %v661_v56 = vld [vmem:[#allocation10 + $0x10] sm:$0xff] }
  0x7f   :  { %4675 = vmatpush3.bf16.msra.mxu0 %v4674_v60  ;;  %v490_v60 = vld [vmem:[#allocation5 + $0x1d8] sm:$0xff] }
  0x80   :  { %4676 = vmatprep.subr.bf16.mxu0 %v8480_v0  ;;  %v4728_v61 = vpack.c.bf16 %v490_v60, %v489_v59  ;;  %v670_v60 = vld [vmem:[#allocation10 + $0x58] sm:$0xff] }
  0x83   :  { %4678 = vmatpush3.bf16.msra.mxu0 %v4677_v63  ;;  %v492_v63 = vld [vmem:[#allocation5 + $0x228] sm:$0xff] }
  0x84   :  { %4679 = vmatprep.subr.bf16.mxu0 %v8480_v0  ;;  %v4731_v3 = vpack.c.bf16 %v492_v63, %v491_v62  ;;  %v669_v63 = vld [vmem:[#allocation10 + $0x50] sm:$0xff] }
  0x87   :  { %4681 = vmatpush3.bf16.msra.mxu0 %v4680_v5 }
  0x88   :  { %4682 = vmatprep.subr.bf16.mxu0 %v8480_v0 }
  0x8b   :  { %4684 = vmatpush3.bf16.msra.mxu0 %v4683_v8 }
  0x8c   :  { %4685 = vmatprep.subr.bf16.mxu0 %v8480_v0 }
  0x8f   :  { %4687 = vmatpush3.bf16.msra.mxu0 %v4686_v14  ;;  %v220_v14 = vld [vmem:[#allocation11 + $0x1] ss:$0 sm:$0xff] }
  0x90   :  { %4712 = vmatprep.subr.bf16.mxu0 %v8480_v0 }
 0x145   :  { %v199_v18 = vpop.f32.mrb[0].mxu0 }
 0x146   :  { %v200_v19 = vadd.f32 %v199_v18, %v132_v15  ;;  %v4405_v20 = vpop.f32.mrb[1].mxu0  ;;  %v114_v18 = vld [vmem:[%s8466_s0 + $0x8] sm:$0xff] }
 0x147   :  { %v572_v20 = vld [vmem:[#allocation8] sm:$0xff] }
 0x148   :  { %v203_v22 = vmax.f32 %v200_v19, 0.0 }
 0x14a   :  { %4439 = vmatmul.mubr.f32.vlgmr.msra.gmra.mrb[0].mxu1 %v203_v22  ;;  %4474 = vmatmul.mubr.f32.vlgmr.msra.gmra.mrb[2].mxu0 %v203_v22 }
 0x14b   :  { %4690 = vmatpush3.bf16.msra.mxu1 %v4689_v21  ;;  %4508 = vmatprep.mubr.msk.f32.mxu1 %vm6964_vm0, %v8485_v1  ;;  %v573_v21 = vld [vmem:[#allocation8 + $0x8] sm:$0xff] }
 0x14c   :  { %4691 = vmatprep.subr.bf16.mxu1 %v8480_v0  ;;  %4543 = vmatprep.mubr.msk.f32.mxu0 %vm6964_vm0, %v8485_v1  ;;  %v4737_v24 = vpack.c.bf16 %v573_v21, %v572_v20  ;;  %v694_v21 = vld [vmem:[#allocation10 + $0x118] sm:$0xff] }
 0x14d   :  { %4714 = vmatpush3.bf16.msra.mxu0 %v4713_v47  ;;  %v113_v47 = vld [vmem:[%s8466_s0] sm:$0xff]  ;;  %s6966_s0 = smov [#allocation2]  }
 0x14e   :  { %4715 = vmatprep.subr.bf16.mxu0 %v8480_v0  ;;  %s97_s23 = sshll.u32 %s6966_s0, 4  ;;  %s98_s23 = int_to_ptr.vmem [resolvable:$true] %s97_s23 }
 0x14f   :  { %4693 = vmatpush3.bf16.msra.mxu1 %v4692_v25 }
 0x150   :  { %4694 = vmatprep.subr.bf16.mxu1 %v8480_v0 }
 0x151   :  { %4717 = vmatpush3.bf16.msra.mxu0 %v4716_v49  ;;  %v494_v49 = vld [vmem:[#allocation5 + $0x278] sm:$0xff] }
 0x152   :  { %4718 = vmatprep.subr.bf16.mxu0 %v8480_v0  ;;  %v4734_v50 = vpack.c.bf16 %v494_v49, %v493_v48  ;;  %v668_v49 = vld [vmem:[#allocation10 + $0x48] sm:$0xff] }
 0x153   :  { %4696 = vmatpush3.bf16.msra.mxu1 %v4695_v28  ;;  %v4740_v28 = vpack.c.bf16 %v575_v27, %v574_v26  ;;  %v702_v27 = vld [vmem:[#allocation10 + $0x158] sm:$0xff] }
 0x154   :  { %4697 = vmatprep.subr.bf16.mxu1 %v8480_v0 }
 0x155   :  { %4720 = vmatpush3.bf16.msra.mxu0 %v4719_v52  ;;  %v666_v52 = vld [vmem:[#allocation10 + $0x38] sm:$0xff] }
 0x156   :  { %4721 = vmatprep.subr.bf16.mxu0 %v8480_v0  ;;  %v4792_v53 = vpack.c.bf16 %v666_v52, %v662_v51 }
 0x157   :  { %4699 = vmatpush3.bf16.msra.mxu1 %v4698_v31  ;;  %v4743_v31 = vpack.c.bf16 %v577_v30, %v576_v29  ;;  %v701_v30 = vld [vmem:[#allocation10 + $0x150] sm:$0xff] }
 0x158   :  { %4700 = vmatprep.subr.bf16.mxu1 %v8480_v0 }
 0x159   :  { %4723 = vmatpush3.bf16.msra.mxu0 %v4722_v55  ;;  %v664_v55 = vld [vmem:[#allocation10 + $0x28] sm:$0xff] }
 0x15a   :  { %4724 = vmatprep.subr.bf16.mxu0 %v8480_v0  ;;  %v4760_v57 = vpack.c.bf16 %v664_v55, %v660_v54 }
 0x15b   :  { %4702 = vmatpush3.bf16.msra.mxu1 %v4701_v34  ;;  %v4746_v34 = vpack.c.bf16 %v579_v33, %v578_v32  ;;  %v710_v33 = vld [vmem:[#allocation10 + $0x198] sm:$0xff] }
 0x15c   :  { %4703 = vmatprep.subr.bf16.mxu1 %v8480_v0 }
 0x15d   :  { %4726 = vmatpush3.bf16.msra.mxu0 %v4725_v58  ;;  %v665_v58 = vld [vmem:[#allocation10 + $0x30] sm:$0xff] }
 0x15e   :  { %4727 = vmatprep.subr.bf16.mxu0 %v8480_v0  ;;  %v4794_v59 = vpack.c.bf16 %v665_v58, %v661_v56  ;;  %v667_v56 = vld [vmem:[#allocation10 + $0x40] sm:$0xff]  ;;  %v676_v58 = vld [vmem:[#allocation10 + $0x88] sm:$0xff] }
 0x15f   :  { %4705 = vmatpush3.bf16.msra.mxu1 %v4704_v37  ;;  %v4749_v37 = vpack.c.bf16 %v581_v36, %v580_v35  ;;  %v709_v36 = vld [vmem:[#allocation10 + $0x190] sm:$0xff] }
 0x160   :  { %4706 = vmatprep.subr.bf16.mxu1 %v8480_v0 }
 0x161   :  { %4729 = vmatpush3.bf16.msra.mxu0 %v4728_v61  ;;  %v674_v61 = vld [vmem:[#allocation10 + $0x78] sm:$0xff] }
 0x162   :  { %4730 = vmatprep.subr.bf16.mxu0 %v8480_v0  ;;  %v4796_v62 = vpack.c.bf16 %v674_v61, %v670_v60 }
 0x163   :  { %4708 = vmatpush3.bf16.msra.mxu1 %v4707_v40  ;;  %v4752_v40 = vpack.c.bf16 %v583_v39, %v582_v38  ;;  %v718_v39 = vld [vmem:[#allocation10 + $0x1d8] sm:$0xff] }
 0x164   :  { %4709 = vmatprep.subr.bf16.mxu1 %v8480_v0 }
 0x165   :  { %4732 = vmatpush3.bf16.msra.mxu0 %v4731_v3  ;;  %v673_v3 = vld [vmem:[#allocation10 + $0x70] sm:$0xff] }
 0x166   :  { %4733 = vmatprep.subr.bf16.mxu0 %v8480_v0 }
 0x167   :  { %4711 = vmatpush3.bf16.msra.mxu1 %v4710_v43  ;;  %v4755_v43 = vpack.c.bf16 %v585_v42, %v584_v41  ;;  %v717_v42 = vld [vmem:[#allocation10 + $0x1d0] sm:$0xff] }
 0x168   :  { %4736 = vmatprep.subr.bf16.mxu1 %v8480_v0 }
 0x169   :  { %4735 = vmatpush3.bf16.msra.mxu0 %v4734_v50  ;;  %v672_v50 = vld [vmem:[#allocation10 + $0x68] sm:$0xff] }
 0x16a   :  { %4761 = vmatprep.subr.bf16.mxu0 %v4760_v57  ;;  %v4764_v55 = vpack.c.bf16 %v672_v50, %v668_v49  ;;  %v671_v57 = vld [vmem:[#allocation10 + $0x60] sm:$0xff] }
 0x16b   :  { %v4766_v60 = vpack.c.bf16 %v671_v57, %v667_v56 }
 0x21d   :  { %v287_v5 = vpop.f32.mrb[0].mxu1  ;;  %v374_v6 = vpop.f32.mrb[2].mxu0 }
 0x21e   :  { %v7149_v7 = vadd.f32 %v374_v6, %v307_v4  ;;  %v4440_v8 = vpop.f32.mrb[1].mxu1  ;;  %v4475_v9 = vpop.f32.mrb[3].mxu0  ;;  %v7154_v15 = vadd.f32 %v287_v5, %v220_v14  ;;  %v4798_v4 = vpack.c.bf16 %v673_v3, %v669_v63  ;;  %v678_v5 = vld [vmem:[#allocation10 + $0x98] sm:$0xff]  ;;  %v679_v63 = vld [vmem:[#allocation10 + $0xa0] sm:$0xff]  ;;  %v684_v3 = vld [vmem:[#allocation10 + $0xc8] sm:$0xff] }
 0x21f   :  { %v682_v6 = vld [vmem:[#allocation10 + $0xb8] sm:$0xff]  ;;  %v677_v9 = vld [vmem:[#allocation10 + $0x90] sm:$0xff] }
 0x220   :  { %v378_v10 = vmul.f32 0.5, %v7149_v7  ;;  %v389_v22 = vrot.slane %v7154_v15, %v7157_v16  ;;  %v4800_v8 = vpack.c.bf16 %v682_v6, %v678_v5  ;;  %v690_v14 = vld [vmem:[#allocation10 + $0xf8] sm:$0xff] }
 0x222   :  { %v379_v11 = vmul.f32 1.442695, %v378_v10  ;;  %v681_v10 = vld [vmem:[#allocation10 + $0xb0] sm:$0xff] }
 0x224   :  { %6406 = vpow2.f32 %v379_v11  ;;  %v4802_v11 = vpack.c.bf16 %v681_v10, %v677_v9  ;;  %v687_v9 = vld [vmem:[#allocation10 + $0xe0] sm:$0xff]  ;;  %v692_v10 = vld [vmem:[#allocation10 + $0x108] sm:$0xff] }
 0x22e   :  { %v6407_v17 = vpop.eup %6406 }
 0x22f   :  { %v384_v19 = vrot.slane %v6407_v17, %v7157_v16  ;;  %v4804_v17 = vpack.c.bf16 %v690_v14, %v686_v12 }
 0x231   :  { %v385_v23 = vmul.f32 %v384_v19, %v114_v18  ;;  %v685_v18 = vld [vmem:[#allocation10 + $0xd0] sm:$0xff] }
 0x232   :  { %v689_v19 = vld [vmem:[#allocation10 + $0xf0] sm:$0xff] }
 0x233   :  { %v390_v25 = vadd.f32 %v389_v22, %v385_v23  ;;  %v4806_v20 = vpack.c.bf16 %v689_v19, %v685_v18  ;;  %v698_v22 = vld [vmem:[#allocation10 + $0x138] sm:$0xff]  ;;  %v695_v18 = vld [vmem:[#allocation10 + $0x120] sm:$0xff]  ;;  %v700_v19 = vld [vmem:[#allocation10 + $0x148] sm:$0xff] }
 0x234   :  { %v4808_v23 = vpack.c.bf16 %v698_v22, %v694_v21 }
 0x235   :  { %4509 = vmatmul.mubr.f32.vlgmr.msra.gmra.mrb[2].mxu1 %v390_v25  ;;  %v697_v25 = vld [vmem:[#allocation10 + $0x130] sm:$0xff] }
 0x236   :  { %4738 = vmatpush3.bf16.msra.mxu1 %v4737_v24  ;;  %4578 = vmatprep.mubr.msk.f32.mxu1 %vm6964_vm0, %v8485_v1  ;;  %v693_v24 = vld [vmem:[#allocation10 + $0x110] sm:$0xff] }
 0x237   :  { %4739 = vmatprep.subr.bf16.mxu1 %v8480_v0  ;;  %v4810_v26 = vpack.c.bf16 %v697_v25, %v693_v24  ;;  %v703_v24 = vld [vmem:[#allocation10 + $0x160] sm:$0xff]  ;;  %v708_v25 = vld [vmem:[#allocation10 + $0x188] sm:$0xff] }
 0x23a   :  { %4741 = vmatpush3.bf16.msra.mxu1 %v4740_v28  ;;  %v706_v28 = vld [vmem:[#allocation10 + $0x178] sm:$0xff] }
 0x23b   :  { %4742 = vmatprep.subr.bf16.mxu1 %v8480_v0  ;;  %v4812_v29 = vpack.c.bf16 %v706_v28, %v702_v27 }
 0x23e   :  { %4744 = vmatpush3.bf16.msra.mxu1 %v4743_v31  ;;  %v705_v31 = vld [vmem:[#allocation10 + $0x170] sm:$0xff] }
 0x23f   :  { %4745 = vmatprep.subr.bf16.mxu1 %v8480_v0  ;;  %v4814_v32 = vpack.c.bf16 %v705_v31, %v701_v30  ;;  %v711_v30 = vld [vmem:[#allocation10 + $0x1a0] sm:$0xff]  ;;  %v716_v31 = vld [vmem:[#allocation10 + $0x1c8] sm:$0xff] }
 0x242   :  { %4747 = vmatpush3.bf16.msra.mxu1 %v4746_v34  ;;  %v714_v34 = vld [vmem:[#allocation10 + $0x1b8] sm:$0xff] }
 0x243   :  { %4748 = vmatprep.subr.bf16.mxu1 %v8480_v0  ;;  %v4816_v35 = vpack.c.bf16 %v714_v34, %v710_v33 }
 0x246   :  { %4750 = vmatpush3.bf16.msra.mxu1 %v4749_v37  ;;  %v713_v37 = vld [vmem:[#allocation10 + $0x1b0] sm:$0xff] }
 0x247   :  { %4751 = vmatprep.subr.bf16.mxu1 %v8480_v0  ;;  %v4818_v38 = vpack.c.bf16 %v713_v37, %v709_v36  ;;  %v719_v36 = vld [vmem:[#allocation10 + $0x1e0] sm:$0xff] }
 0x248   :  { %v588_v37 = vld [vmem:[#allocation11 + $0x5] ss:$0 sm:$0xff] }
 0x24a   :  { %4753 = vmatpush3.bf16.msra.mxu1 %v4752_v40  ;;  %v722_v40 = vld [vmem:[#allocation10 + $0x1f8] sm:$0xff] }
 0x24b   :  { %4754 = vmatprep.subr.bf16.mxu1 %v8480_v0  ;;  %v4820_v41 = vpack.c.bf16 %v722_v40, %v718_v39 }
 0x24e   :  { %4756 = vmatpush3.bf16.msra.mxu1 %v4755_v43  ;;  %v721_v43 = vld [vmem:[#allocation10 + $0x1f0] sm:$0xff] }
 0x24f   :  { %4757 = vmatprep.subr.bf16.mxu1 %v8480_v0  ;;  %v4822_v44 = vpack.c.bf16 %v721_v43, %v717_v42 }
 0x252   :  { %4759 = vmatpush3.bf16.msra.mxu1 %v4758_v46  ;;  %v659_v46 = vld [vmem:[#allocation10] sm:$0xff] }
 0x253   :  { %4793 = vmatprep.subr.bf16.mxu1 %v4792_v53 }
 0x255   :  { %4579 = vmatmul.mubr.f32.vlgmr.msra.gmra.mrb[4].mxu1 %v113_v47  ;;  %v663_v47 = vld [vmem:[#allocation10 + $0x20] sm:$0xff] }
 0x256   :  { %881 = vmatprep.mubr.f32.mxu1 %v8485_v1  ;;  %4795 = vmatpush1.bf16.msra.mxu1 %v4794_v59  ;;  %v4762_v53 = vpack.c.bf16 %v663_v47, %v659_v46  ;;  %v680_v59 = vld [vmem:[#allocation10 + $0xa8] sm:$0xff] }
 0x257   :  { %4797 = vmatprep.subr.bf16.mxu1 %v4796_v62  ;;  %v4768_v61 = vpack.c.bf16 %v680_v59, %v676_v58  ;;  %v675_v62 = vld [vmem:[#allocation10 + $0x80] sm:$0xff] }
 0x258   :  { %v4770_v5 = vpack.c.bf16 %v679_v63, %v675_v62 }
 0x25a   :  { %4799 = vmatpush1.bf16.msra.mxu1 %v4798_v4  ;;  %v688_v4 = vld [vmem:[#allocation10 + $0xe8] sm:$0xff] }
 0x25b   :  { %4801 = vmatprep.subr.bf16.mxu1 %v4800_v8  ;;  %v4772_v6 = vpack.c.bf16 %v688_v4, %v684_v3  ;;  %v683_v8 = vld [vmem:[#allocation10 + $0xc0] sm:$0xff] }
 0x25c   :  { %v4774_v12 = vpack.c.bf16 %v687_v9, %v683_v8 }
 0x25e   :  { %4803 = vmatpush1.bf16.msra.mxu1 %v4802_v11  ;;  %v696_v11 = vld [vmem:[#allocation10 + $0x128] sm:$0xff] }
 0x25f   :  { %4805 = vmatprep.subr.bf16.mxu1 %v4804_v17  ;;  %v4776_v14 = vpack.c.bf16 %v696_v11, %v692_v10  ;;  %v691_v17 = vld [vmem:[#allocation10 + $0x100] sm:$0xff] }
 0x260   :  { %v4778_v21 = vpack.c.bf16 %v695_v18, %v691_v17 }
 0x262   :  { %4807 = vmatpush1.bf16.msra.mxu1 %v4806_v20  ;;  %v704_v20 = vld [vmem:[#allocation10 + $0x168] sm:$0xff] }
 0x263   :  { %4809 = vmatprep.subr.bf16.mxu1 %v4808_v23  ;;  %v4780_v22 = vpack.c.bf16 %v704_v20, %v700_v19  ;;  %v699_v23 = vld [vmem:[#allocation10 + $0x140] sm:$0xff] }
 0x264   :  { %v4782_v27 = vpack.c.bf16 %v703_v24, %v699_v23 }
 0x266   :  { %4811 = vmatpush1.bf16.msra.mxu1 %v4810_v26  ;;  %v712_v26 = vld [vmem:[#allocation10 + $0x1a8] sm:$0xff] }
 0x267   :  { %4813 = vmatprep.subr.bf16.mxu1 %v4812_v29  ;;  %v4784_v28 = vpack.c.bf16 %v712_v26, %v708_v25  ;;  %v707_v29 = vld [vmem:[#allocation10 + $0x180] sm:$0xff] }
 0x268   :  { %v4786_v33 = vpack.c.bf16 %v711_v30, %v707_v29 }
 0x26a   :  { %4815 = vmatpush1.bf16.msra.mxu1 %v4814_v32  ;;  %v720_v32 = vld [vmem:[#allocation10 + $0x1e8] sm:$0xff] }
 0x26b   :  { %4817 = vmatprep.subr.bf16.mxu1 %v4816_v35  ;;  %v4788_v34 = vpack.c.bf16 %v720_v32, %v716_v31  ;;  %v715_v35 = vld [vmem:[#allocation10 + $0x1c0] sm:$0xff] }
 0x26e   :  { %4819 = vmatpush1.bf16.msra.mxu1 %v4818_v38  ;;  %v4790_v38 = vpack.c.bf16 %v719_v36, %v715_v35 }
 0x26f   :  { %4821 = vmatprep.subr.bf16.mxu1 %v4820_v41 }
 0x272   :  { %4823 = vmatpush1.bf16.msra.mxu1 %v4822_v44 }
 0x308   :  { %v474_v48 = vpop.f32.mrb[2].mxu1 }
 0x309   :  { %v475_v51 = vadd.f32 %v474_v48, %v407_v45  ;;  %v4510_v52 = vpop.f32.mrb[3].mxu1 }
 0x30b   :  { %v478_v54 = vmax.f32 %v475_v51, 0.0 }
 0x30d   :  { %4544 = vmatmul.mubr.f32.vlgmr.msra.gmra.mrb[4].mxu0 %v478_v54 }
 0x30e   :  { %4763 = vmatpush1.bf16.msra.mxu0 %v4762_v53  ;;  %810 = vmatprep.mubr.f32.mxu0 %v8485_v1 }
 0x30f   :  { %4765 = vmatprep.subr.bf16.mxu0 %v4764_v55 }
 0x312   :  { %4767 = vmatpush1.bf16.msra.mxu0 %v4766_v60 }
 0x313   :  { %4769 = vmatprep.subr.bf16.mxu0 %v4768_v61 }
 0x316   :  { %4771 = vmatpush1.bf16.msra.mxu0 %v4770_v5 }
 0x317   :  { %4773 = vmatprep.subr.bf16.mxu0 %v4772_v6 }
 0x31a   :  { %4775 = vmatpush1.bf16.msra.mxu0 %v4774_v12 }
 0x31b   :  { %4777 = vmatprep.subr.bf16.mxu0 %v4776_v14 }
 0x31e   :  { %4779 = vmatpush1.bf16.msra.mxu0 %v4778_v21 }
 0x31f   :  { %4781 = vmatprep.subr.bf16.mxu0 %v4780_v22 }
 0x322   :  { %4783 = vmatpush1.bf16.msra.mxu0 %v4782_v27 }
 0x323   :  { %4785 = vmatprep.subr.bf16.mxu0 %v4784_v28 }
 0x326   :  { %4787 = vmatpush1.bf16.msra.mxu0 %v4786_v33 }
 0x327   :  { %4789 = vmatprep.subr.bf16.mxu0 %v4788_v34 }
 0x328   :  { %v655_v39 = vpop.f32.mrb[4].mxu1 }
 0x329   :  { %v656_v40 = vadd.f32 %v655_v39, %v588_v37  ;;  %v4580_v41 = vpop.f32.mrb[5].mxu1 }
 0x32a   :  { %4791 = vmatpush1.bf16.msra.mxu0 %v4790_v38 }
 0x32b   :  { %882 = vmatmul.mubr.f32.vlgmr.msra.gmra.mrb[6].mxu1 %v656_v40 }
 0x32d   :  { %811 = vmatmul.mubr.f32.vlgmr.msra.gmra.mrb[6].mxu0 %v656_v40 }
 0x32e   :  { %6768 = shalt.err (!%p6765_p6)  }
 0x32f   :  { %s6769_s21 = scalar_lea.vmem %s98_s23, 8192  ;;  %p6774_p8 = scmp.lt.s32.totalorder %s98_s23, %s98_s23 }
 0x330   :  { %p6770_p7 = scmp.ne.s32.totalorder %s98_s23, %s6769_s21  ;;  %p6775_p9 = scmp.lt.s32.totalorder %s6769_s21, %s6769_s21 }
 0x332   :  { %p6776_p10 = por %p6775_p9, %p6774_p8 }
 0x334   :  { %p6777_p11 = pnand %p6776_p10, %p6770_p7 }
 0x336   :  { %6780 = shalt.err (!%p6777_p11)  }
 0x337   :  { %100 = dma.hbm_to_vmem [thread:$0]  %s8472_s6, 8192, %s98_s23, [#allocation4] }
 0x338   :  { %s6781_s5 = scalar_lea.hbm %s8473_s7, 16384 }
 0x339   :  { %p6782_p12 = scmp.ne.s32.totalorder %s8473_s7, %s6781_s5  ;;  %p6785_p13 = scmp.lt.u32.totalorder %s6781_s5, %s8473_s7 }
 0x33b   :  { %p6787_p0 = pnand %p6785_p13, %p6782_p12 }
 0x33d   :  { %6790 = shalt.err (!%p6787_p0)  }
 0x33e   :  { %s6791_s2 = scalar_lea.vmem %s110_s14, 16384  ;;  %p6796_p2 = scmp.lt.s32.totalorder %s110_s14, %s110_s14 }
 0x33f   :  { %p6792_p1 = scmp.ne.s32.totalorder %s110_s14, %s6791_s2  ;;  %p6797_p3 = scmp.lt.s32.totalorder %s6791_s2, %s6791_s2 }
 0x341   :  { %p6798_p4 = por %p6797_p3, %p6796_p2 }
 0x343   :  { %p6799_p5 = pnand %p6798_p4, %p6792_p1 }
 0x345   :  { %6802 = shalt.err (!%p6799_p5)  }
 0x346   :  { %112 = dma.hbm_to_vmem [thread:$0]  %s8473_s7, 16384, %s110_s14, [#allocation4 + $0x1]  ;;  %v495_v42 = vld [vmem:[#allocation11 + $0x4] ss:$0 sm:$0xff]  ;;  %v8482_v49 = vsub.s32 2, %v7152_v13  ;;  %v8483_v51 = vsub.s32 3, %v7152_v13 }
 0x347   :  { %v724_v50 = vld [vmem:[#allocation11 + $0x7] ss:$8 sm:$0xf]  ;;  %v8484_v52 = vsub.s32 1, %v7152_v13 }
 0x348   :  { %v737_v53 = vrot.slane %v724_v50, %v8482_v49  ;;  %v741_v55 = vrot.slane %v724_v50, %v8483_v51  ;;  %v729_v56 = vrot.slane %v724_v50, %v7157_v16 }
 0x349   :  { %v733_v58 = vrot.slane %v724_v50, %v8484_v52 }
 0x3e0   :  { %v562_v43 = vpop.f32.mrb[4].mxu0 }
 0x3e1   :  { %v563_v44 = vadd.f32 %v562_v43, %v495_v42  ;;  %v4545_v45 = vpop.f32.mrb[5].mxu0 }
 0x3e3   :  { %v4201_v46 = vmul.f32 -1.442695, %v563_v44 }
 0x3e5   :  { %6408 = vpow2.f32 %v4201_v46 }
 0x3ef   :  { %v6409_v47 = vpop.eup %6408 }
 0x3f0   :  { %v569_v48 = vadd.f32 1.0, %v6409_v47 }
 0x3f2   :  { %6410 = vrcp.f32 %v569_v48 }
 0x3fc   :  { %v7208_v54 = vpop.eup %6410 }
 0x3fd   :  { %8635 = vst [vmem:[#allocation40_spill] sm:$0xff] %v7208_v54 }
 0x3fe   :  { %v883_v57 = vpop.f32.mrb[6].mxu1 }
 0x3ff   :  { %v7215_v59 = vadd.f32 %v883_v57, %v737_v53  ;;  %v885_v60 = vpop.f32.mrb[7].mxu1 }
 0x400   :  { %v812_v61 = vpop.f32.mrb[6].mxu0  ;;  %v7217_v62 = vadd.f32 %v885_v60, %v741_v55 }
 0x401   :  { %v7219_v63 = vadd.f32 %v812_v61, %v729_v56  ;;  %v814_v3 = vpop.f32.mrb[7].mxu0 }
 0x402   :  { %v7221_v4 = vadd.f32 %v814_v3, %v733_v58 }
 0x403   :  { %8636 = vst [vmem:[#allocation41_spill] sm:$0xff] %v7219_v63 }
 0x404   :  { %8637 = vst [vmem:[#allocation42_spill] sm:$0xff] %v7221_v4 }
 0x405   :  { %6941 = dma.done.wait [#allocation4], 8192 }
 0x406   :  { %6942 = vsyncadd [#allocation4], 4294959104 }
 0x407   :  { %6943 = dma.done.wait [#allocation4 + $0x1], 16384 }
 0x408   :  { %6944 = vsyncadd [#allocation4 + $0x1], 4294950912  ;;  %1026 = vmatprep.mubr.f32.mxu0 %v8485_v1  ;;  %1097 = vmatprep.mubr.f32.mxu1 %v8485_v1  ;;  %4088 = vst [vmem:[#allocation14] sm:$0xff] %v7208_v54  ;;  %v899_v5 = vld [vmem:[#allocation2 + $0x8] sm:$0xff]  ;;  %v898_v8 = vld [vmem:[#allocation2] sm:$0xff]  ;;  %vm3968_vm1 = vcmask 1040384  }
 0x409   :  { %4089 = vst [vmem:[#allocation16] sm:$0x1] %v7154_v15  ;;  %4090 = vst [vmem:[#allocation17] sm:$0x1] %v7149_v7  ;;  %v903_v6 = vld [vmem:[#allocation2 + $0x28] sm:$0xff]  ;;  %v902_v10 = vld [vmem:[#allocation2 + $0x20] sm:$0xff] }
 0x40a   :  { %v7228_v9 = vpack.c.bf16 %v903_v6, %v899_v5  ;;  %v907_v11 = vld [vmem:[#allocation2 + $0x48] sm:$0xff]  ;;  %v7230_v14 = vpack.c.bf16 %v902_v10, %v898_v8  ;;  %v906_v18 = vld [vmem:[#allocation2 + $0x40] sm:$0xff]  ;;  %v901_v25 = vld [vmem:[#allocation2 + $0x18] sm:$0xff]  ;;  %vm3970_vm2 = vcmask 1041408   ;;  %vm3972_vm3 = vcmask 1042432   ;;  %s6970_s14 = smov [#allocation17]  }
 0x40b   :  { %v911_v12 = vld [vmem:[#allocation2 + $0x68] sm:$0xff]  ;;  %v910_v19 = vld [vmem:[#allocation2 + $0x60] sm:$0xff]  ;;  %v905_v26 = vld [vmem:[#allocation2 + $0x38] sm:$0xff]  ;;  %vm3974_vm4 = vcmask 1043456   ;;  %vm3976_vm5 = vcmask 1044480   ;;  %vm3978_vm6 = vcmask 1045504  }
 0x40c   :  { %8638 = vst [vmem:[#allocation43_spill] sm:$0xff] %v7228_v9  ;;  %v7232_v17 = vpack.c.bf16 %v911_v12, %v907_v11  ;;  %v915_v20 = vld [vmem:[#allocation2 + $0x88] sm:$0xff]  ;;  %4825 = vmatprep.subr.bf16.mxu0 %v7228_v9  ;;  %v7236_v7 = vpack.c.bf16 %v910_v19, %v906_v18  ;;  %v914_v21 = vld [vmem:[#allocation2 + $0x80] sm:$0xff]  ;;  %v7241_v28 = vpack.c.bf16 %v905_v26, %v901_v25  ;;  %v900_v29 = vld [vmem:[#allocation2 + $0x10] sm:$0xff]  ;;  %vm3980_vm7 = vcmask 1046528   ;;  %s4139_s15 = sshll.u32 %s6970_s14, 4  ;;  %s4140_s15 = int_to_ptr.vmem [resolvable:$true] %s4139_s15 }
 0x40d   :  { %v919_v15 = vld [vmem:[#allocation2 + $0xa8] sm:$0xff]  ;;  %4827 = vmatpush1.bf16.msra.mxu0 %v7230_v14  ;;  %v918_v22 = vld [vmem:[#allocation2 + $0xa0] sm:$0xff]  ;;  %v904_v30 = vld [vmem:[#allocation2 + $0x30] sm:$0xff] }
 0x40e   :  { %4829 = vmatprep.subr.bf16.mxu0 %v7232_v17  ;;  %v7239_v23 = vpack.c.bf16 %v919_v15, %v915_v20  ;;  %v923_v24 = vld [vmem:[#allocation2 + $0xc8] sm:$0xff]  ;;  %8639 = vst [vmem:[#allocation44_spill] sm:$0xff] %v7241_v28  ;;  %v7243_v31 = vpack.c.bf16 %v904_v30, %v900_v29  ;;  %v7246_v32 = vpack.c.bf16 %v918_v22, %v914_v21  ;;  %v909_v33 = vld [vmem:[#allocation2 + $0x58] sm:$0xff]  ;;  %v908_v35 = vld [vmem:[#allocation2 + $0x50] sm:$0xff] }
 0x40f   :  { %v927_v27 = vld [vmem:[#allocation2 + $0xe8] sm:$0xff]  ;;  %4857 = vmatprep.subr.bf16.mxu1 %v7241_v28  ;;  %v913_v34 = vld [vmem:[#allocation2 + $0x78] sm:$0xff]  ;;  %v922_v37 = vld [vmem:[#allocation2 + $0xc0] sm:$0xff] }
 0x410   :  { %v7250_v36 = vpack.c.bf16 %v927_v27, %v923_v24  ;;  %v926_v38 = vld [vmem:[#allocation2 + $0xe0] sm:$0xff]  ;;  %4859 = vmatpush1.bf16.msra.mxu1 %v7243_v31  ;;  %v7253_v39 = vpack.c.bf16 %v913_v34, %v909_v33  ;;  %v912_v40 = vld [vmem:[#allocation2 + $0x70] sm:$0xff]  ;;  %v931_v41 = vld [vmem:[#allocation2 + $0x108] sm:$0xff] }
 0x411   :  { %4831 = vmatpush1.bf16.msra.mxu0 %v7236_v7  ;;  %v935_v42 = vld [vmem:[#allocation2 + $0x128] sm:$0xff]  ;;  %v7255_v43 = vpack.c.bf16 %v912_v40, %v908_v35  ;;  %v917_v44 = vld [vmem:[#allocation2 + $0x98] sm:$0xff]  ;;  %v916_v46 = vld [vmem:[#allocation2 + $0x90] sm:$0xff]  ;;  %v7259_v48 = vpack.c.bf16 %v926_v38, %v922_v37 }
 0x412   :  { %4833 = vmatprep.subr.bf16.mxu0 %v7239_v23  ;;  %4861 = vmatprep.subr.bf16.mxu1 %v7253_v39  ;;  %v921_v45 = vld [vmem:[#allocation2 + $0xb8] sm:$0xff]  ;;  %v920_v47 = vld [vmem:[#allocation2 + $0xb0] sm:$0xff]  ;;  %v930_v50 = vld [vmem:[#allocation2 + $0x100] sm:$0xff]  ;;  %v7264_v56 = vpack.c.bf16 %v935_v42, %v931_v41 }
 0x413   :  { %v934_v53 = vld [vmem:[#allocation2 + $0x120] sm:$0xff]  ;;  %v7261_v55 = vpack.c.bf16 %v921_v45, %v917_v44  ;;  %v939_v57 = vld [vmem:[#allocation2 + $0x148] sm:$0xff]  ;;  %v7267_v58 = vpack.c.bf16 %v920_v47, %v916_v46  ;;  %v925_v60 = vld [vmem:[#allocation2 + $0xd8] sm:$0xff] }
 0x414   :  { %4863 = vmatpush1.bf16.msra.mxu1 %v7255_v43  ;;  %v929_v61 = vld [vmem:[#allocation2 + $0xf8] sm:$0xff]  ;;  %v943_v3 = vld [vmem:[#allocation2 + $0x168] sm:$0xff]  ;;  %v924_v6 = vld [vmem:[#allocation2 + $0xd0] sm:$0xff]  ;;  %v7273_v10 = vpack.c.bf16 %v934_v53, %v930_v50 }
 0x415   :  { %4835 = vmatpush1.bf16.msra.mxu0 %v7246_v32  ;;  %4865 = vmatprep.subr.bf16.mxu1 %v7261_v55  ;;  %v7270_v5 = vpack.c.bf16 %v929_v61, %v925_v60  ;;  %v928_v8 = vld [vmem:[#allocation2 + $0xf0] sm:$0xff]  ;;  %v933_v11 = vld [vmem:[#allocation2 + $0x118] sm:$0xff]  ;;  %v7276_v18 = vpack.c.bf16 %v943_v3, %v939_v57  ;;  %v938_v19 = vld [vmem:[#allocation2 + $0x140] sm:$0xff] }
 0x416   :  { %4837 = vmatprep.subr.bf16.mxu0 %v7250_v36  ;;  %v937_v12 = vld [vmem:[#allocation2 + $0x138] sm:$0xff]  ;;  %v942_v20 = vld [vmem:[#allocation2 + $0x160] sm:$0xff]  ;;  %v947_v15 = vld [vmem:[#allocation2 + $0x188] sm:$0xff]  ;;  %v7279_v21 = vpack.c.bf16 %v928_v8, %v924_v6 }
 0x417   :  { %v951_v22 = vld [vmem:[#allocation2 + $0x1a8] sm:$0xff]  ;;  %v7282_v24 = vpack.c.bf16 %v937_v12, %v933_v11  ;;  %v932_v25 = vld [vmem:[#allocation2 + $0x110] sm:$0xff]  ;;  %v941_v27 = vld [vmem:[#allocation2 + $0x158] sm:$0xff]  ;;  %v7285_v30 = vpack.c.bf16 %v942_v20, %v938_v19 }
 0x418   :  { %4867 = vmatpush1.bf16.msra.mxu1 %v7267_v58  ;;  %v936_v26 = vld [vmem:[#allocation2 + $0x130] sm:$0xff]  ;;  %v945_v29 = vld [vmem:[#allocation2 + $0x178] sm:$0xff]  ;;  %v7288_v33 = vpack.c.bf16 %v951_v22, %v947_v15  ;;  %v946_v34 = vld [vmem:[#allocation2 + $0x180] sm:$0xff] }
 0x419   :  { %4839 = vmatpush1.bf16.msra.mxu0 %v7259_v48  ;;  %4869 = vmatprep.subr.bf16.mxu1 %v7270_v5  ;;  %v950_v35 = vld [vmem:[#allocation2 + $0x1a0] sm:$0xff]  ;;  %v955_v37 = vld [vmem:[#allocation2 + $0x1c8] sm:$0xff]  ;;  %v7291_v38 = vpack.c.bf16 %v936_v26, %v932_v25  ;;  %v7294_v41 = vpack.c.bf16 %v945_v29, %v941_v27  ;;  %v940_v42 = vld [vmem:[#allocation2 + $0x150] sm:$0xff] }
 0x41a   :  { %4841 = vmatprep.subr.bf16.mxu0 %v7264_v56  ;;  %v959_v40 = vld [vmem:[#allocation2 + $0x1e8] sm:$0xff]  ;;  %v944_v44 = vld [vmem:[#allocation2 + $0x170] sm:$0xff]  ;;  %v949_v45 = vld [vmem:[#allocation2 + $0x198] sm:$0xff]  ;;  %v7297_v47 = vpack.c.bf16 %v950_v35, %v946_v34 }
 0x41b   :  { %v953_v46 = vld [vmem:[#allocation2 + $0x1b8] sm:$0xff]  ;;  %v7300_v50 = vpack.c.bf16 %v959_v40, %v955_v37  ;;  %v954_v53 = vld [vmem:[#allocation2 + $0x1c0] sm:$0xff]  ;;  %v7303_v60 = vpack.c.bf16 %v944_v44, %v940_v42  ;;  %v948_v61 = vld [vmem:[#allocation2 + $0x190] sm:$0xff] }
 0x41c   :  { %4871 = vmatpush1.bf16.msra.mxu1 %v7279_v21  ;;  %v958_v57 = vld [vmem:[#allocation2 + $0x1e0] sm:$0xff]  ;;  %v7306_v3 = vpack.c.bf16 %v953_v46, %v949_v45  ;;  %v952_v6 = vld [vmem:[#allocation2 + $0x1b0] sm:$0xff]  ;;  %v1133_v8 = vld [vmem:[#allocation3 + $0x8] sm:$0xff] }
 0x41d   :  { %4843 = vmatpush1.bf16.msra.mxu0 %v7273_v10  ;;  %4873 = vmatprep.subr.bf16.mxu1 %v7282_v24  ;;  %v1137_v11 = vld [vmem:[#allocation3 + $0x28] sm:$0xff]  ;;  %v957_v12 = vld [vmem:[#allocation2 + $0x1d8] sm:$0xff]  ;;  %v7309_v20 = vpack.c.bf16 %v958_v57, %v954_v53  ;;  %v7313_v15 = vpack.c.bf16 %v952_v6, %v948_v61  ;;  %v956_v22 = vld [vmem:[#allocation2 + $0x1d0] sm:$0xff] }
 0x41e   :  { %4845 = vmatprep.subr.bf16.mxu0 %v7276_v18  ;;  %v961_v19 = vld [vmem:[#allocation2 + $0x1f8] sm:$0xff]  ;;  %v7315_v25 = vpack.c.bf16 %v1137_v11, %v1133_v8  ;;  %v1132_v26 = vld [vmem:[#allocation3] sm:$0xff]  ;;  %v960_v34 = vld [vmem:[#allocation2 + $0x1f0] sm:$0xff] }
 0x41f   :  { %v1136_v27 = vld [vmem:[#allocation3 + $0x20] sm:$0xff]  ;;  %v7318_v29 = vpack.c.bf16 %v961_v19, %v957_v12  ;;  %v1141_v35 = vld [vmem:[#allocation3 + $0x48] sm:$0xff]  ;;  %v1135_v40 = vld [vmem:[#allocation3 + $0x18] sm:$0xff]  ;;  %v7324_v45 = vpack.c.bf16 %v960_v34, %v956_v22 }
 0x420   :  { %4875 = vmatpush1.bf16.msra.mxu1 %v7291_v38  ;;  %v1145_v37 = vld [vmem:[#allocation3 + $0x68] sm:$0xff]  ;;  %v1139_v42 = vld [vmem:[#allocation3 + $0x38] sm:$0xff]  ;;  %v7321_v44 = vpack.c.bf16 %v1136_v27, %v1132_v26  ;;  %v1134_v46 = vld [vmem:[#allocation3 + $0x10] sm:$0xff] }
 0x421   :  { %4847 = vmatpush1.bf16.msra.mxu0 %v7285_v30  ;;  %4877 = vmatprep.subr.bf16.mxu1 %v7294_v41  ;;  %v7327_v53 = vpack.c.bf16 %v1145_v37, %v1141_v35  ;;  %v1140_v57 = vld [vmem:[#allocation3 + $0x40] sm:$0xff]  ;;  %v7330_v6 = vpack.c.bf16 %v1139_v42, %v1135_v40  ;;  %v1138_v8 = vld [vmem:[#allocation3 + $0x30] sm:$0xff]  ;;  %v1149_v11 = vld [vmem:[#allocation3 + $0x88] sm:$0xff] }
 0x422   :  { %4849 = vmatprep.subr.bf16.mxu0 %v7288_v33  ;;  %v1144_v61 = vld [vmem:[#allocation3 + $0x60] sm:$0xff]  ;;  %v1153_v12 = vld [vmem:[#allocation3 + $0xa8] sm:$0xff]  ;;  %v1143_v19 = vld [vmem:[#allocation3 + $0x58] sm:$0xff]  ;;  %v7338_v27 = vpack.c.bf16 %v1138_v8, %v1134_v46 }
 0x423   :  { %v1147_v26 = vld [vmem:[#allocation3 + $0x78] sm:$0xff]  ;;  %v7334_v22 = vpack.c.bf16 %v1144_v61, %v1140_v57  ;;  %v1142_v34 = vld [vmem:[#allocation3 + $0x50] sm:$0xff]  ;;  %v7341_v35 = vpack.c.bf16 %v1153_v12, %v1149_v11  ;;  %v1148_v37 = vld [vmem:[#allocation3 + $0x80] sm:$0xff] }
 0x424   :  { %4879 = vmatpush1.bf16.msra.mxu1 %v7303_v60  ;;  %v1152_v40 = vld [vmem:[#allocation3 + $0xa0] sm:$0xff]  ;;  %v7344_v42 = vpack.c.bf16 %v1147_v26, %v1143_v19  ;;  %v1146_v0 = vld [vmem:[#allocation3 + $0x70] sm:$0xff]  ;;  %v1157_v57 = vld [vmem:[#allocation3 + $0xc8] sm:$0xff] }
 0x425   :  { %4851 = vmatpush1.bf16.msra.mxu0 %v7297_v47  ;;  %4881 = vmatprep.subr.bf16.mxu1 %v7306_v3  ;;  %8640 = vst [vmem:[#allocation45_spill] sm:$0xff] %v7334_v22  ;;  %8641 = vst [vmem:[#allocation46_spill] sm:$0xff] %v7341_v35  ;;  %v1161_v61 = vld [vmem:[#allocation3 + $0xe8] sm:$0xff]  ;;  %v1151_v49 = vld [vmem:[#allocation3 + $0x98] sm:$0xff]  ;;  %v7348_v46 = vpack.c.bf16 %v1152_v40, %v1148_v37  ;;  %v7351_v8 = vpack.c.bf16 %v1146_v0, %v1142_v34  ;;  %v8646_v37 = vmov 0.0  }
 0x426   :  { %4853 = vmatprep.subr.bf16.mxu0 %v7300_v50  ;;  %v1155_v51 = vld [vmem:[#allocation3 + $0xb8] sm:$0xff]  ;;  %v1150_v11 = vld [vmem:[#allocation3 + $0x90] sm:$0xff]  ;;  %v7354_v12 = vpack.c.bf16 %v1161_v61, %v1157_v57  ;;  %v1156_v19 = vld [vmem:[#allocation3 + $0xc0] sm:$0xff] }
 0x427   :  { %8642 = vst [vmem:[#allocation47_spill] sm:$0xff] %v7348_v46  ;;  %8643 = vst [vmem:[#allocation48_spill] sm:$0xff] %v7351_v8  ;;  %v1160_v26 = vld [vmem:[#allocation3 + $0xe0] sm:$0xff]  ;;  %v7357_v52 = vpack.c.bf16 %v1155_v51, %v1151_v49  ;;  %v1165_v54 = vld [vmem:[#allocation3 + $0x108] sm:$0xff] }
 0x428   :  { %4883 = vmatpush1.bf16.msra.mxu1 %v7313_v15  ;;  %8644 = vst [vmem:[#allocation49_spill] sm:$0xff] %v7354_v12  ;;  %v1169_v13 = vld [vmem:[#allocation3 + $0x128] sm:$0xff]  ;;  %v1159_v40 = vld [vmem:[#allocation3 + $0xd8] sm:$0xff]  ;;  %v7361_v0 = vpack.c.bf16 %v1160_v26, %v1156_v19  ;;  %v1164_v49 = vld [vmem:[#allocation3 + $0x100] sm:$0xff] }
 0x429   :  { %4855 = vmatpush1.bf16.msra.mxu0 %v7309_v20  ;;  %4885 = vmatprep.subr.bf16.mxu1 %v7318_v29  ;;  %8645 = vst [vmem:[#allocation50_spill] sm:$0xff] %v7357_v52  ;;  %v1163_v2 = vld [vmem:[#allocation3 + $0xf8] sm:$0xff]  ;;  %v7367_v57 = vpack.c.bf16 %v1169_v13, %v1165_v54  ;;  %v1168_v51 = vld [vmem:[#allocation3 + $0x120] sm:$0xff]  ;;  %v1158_v16 = vld [vmem:[#allocation3 + $0xd0] sm:$0xff] }
 0x42a   :  { %4889 = vmatprep.subr.bf16.mxu0 %v7315_v25  ;;  %8647 = vst [vmem:[#allocation51_spill] sm:$0xff] %v7361_v0  ;;  %v7370_v61 = vpack.c.bf16 %v1163_v2, %v1159_v40  ;;  %v7373_v19 = vpack.c.bf16 %v1168_v51, %v1164_v49  ;;  %v1166_v2 = vld [vmem:[#allocation3 + $0x110] sm:$0xff]  ;;  %v1175_v26 = vld [vmem:[#allocation3 + $0x158] sm:$0xff] }
 0x42b   :  { %8649 = vst [vmem:[#allocation53_spill] sm:$0xff] %v7367_v57  ;;  %v1170_v54 = vld [vmem:[#allocation3 + $0x130] sm:$0xff]  ;;  %v1179_v49 = vld [vmem:[#allocation3 + $0x178] sm:$0xff] }
 0x42c   :  { %1027 = vmatmul.mubr.f32.vlgmr.msra.gmra.mrb[8].mxu0 %v8485_v1  ;;  %4887 = vmatpush1.bf16.msra.mxu1 %v7324_v45  ;;  %8650 = vst [vmem:[#allocation54_spill] sm:$0xff] %v7370_v61  ;;  %8651 = vst [vmem:[#allocation55_spill] sm:$0xff] %v7373_v19  ;;  %v7390_v51 = vpack.c.bf16 %v1179_v49, %v1175_v26  ;;  %v1187_v26 = vld [vmem:[#allocation3 + $0x1b8] sm:$0xff]  ;;  %v1180_v49 = vld [vmem:[#allocation3 + $0x180] sm:$0xff] }
 0x42d   :  { %4891 = vmatpush1.bf16.msra.mxu0 %v7321_v44  ;;  %1345 = vmatprep.mubr.f32.mxu0 %v8485_v1 }
 0x42e   :  { %4893 = vmatprep.subr.bf16.mxu0 %v7327_v53  ;;  %4953 = vmatprep.subr.bf16.mxu1 %v7330_v6  ;;  %8656 = vst [vmem:[#allocation60_spill] sm:$0xff] %v7390_v51 }
 0x42f   :  { %1098 = vmatmul.mubr.f32.vlgmr.msra.gmra.mrb[8].mxu1 %v8485_v1  ;;  %v1154_v1 = vld [vmem:[#allocation3 + $0xb0] sm:$0xff] }
 0x430   :  { %4955 = vmatpush1.bf16.msra.mxu1 %v7338_v27  ;;  %1416 = vmatprep.mubr.f32.mxu1 %v8646_v37  ;;  %v7364_v34 = vpack.c.bf16 %v1154_v1, %v1150_v11  ;;  %v7384_v11 = vpack.c.bf16 %v1170_v54, %v1166_v2  ;;  %v1181_v54 = vld [vmem:[#allocation3 + $0x188] sm:$0xff] }
 0x431   :  { %4895 = vmatpush1.bf16.msra.mxu0 %v7334_v22  ;;  %4957 = vmatprep.subr.bf16.mxu1 %v7344_v42  ;;  %v1167_v22 = vld [vmem:[#allocation3 + $0x118] sm:$0xff] }
 0x432   :  { %4897 = vmatprep.subr.bf16.mxu0 %v7341_v35  ;;  %8648 = vst [vmem:[#allocation52_spill] sm:$0xff] %v7364_v34  ;;  %v1162_v35 = vld [vmem:[#allocation3 + $0xf0] sm:$0xff]  ;;  %8654 = vst [vmem:[#allocation58_spill] sm:$0xff] %v7384_v11 }
 0x433   :  { %v7376_v1 = vpack.c.bf16 %v1162_v35, %v1158_v16  ;;  %v1173_v16 = vld [vmem:[#allocation3 + $0x148] sm:$0xff] }
 0x434   :  { %4959 = vmatpush1.bf16.msra.mxu1 %v7351_v8  ;;  %v1177_v35 = vld [vmem:[#allocation3 + $0x168] sm:$0xff] }
 0x435   :  { %4899 = vmatpush1.bf16.msra.mxu0 %v7348_v46  ;;  %4961 = vmatprep.subr.bf16.mxu1 %v7357_v52  ;;  %v1171_v46 = vld [vmem:[#allocation3 + $0x138] sm:$0xff]  ;;  %8652 = vst [vmem:[#allocation56_spill] sm:$0xff] %v7376_v1  ;;  %v7388_v40 = vpack.c.bf16 %v1177_v35, %v1173_v16  ;;  %v1185_v16 = vld [vmem:[#allocation3 + $0x1a8] sm:$0xff] }
 0x436   :  { %4901 = vmatprep.subr.bf16.mxu0 %v7354_v12  ;;  %v7380_v13 = vpack.c.bf16 %v1171_v46, %v1167_v22  ;;  %v1172_v22 = vld [vmem:[#allocation3 + $0x140] sm:$0xff]  ;;  %v1183_v35 = vld [vmem:[#allocation3 + $0x198] sm:$0xff] }
 0x437   :  { %8655 = vst [vmem:[#allocation59_spill] sm:$0xff] %v7388_v40  ;;  %v1176_v46 = vld [vmem:[#allocation3 + $0x160] sm:$0xff] }
 0x438   :  { %4963 = vmatpush1.bf16.msra.mxu1 %v7364_v34  ;;  %8653 = vst [vmem:[#allocation57_spill] sm:$0xff] %v7380_v13 }
 0x439   :  { %4903 = vmatpush1.bf16.msra.mxu0 %v7361_v0  ;;  %4965 = vmatprep.subr.bf16.mxu1 %v7370_v61  ;;  %v1247_v0 = vld [vmem:[#allocation3 + $0x398] sm:$0xff] }
 0x43a   :  { %4905 = vmatprep.subr.bf16.mxu0 %v7367_v57  ;;  %v7392_v57 = vpack.c.bf16 %v1176_v46, %v1172_v22  ;;  %v1184_v22 = vld [vmem:[#allocation3 + $0x1a0] sm:$0xff]  ;;  %v7402_v46 = vpack.c.bf16 %v1187_v26, %v1183_v35  ;;  %v1195_v35 = vld [vmem:[#allocation3 + $0x1f8] sm:$0xff] }
 0x43b   :  { %v1188_v26 = vld [vmem:[#allocation3 + $0x1c0] sm:$0xff] }
 0x43c   :  { %4967 = vmatpush1.bf16.msra.mxu1 %v7376_v1  ;;  %8657 = vst [vmem:[#allocation61_spill] sm:$0xff] %v7392_v57  ;;  %v1178_v1 = vld [vmem:[#allocation3 + $0x170] sm:$0xff]  ;;  %8660 = vst [vmem:[#allocation64_spill] sm:$0xff] %v7402_v46 }
 0x43d   :  { %4907 = vmatpush1.bf16.msra.mxu0 %v7373_v19  ;;  %4969 = vmatprep.subr.bf16.mxu1 %v7380_v13  ;;  %v1174_v19 = vld [vmem:[#allocation3 + $0x150] sm:$0xff]  ;;  %v7404_v13 = vpack.c.bf16 %v1184_v22, %v1180_v49  ;;  %v1192_v49 = vld [vmem:[#allocation3 + $0x1e0] sm:$0xff] }
 0x43e   :  { %4909 = vmatprep.subr.bf16.mxu0 %v7388_v40  ;;  %v7395_v2 = vpack.c.bf16 %v1178_v1, %v1174_v19  ;;  %v1182_v19 = vld [vmem:[#allocation3 + $0x190] sm:$0xff]  ;;  %v7416_v40 = vpack.c.bf16 %v1192_v49, %v1188_v26  ;;  %v1200_v26 = vld [vmem:[#allocation3 + $0x220] sm:$0xff] }
 0x43f   :  { %8661 = vst [vmem:[#allocation65_spill] sm:$0xff] %v7404_v13  ;;  %v1186_v1 = vld [vmem:[#allocation3 + $0x1b0] sm:$0xff] }
 0x440   :  { %4971 = vmatpush1.bf16.msra.mxu1 %v7384_v11  ;;  %8658 = vst [vmem:[#allocation62_spill] sm:$0xff] %v7395_v2  ;;  %v7400_v11 = vpack.c.bf16 %v1185_v16, %v1181_v54  ;;  %v1193_v54 = vld [vmem:[#allocation3 + $0x1e8] sm:$0xff]  ;;  %v1191_v16 = vld [vmem:[#allocation3 + $0x1d8] sm:$0xff]  ;;  %8665 = vst [vmem:[#allocation69_spill] sm:$0xff] %v7416_v40 }
 0x441   :  { %4973 = vmatprep.subr.bf16.mxu1 %v7390_v51  ;;  %4911 = vmatpush1.bf16.msra.mxu0 %v7392_v57  ;;  %v7407_v51 = vpack.c.bf16 %v1186_v1, %v1182_v19  ;;  %v7414_v22 = vpack.c.bf16 %v1195_v35, %v1191_v16  ;;  %v1190_v19 = vld [vmem:[#allocation3 + $0x1d0] sm:$0xff]  ;;  %v1203_v16 = vld [vmem:[#allocation3 + $0x238] sm:$0xff]  ;;  %v1196_v35 = vld [vmem:[#allocation3 + $0x200] sm:$0xff] }
 0x442   :  { %8659 = vst [vmem:[#allocation63_spill] sm:$0xff] %v7400_v11  ;;  %4913 = vmatprep.subr.bf16.mxu0 %v7400_v11  ;;  %v1194_v1 = vld [vmem:[#allocation3 + $0x1f0] sm:$0xff]  ;;  %v7428_v11 = vpack.c.bf16 %v1200_v26, %v1196_v35  ;;  %v1208_v35 = vld [vmem:[#allocation3 + $0x260] sm:$0xff] }
 0x443   :  { %8662 = vst [vmem:[#allocation66_spill] sm:$0xff] %v7407_v51  ;;  %8664 = vst [vmem:[#allocation68_spill] sm:$0xff] %v7414_v22 }
 0x444   :  { %4975 = vmatpush1.bf16.msra.mxu1 %v7395_v2  ;;  %v1189_v2 = vld [vmem:[#allocation3 + $0x1c8] sm:$0xff]  ;;  %8669 = vst [vmem:[#allocation73_spill] sm:$0xff] %v7428_v11 }
 0x445   :  { %4977 = vmatprep.subr.bf16.mxu1 %v7402_v46  ;;  %4915 = vmatpush1.bf16.msra.mxu0 %v7404_v13  ;;  %v7412_v57 = vpack.c.bf16 %v1193_v54, %v1189_v2  ;;  %v7419_v46 = vpack.c.bf16 %v1194_v1, %v1190_v19  ;;  %v1201_v2 = vld [vmem:[#allocation3 + $0x228] sm:$0xff]  ;;  %v1199_v54 = vld [vmem:[#allocation3 + $0x218] sm:$0xff]  ;;  %v1198_v19 = vld [vmem:[#allocation3 + $0x210] sm:$0xff] }
 0x446   :  { %v7426_v49 = vpack.c.bf16 %v1203_v16, %v1199_v54  ;;  %v1202_v1 = vld [vmem:[#allocation3 + $0x230] sm:$0xff]  ;;  %v1211_v54 = vld [vmem:[#allocation3 + $0x278] sm:$0xff]  ;;  %v1204_v16 = vld [vmem:[#allocation3 + $0x240] sm:$0xff] }
 0x447   :  { %8663 = vst [vmem:[#allocation67_spill] sm:$0xff] %v7412_v57  ;;  %4917 = vmatprep.subr.bf16.mxu0 %v7412_v57  ;;  %8666 = vst [vmem:[#allocation70_spill] sm:$0xff] %v7419_v46  ;;  %v7440_v57 = vpack.c.bf16 %v1208_v35, %v1204_v16  ;;  %v1216_v16 = vld [vmem:[#allocation3 + $0x2a0] sm:$0xff] }
 0x448   :  { %4979 = vmatpush1.bf16.msra.mxu1 %v7407_v51  ;;  %v1197_v51 = vld [vmem:[#allocation3 + $0x208] sm:$0xff]  ;;  %8668 = vst [vmem:[#allocation72_spill] sm:$0xff] %v7426_v49 }
 0x449   :  { %4981 = vmatprep.subr.bf16.mxu1 %v7414_v22  ;;  %4919 = vmatpush1.bf16.msra.mxu0 %v7416_v40  ;;  %v7424_v13 = vpack.c.bf16 %v1201_v2, %v1197_v51  ;;  %v7431_v22 = vpack.c.bf16 %v1202_v1, %v1198_v19  ;;  %v1209_v51 = vld [vmem:[#allocation3 + $0x268] sm:$0xff]  ;;  %v1207_v2 = vld [vmem:[#allocation3 + $0x258] sm:$0xff]  ;;  %8673 = vst [vmem:[#allocation77_spill] sm:$0xff] %v7440_v57  ;;  %v1206_v19 = vld [vmem:[#allocation3 + $0x250] sm:$0xff] }
 0x44a   :  { %v7438_v26 = vpack.c.bf16 %v1211_v54, %v1207_v2  ;;  %v1210_v1 = vld [vmem:[#allocation3 + $0x270] sm:$0xff]  ;;  %v1219_v2 = vld [vmem:[#allocation3 + $0x2b8] sm:$0xff]  ;;  %v1212_v54 = vld [vmem:[#allocation3 + $0x280] sm:$0xff] }
 0x44b   :  { %8667 = vst [vmem:[#allocation71_spill] sm:$0xff] %v7424_v13  ;;  %4921 = vmatprep.subr.bf16.mxu0 %v7424_v13  ;;  %8670 = vst [vmem:[#allocation74_spill] sm:$0xff] %v7431_v22  ;;  %v7452_v13 = vpack.c.bf16 %v1216_v16, %v1212_v54  ;;  %v1224_v54 = vld [vmem:[#allocation3 + $0x2e0] sm:$0xff] }
 0x44c   :  { %4983 = vmatpush1.bf16.msra.mxu1 %v7419_v46  ;;  %v1205_v46 = vld [vmem:[#allocation3 + $0x248] sm:$0xff]  ;;  %8672 = vst [vmem:[#allocation76_spill] sm:$0xff] %v7438_v26 }
 0x44d   :  { %4985 = vmatprep.subr.bf16.mxu1 %v7426_v49  ;;  %4923 = vmatpush1.bf16.msra.mxu0 %v7428_v11  ;;  %v7436_v40 = vpack.c.bf16 %v1209_v51, %v1205_v46  ;;  %v7443_v49 = vpack.c.bf16 %v1210_v1, %v1206_v19  ;;  %v1217_v46 = vld [vmem:[#allocation3 + $0x2a8] sm:$0xff]  ;;  %v1215_v51 = vld [vmem:[#allocation3 + $0x298] sm:$0xff]  ;;  %8677 = vst [vmem:[#allocation81_spill] sm:$0xff] %v7452_v13  ;;  %v1214_v19 = vld [vmem:[#allocation3 + $0x290] sm:$0xff] }
 0x44e   :  { %v7450_v35 = vpack.c.bf16 %v1219_v2, %v1215_v51  ;;  %v1218_v1 = vld [vmem:[#allocation3 + $0x2b0] sm:$0xff]  ;;  %v1227_v51 = vld [vmem:[#allocation3 + $0x2f8] sm:$0xff]  ;;  %v1220_v2 = vld [vmem:[#allocation3 + $0x2c0] sm:$0xff] }
 0x44f   :  { %8671 = vst [vmem:[#allocation75_spill] sm:$0xff] %v7436_v40  ;;  %4925 = vmatprep.subr.bf16.mxu0 %v7436_v40  ;;  %8674 = vst [vmem:[#allocation78_spill] sm:$0xff] %v7443_v49  ;;  %v7464_v40 = vpack.c.bf16 %v1224_v54, %v1220_v2  ;;  %v1232_v2 = vld [vmem:[#allocation3 + $0x320] sm:$0xff] }
 0x450   :  { %4987 = vmatpush1.bf16.msra.mxu1 %v7431_v22  ;;  %v1213_v22 = vld [vmem:[#allocation3 + $0x288] sm:$0xff]  ;;  %8676 = vst [vmem:[#allocation80_spill] sm:$0xff] %v7450_v35 }
 0x451   :  { %4989 = vmatprep.subr.bf16.mxu1 %v7438_v26  ;;  %4927 = vmatpush1.bf16.msra.mxu0 %v7440_v57  ;;  %v7448_v11 = vpack.c.bf16 %v1217_v46, %v1213_v22  ;;  %v7455_v26 = vpack.c.bf16 %v1218_v1, %v1214_v19  ;;  %v1225_v22 = vld [vmem:[#allocation3 + $0x2e8] sm:$0xff]  ;;  %v1223_v46 = vld [vmem:[#allocation3 + $0x2d8] sm:$0xff]  ;;  %8681 = vst [vmem:[#allocation85_spill] sm:$0xff] %v7464_v40  ;;  %v1222_v19 = vld [vmem:[#allocation3 + $0x2d0] sm:$0xff] }
 0x452   :  { %v7462_v16 = vpack.c.bf16 %v1227_v51, %v1223_v46  ;;  %v1226_v1 = vld [vmem:[#allocation3 + $0x2f0] sm:$0xff]  ;;  %v1235_v46 = vld [vmem:[#allocation3 + $0x338] sm:$0xff]  ;;  %v1228_v51 = vld [vmem:[#allocation3 + $0x300] sm:$0xff] }
 0x453   :  { %8675 = vst [vmem:[#allocation79_spill] sm:$0xff] %v7448_v11  ;;  %4929 = vmatprep.subr.bf16.mxu0 %v7448_v11  ;;  %8678 = vst [vmem:[#allocation82_spill] sm:$0xff] %v7455_v26  ;;  %v7476_v11 = vpack.c.bf16 %v1232_v2, %v1228_v51  ;;  %v1240_v51 = vld [vmem:[#allocation3 + $0x360] sm:$0xff] }
 0x454   :  { %4991 = vmatpush1.bf16.msra.mxu1 %v7443_v49  ;;  %v1221_v49 = vld [vmem:[#allocation3 + $0x2c8] sm:$0xff]  ;;  %8680 = vst [vmem:[#allocation84_spill] sm:$0xff] %v7462_v16 }
 0x455   :  { %4993 = vmatprep.subr.bf16.mxu1 %v7450_v35  ;;  %4931 = vmatpush1.bf16.msra.mxu0 %v7452_v13  ;;  %v7460_v57 = vpack.c.bf16 %v1225_v22, %v1221_v49  ;;  %v7467_v35 = vpack.c.bf16 %v1226_v1, %v1222_v19  ;;  %v1233_v49 = vld [vmem:[#allocation3 + $0x328] sm:$0xff]  ;;  %v1231_v22 = vld [vmem:[#allocation3 + $0x318] sm:$0xff]  ;;  %8685 = vst [vmem:[#allocation89_spill] sm:$0xff] %v7476_v11  ;;  %v1230_v19 = vld [vmem:[#allocation3 + $0x310] sm:$0xff] }
 0x456   :  { %v7474_v54 = vpack.c.bf16 %v1235_v46, %v1231_v22  ;;  %v1234_v1 = vld [vmem:[#allocation3 + $0x330] sm:$0xff]  ;;  %v1243_v22 = vld [vmem:[#allocation3 + $0x378] sm:$0xff]  ;;  %v1236_v46 = vld [vmem:[#allocation3 + $0x340] sm:$0xff] }
 0x457   :  { %8679 = vst [vmem:[#allocation83_spill] sm:$0xff] %v7460_v57  ;;  %4933 = vmatprep.subr.bf16.mxu0 %v7460_v57  ;;  %8682 = vst [vmem:[#allocation86_spill] sm:$0xff] %v7467_v35  ;;  %v7488_v57 = vpack.c.bf16 %v1240_v51, %v1236_v46 }
 0x458   :  { %4995 = vmatpush1.bf16.msra.mxu1 %v7455_v26  ;;  %v1229_v26 = vld [vmem:[#allocation3 + $0x308] sm:$0xff]  ;;  %8684 = vst [vmem:[#allocation88_spill] sm:$0xff] %v7474_v54 }
 0x459   :  { %4997 = vmatprep.subr.bf16.mxu1 %v7462_v16  ;;  %4935 = vmatpush1.bf16.msra.mxu0 %v7464_v40  ;;  %v7472_v13 = vpack.c.bf16 %v1233_v49, %v1229_v26  ;;  %v7479_v16 = vpack.c.bf16 %v1234_v1, %v1230_v19  ;;  %v1241_v26 = vld [vmem:[#allocation3 + $0x368] sm:$0xff]  ;;  %v1239_v49 = vld [vmem:[#allocation3 + $0x358] sm:$0xff]  ;;  %8689 = vst [vmem:[#allocation93_spill] sm:$0xff] %v7488_v57  ;;  %v1238_v19 = vld [vmem:[#allocation3 + $0x350] sm:$0xff] }
 0x45a   :  { %v7486_v2 = vpack.c.bf16 %v1243_v22, %v1239_v49  ;;  %v1242_v1 = vld [vmem:[#allocation3 + $0x370] sm:$0xff]  ;;  %v1244_v49 = vld [vmem:[#allocation3 + $0x380] sm:$0xff] }
 0x45b   :  { %8683 = vst [vmem:[#allocation87_spill] sm:$0xff] %v7472_v13  ;;  %4937 = vmatprep.subr.bf16.mxu0 %v7472_v13  ;;  %8686 = vst [vmem:[#allocation90_spill] sm:$0xff] %v7479_v16  ;;  %v1249_v13 = vld [vmem:[#allocation3 + $0x3a8] sm:$0xff]  ;;  %v1248_v22 = vld [vmem:[#allocation3 + $0x3a0] sm:$0xff] }
 0x45c   :  { %4999 = vmatpush1.bf16.msra.mxu1 %v7467_v35  ;;  %v1237_v35 = vld [vmem:[#allocation3 + $0x348] sm:$0xff]  ;;  %8688 = vst [vmem:[#allocation92_spill] sm:$0xff] %v7486_v2  ;;  %v7500_v51 = vpack.c.bf16 %v1248_v22, %v1244_v49  ;;  %v1254_v49 = vld [vmem:[#allocation3 + $0x3d0] sm:$0xff] }
 0x45d   :  { %5001 = vmatprep.subr.bf16.mxu1 %v7474_v54  ;;  %4939 = vmatpush1.bf16.msra.mxu0 %v7476_v11  ;;  %v7484_v40 = vpack.c.bf16 %v1241_v26, %v1237_v35  ;;  %v7491_v54 = vpack.c.bf16 %v1242_v1, %v1238_v19  ;;  %v1245_v11 = vld [vmem:[#allocation3 + $0x388] sm:$0xff]  ;;  %v1251_v26 = vld [vmem:[#allocation3 + $0x3b8] sm:$0xff]  ;;  %v1246_v19 = vld [vmem:[#allocation3 + $0x390] sm:$0xff] }
 0x45e   :  { %v7495_v35 = vpack.c.bf16 %v1249_v13, %v1245_v11  ;;  %v7498_v46 = vpack.c.bf16 %v1251_v26, %v1247_v0  ;;  %8693 = vst [vmem:[#allocation97_spill] sm:$0xff] %v7500_v51  ;;  %v1250_v1 = vld [vmem:[#allocation3 + $0x3b0] sm:$0xff]  ;;  %v1259_v13 = vld [vmem:[#allocation3 + $0x3f8] sm:$0xff]  ;;  %v1252_v0 = vld [vmem:[#allocation3 + $0x3c0] sm:$0xff] }
 0x45f   :  { %8687 = vst [vmem:[#allocation91_spill] sm:$0xff] %v7484_v40  ;;  %4941 = vmatprep.subr.bf16.mxu0 %v7484_v40  ;;  %8690 = vst [vmem:[#allocation94_spill] sm:$0xff] %v7491_v54  ;;  %v1253_v40 = vld [vmem:[#allocation3 + $0x3c8] sm:$0xff]  ;;  %v1256_v26 = vld [vmem:[#allocation3 + $0x3e0] sm:$0xff] }
 0x460   :  { %5003 = vmatpush1.bf16.msra.mxu1 %v7479_v16  ;;  %8691 = vst [vmem:[#allocation95_spill] sm:$0xff] %v7495_v35  ;;  %8692 = vst [vmem:[#allocation96_spill] sm:$0xff] %v7498_v46  ;;  %v7503_v16 = vpack.c.bf16 %v1250_v1, %v1246_v19  ;;  %v7511_v22 = vpack.c.bf16 %v1256_v26, %v1252_v0 }
 0x461   :  { %5005 = vmatprep.subr.bf16.mxu1 %v7486_v2  ;;  %4943 = vmatpush1.bf16.msra.mxu0 %v7488_v57  ;;  %v1257_v2 = vld [vmem:[#allocation3 + $0x3e8] sm:$0xff]  ;;  %v1255_v57 = vld [vmem:[#allocation3 + $0x3d8] sm:$0xff] }
 0x462   :  { %4945 = vmatprep.subr.bf16.mxu0 %v7495_v35  ;;  %8694 = vst [vmem:[#allocation98_spill] sm:$0xff] %v7503_v16  ;;  %v7506_v11 = vpack.c.bf16 %v1257_v2, %v1253_v40  ;;  %v7508_v61 = vpack.c.bf16 %v1259_v13, %v1255_v57  ;;  %8697 = vst [vmem:[#allocation101_spill] sm:$0xff] %v7511_v22 }
 0x464   :  { %5007 = vmatpush1.bf16.msra.mxu1 %v7491_v54  ;;  %8695 = vst [vmem:[#allocation99_spill] sm:$0xff] %v7506_v11  ;;  %8696 = vst [vmem:[#allocation100_spill] sm:$0xff] %v7508_v61  ;;  %v1258_v54 = vld [vmem:[#allocation3 + $0x3f0] sm:$0xff] }
 0x465   :  { %5009 = vmatprep.subr.bf16.mxu1 %v7498_v46  ;;  %4947 = vmatpush1.bf16.msra.mxu0 %v7500_v51  ;;  %v7515_v19 = vpack.c.bf16 %v1258_v54, %v1254_v49 }
 0x466   :  { %4949 = vmatprep.subr.bf16.mxu0 %v7506_v11 }
 0x467   :  { %8698 = vst [vmem:[#allocation102_spill] sm:$0xff] %v7515_v19 }
 0x468   :  { %5011 = vmatpush1.bf16.msra.mxu1 %v7503_v16 }
 0x469   :  { %5013 = vmatprep.subr.bf16.mxu1 %v7508_v61  ;;  %4951 = vmatpush1.bf16.msra.mxu0 %v7511_v22 }
 0x46a   :  { %5017 = vmatprep.subr.bf16.mxu0 %v7228_v9 }
 0x46c   :  { %5015 = vmatpush1.bf16.msra.mxu1 %v7515_v19 }
 0x46d   :  { %5049 = vmatprep.subr.bf16.mxu1 %v7241_v28 }
 0x4ff   :  { %v1028_v57 = vpop.f32.mrb[8].mxu0 }
 0x500   :  { %v1104_v40 = vadd.f32 %v1028_v57, %v7219_v63  ;;  %v1030_v2 = vpop.f32.mrb[9].mxu0 }
 0x501   :  { %v1105_v1 = vadd.f32 %v1030_v2, %v7221_v4 }
 0x502   :  { %v4202_v13 = vmul.f32 -1.442695, %v1104_v40  ;;  %v1099_v54 = vpop.f32.mrb[8].mxu1 }
 0x503   :  { %v4203_v0 = vmul.f32 -1.442695, %v1105_v1  ;;  %v1101_v26 = vpop.f32.mrb[9].mxu1  ;;  %v1106_v19 = vadd.f32 %v1099_v54, %v7215_v59 }
 0x504   :  { %6413 = vpow2.f32 %v4202_v13  ;;  %v1107_v49 = vadd.f32 %v1101_v26, %v7217_v62 }
 0x505   :  { %6415 = vpow2.f32 %v4203_v0 }
 0x506   :  { %v4204_v22 = vmul.f32 -1.442695, %v1107_v49  ;;  %v8705_v49 = vld [vmem:[#allocation53_spill] sm:$0xff] }
 0x508   :  { %6417 = vpow2.f32 %v4204_v22 }
 0x509   :  { %6419 = vtanh.f32 %v1106_v19  ;;  %v8704_v19 = vld [vmem:[#allocation56_spill] sm:$0xff] }
 0x50e   :  { %v6414_v9 = vpop.eup %6413 }
 0x50f   :  { %v6416_v28 = vpop.eup %6415  ;;  %v1114_v61 = vadd.f32 1.0, %v6414_v9  ;;  %v8701_v9 = vld [vmem:[#allocation47_spill] sm:$0xff] }
 0x510   :  { %v1115_v57 = vadd.f32 1.0, %v6416_v28  ;;  %v8702_v28 = vld [vmem:[#allocation54_spill] sm:$0xff] }
 0x511   :  { %6421 = vrcp.f32 %v1114_v61  ;;  %v8703_v61 = vld [vmem:[#allocation51_spill] sm:$0xff] }
 0x512   :  { %6423 = vrcp.f32 %v1115_v57  ;;  %v6418_v2 = vpop.eup %6417  ;;  %v8706_v57 = vld [vmem:[#allocation57_spill] sm:$0xff] }
 0x513   :  { %v6420_v40 = vpop.eup %6419  ;;  %v1123_v13 = vadd.f32 1.0, %v6418_v2  ;;  %v8707_v2 = vld [vmem:[#allocation55_spill] sm:$0xff] }
 0x515   :  { %6425 = vrcp.f32 %v1123_v13  ;;  %v8710_v13 = vld [vmem:[#allocation60_spill] sm:$0xff] }
 0x51b   :  { %v6422_v1 = vpop.eup %6421 }
 0x51c   :  { %v6424_v4 = vpop.eup %6423  ;;  %v1128_v0 = vmul.f32 %v6422_v1, %v6420_v40  ;;  %v8708_v40 = vld [vmem:[#allocation58_spill] sm:$0xff]  ;;  %v8709_v1 = vld [vmem:[#allocation59_spill] sm:$0xff] }
 0x51d   :  { %v1127_v63 = vmul.f32 0.0, %v6424_v4  ;;  %v8700_v4 = vld [vmem:[#allocation46_spill] sm:$0xff] }
 0x51f   :  { %v7526_v11 = vadd.f32 %v1128_v0, %v1127_v63  ;;  %v6426_v54 = vpop.eup %6425  ;;  %v8699_v63 = vld [vmem:[#allocation45_spill] sm:$0xff] }
 0x520   :  { %v8711_v0 = vld [vmem:[#allocation61_spill] sm:$0xff] }
 0x521   :  { %6427 = vtanh.f32 %v7526_v11 }
 0x52b   :  { %v6428_v22 = vpop.eup %6427 }
 0x52c   :  { %v1131_v26 = vmul.f32 %v6428_v22, %v6426_v54  ;;  %v8712_v54 = vld [vmem:[#allocation62_spill] sm:$0xff]  ;;  %v8713_v22 = vld [vmem:[#allocation63_spill] sm:$0xff] }
 0x52e   :  { %1346 = vmatmul.mubr.f32.vlgmr.msra.gmra.mrb[10].mxu0 %v1131_v26  ;;  %1417 = vmatmul.mubr.f32.vlgmr.msra.gmra.mrb[10].mxu1 %v1131_v26 }
 0x52f   :  { %5019 = vmatpush1.bf16.msra.mxu0 %v7230_v14  ;;  %5051 = vmatpush1.bf16.msra.mxu1 %v7243_v31 }
 0x530   :  { %5021 = vmatprep.subr.bf16.mxu0 %v7232_v17  ;;  %5053 = vmatprep.subr.bf16.mxu1 %v7253_v39 }
 0x531   :  { %1511 = vmatprep.mubr.f32.mxu0 %v8646_v37  ;;  %1582 = vmatprep.mubr.f32.mxu1 %v8646_v37 }
 0x533   :  { %5023 = vmatpush1.bf16.msra.mxu0 %v7236_v7  ;;  %5055 = vmatpush1.bf16.msra.mxu1 %v7255_v43 }
 0x534   :  { %5025 = vmatprep.subr.bf16.mxu0 %v7239_v23  ;;  %5057 = vmatprep.subr.bf16.mxu1 %v7261_v55 }
 0x537   :  { %5027 = vmatpush1.bf16.msra.mxu0 %v7246_v32  ;;  %5059 = vmatpush1.bf16.msra.mxu1 %v7267_v58 }
 0x538   :  { %5029 = vmatprep.subr.bf16.mxu0 %v7250_v36  ;;  %5061 = vmatprep.subr.bf16.mxu1 %v7270_v5 }
 0x53b   :  { %5031 = vmatpush1.bf16.msra.mxu0 %v7259_v48  ;;  %5063 = vmatpush1.bf16.msra.mxu1 %v7279_v21 }
 0x53c   :  { %5033 = vmatprep.subr.bf16.mxu0 %v7264_v56  ;;  %5065 = vmatprep.subr.bf16.mxu1 %v7282_v24 }
 0x53f   :  { %5035 = vmatpush1.bf16.msra.mxu0 %v7273_v10  ;;  %5067 = vmatpush1.bf16.msra.mxu1 %v7291_v38 }
 0x540   :  { %5037 = vmatprep.subr.bf16.mxu0 %v7276_v18  ;;  %5069 = vmatprep.subr.bf16.mxu1 %v7294_v41 }
 0x543   :  { %5039 = vmatpush1.bf16.msra.mxu0 %v7285_v30  ;;  %5071 = vmatpush1.bf16.msra.mxu1 %v7303_v60 }
 0x544   :  { %5041 = vmatprep.subr.bf16.mxu0 %v7288_v33  ;;  %5073 = vmatprep.subr.bf16.mxu1 %v7306_v3 }
 0x547   :  { %5043 = vmatpush1.bf16.msra.mxu0 %v7297_v47  ;;  %5075 = vmatpush1.bf16.msra.mxu1 %v7313_v15 }
 0x548   :  { %5045 = vmatprep.subr.bf16.mxu0 %v7300_v50  ;;  %5077 = vmatprep.subr.bf16.mxu1 %v7318_v29 }
 0x54b   :  { %5047 = vmatpush1.bf16.msra.mxu0 %v7309_v20  ;;  %5079 = vmatpush1.bf16.msra.mxu1 %v7324_v45 }
 0x54c   :  { %5081 = vmatprep.subr.bf16.mxu0 %v7315_v25  ;;  %5145 = vmatprep.subr.bf16.mxu1 %v7330_v6 }
 0x54e   :  { %1512 = vmatmul.mubr.f32.vlgmr.msra.gmra.mrb[12].mxu0 %v1131_v26  ;;  %1583 = vmatmul.mubr.f32.vlgmr.msra.gmra.mrb[12].mxu1 %v1131_v26  ;;  %v8714_v26 = vld [vmem:[#allocation64_spill] sm:$0xff] }
 0x54f   :  { %5083 = vmatpush1.bf16.msra.mxu0 %v7321_v44  ;;  %5147 = vmatpush1.bf16.msra.mxu1 %v7338_v27 }
 0x550   :  { %5085 = vmatprep.subr.bf16.mxu0 %v7327_v53  ;;  %5149 = vmatprep.subr.bf16.mxu1 %v7344_v42 }
 0x553   :  { %5087 = vmatpush1.bf16.msra.mxu0 %v8699_v63  ;;  %5151 = vmatpush1.bf16.msra.mxu1 %v7351_v8 }
 0x554   :  { %5089 = vmatprep.subr.bf16.mxu0 %v8700_v4  ;;  %5153 = vmatprep.subr.bf16.mxu1 %v7357_v52 }
 0x557   :  { %5091 = vmatpush1.bf16.msra.mxu0 %v8701_v9  ;;  %5155 = vmatpush1.bf16.msra.mxu1 %v7364_v34 }
 0x558   :  { %5093 = vmatprep.subr.bf16.mxu0 %v7354_v12  ;;  %5157 = vmatprep.subr.bf16.mxu1 %v8702_v28 }
 0x55b   :  { %5095 = vmatpush1.bf16.msra.mxu0 %v8703_v61  ;;  %5159 = vmatpush1.bf16.msra.mxu1 %v8704_v19  ;;  %v8715_v19 = vld [vmem:[#allocation65_spill] sm:$0xff] }
 0x55c   :  { %5097 = vmatprep.subr.bf16.mxu0 %v8705_v49  ;;  %5161 = vmatprep.subr.bf16.mxu1 %v8706_v57  ;;  %v8716_v49 = vld [vmem:[#allocation66_spill] sm:$0xff]  ;;  %v8717_v57 = vld [vmem:[#allocation67_spill] sm:$0xff] }
 0x55f   :  { %5099 = vmatpush1.bf16.msra.mxu0 %v8707_v2  ;;  %5163 = vmatpush1.bf16.msra.mxu1 %v8708_v40  ;;  %v8718_v2 = vld [vmem:[#allocation68_spill] sm:$0xff]  ;;  %v8719_v40 = vld [vmem:[#allocation69_spill] sm:$0xff] }
 0x560   :  { %5101 = vmatprep.subr.bf16.mxu0 %v8709_v1  ;;  %5165 = vmatprep.subr.bf16.mxu1 %v8710_v13  ;;  %v8720_v1 = vld [vmem:[#allocation70_spill] sm:$0xff]  ;;  %v8721_v13 = vld [vmem:[#allocation71_spill] sm:$0xff] }
 0x563   :  { %5103 = vmatpush1.bf16.msra.mxu0 %v8711_v0  ;;  %5167 = vmatpush1.bf16.msra.mxu1 %v8712_v54  ;;  %v8722_v0 = vld [vmem:[#allocation72_spill] sm:$0xff]  ;;  %v8723_v54 = vld [vmem:[#allocation73_spill] sm:$0xff] }
 0x564   :  { %5105 = vmatprep.subr.bf16.mxu0 %v8713_v22  ;;  %5169 = vmatprep.subr.bf16.mxu1 %v8714_v26  ;;  %v8724_v22 = vld [vmem:[#allocation74_spill] sm:$0xff]  ;;  %v8725_v26 = vld [vmem:[#allocation75_spill] sm:$0xff] }
 0x567   :  { %5107 = vmatpush1.bf16.msra.mxu0 %v8715_v19  ;;  %5171 = vmatpush1.bf16.msra.mxu1 %v8716_v49  ;;  %v8726_v19 = vld [vmem:[#allocation76_spill] sm:$0xff]  ;;  %v8727_v49 = vld [vmem:[#allocation77_spill] sm:$0xff] }
 0x568   :  { %5109 = vmatprep.subr.bf16.mxu0 %v8717_v57  ;;  %5173 = vmatprep.subr.bf16.mxu1 %v8718_v2  ;;  %v8728_v57 = vld [vmem:[#allocation78_spill] sm:$0xff]  ;;  %v8729_v2 = vld [vmem:[#allocation79_spill] sm:$0xff] }
 0x56b   :  { %5111 = vmatpush1.bf16.msra.mxu0 %v8719_v40  ;;  %5175 = vmatpush1.bf16.msra.mxu1 %v8720_v1  ;;  %v8730_v40 = vld [vmem:[#allocation80_spill] sm:$0xff]  ;;  %v8731_v1 = vld [vmem:[#allocation81_spill] sm:$0xff] }
 0x56c   :  { %5113 = vmatprep.subr.bf16.mxu0 %v8721_v13  ;;  %5177 = vmatprep.subr.bf16.mxu1 %v8722_v0  ;;  %v8732_v13 = vld [vmem:[#allocation82_spill] sm:$0xff]  ;;  %v8733_v0 = vld [vmem:[#allocation83_spill] sm:$0xff] }
 0x56f   :  { %5115 = vmatpush1.bf16.msra.mxu0 %v8723_v54  ;;  %5179 = vmatpush1.bf16.msra.mxu1 %v8724_v22  ;;  %v8734_v54 = vld [vmem:[#allocation84_spill] sm:$0xff]  ;;  %v8735_v22 = vld [vmem:[#allocation85_spill] sm:$0xff] }
 0x570   :  { %5117 = vmatprep.subr.bf16.mxu0 %v8725_v26  ;;  %5181 = vmatprep.subr.bf16.mxu1 %v8726_v19  ;;  %v8736_v26 = vld [vmem:[#allocation86_spill] sm:$0xff]  ;;  %v8737_v19 = vld [vmem:[#allocation87_spill] sm:$0xff] }
 0x573   :  { %5119 = vmatpush1.bf16.msra.mxu0 %v8727_v49  ;;  %5183 = vmatpush1.bf16.msra.mxu1 %v8728_v57  ;;  %v8738_v49 = vld [vmem:[#allocation88_spill] sm:$0xff]  ;;  %v8739_v57 = vld [vmem:[#allocation89_spill] sm:$0xff] }
 0x574   :  { %5121 = vmatprep.subr.bf16.mxu0 %v8729_v2  ;;  %5185 = vmatprep.subr.bf16.mxu1 %v8730_v40  ;;  %v8740_v2 = vld [vmem:[#allocation90_spill] sm:$0xff]  ;;  %v8741_v40 = vld [vmem:[#allocation91_spill] sm:$0xff] }
 0x577   :  { %5123 = vmatpush1.bf16.msra.mxu0 %v8731_v1  ;;  %5187 = vmatpush1.bf16.msra.mxu1 %v8732_v13  ;;  %v8742_v1 = vld [vmem:[#allocation92_spill] sm:$0xff]  ;;  %v8743_v13 = vld [vmem:[#allocation93_spill] sm:$0xff] }
 0x578   :  { %5125 = vmatprep.subr.bf16.mxu0 %v8733_v0  ;;  %5189 = vmatprep.subr.bf16.mxu1 %v8734_v54  ;;  %v8744_v0 = vld [vmem:[#allocation94_spill] sm:$0xff] }
 0x57b   :  { %5127 = vmatpush1.bf16.msra.mxu0 %v8735_v22  ;;  %5191 = vmatpush1.bf16.msra.mxu1 %v8736_v26 }
 0x57c   :  { %5129 = vmatprep.subr.bf16.mxu0 %v8737_v19  ;;  %5193 = vmatprep.subr.bf16.mxu1 %v8738_v49  ;;  %v8745_v49 = vld [vmem:[#allocation99_spill] sm:$0xff] }
 0x57f   :  { %5131 = vmatpush1.bf16.msra.mxu0 %v8739_v57  ;;  %5195 = vmatpush1.bf16.msra.mxu1 %v8740_v2  ;;  %v8746_v57 = vld [vmem:[#allocation100_spill] sm:$0xff]  ;;  %v8747_v2 = vld [vmem:[#allocation101_spill] sm:$0xff] }
 0x580   :  { %5133 = vmatprep.subr.bf16.mxu0 %v8741_v40  ;;  %5197 = vmatprep.subr.bf16.mxu1 %v8742_v1  ;;  %v8748_v40 = vld [vmem:[#allocation102_spill] sm:$0xff]  ;;  %v8749_v1 = vld [vmem:[#allocation43_spill] sm:$0xff] }
 0x583   :  { %5135 = vmatpush1.bf16.msra.mxu0 %v8743_v13  ;;  %5199 = vmatpush1.bf16.msra.mxu1 %v8744_v0  ;;  %v8750_v13 = vld [vmem:[#allocation44_spill] sm:$0xff]  ;;  %v8751_v0 = vld [vmem:[#allocation39_spill] sm:$0xff] }
 0x584   :  { %5137 = vmatprep.subr.bf16.mxu0 %v7495_v35  ;;  %5201 = vmatprep.subr.bf16.mxu1 %v7498_v46  ;;  %v8752_v35 = vld [vmem:[#allocation37_spill] sm:$0xff]  ;;  %v8754_v46 = vld [vmem:[#allocation38_spill] sm:$0xff] }
 0x585   :  { %v7629_v19 = vrot.slane %v8752_v35, %v8751_v0  ;;  %v8759_v61 = vsub.s32 2, %v8754_v46 }
 0x587   :  { %5139 = vmatpush1.bf16.msra.mxu0 %v7500_v51  ;;  %5203 = vmatpush1.bf16.msra.mxu1 %v7503_v16  ;;  %8753 = vst [vmem:[#allocation45_spill] sm:$0xff] %v7629_v19  ;;  %v8755_v51 = vsub.s32 1, %v8754_v46  ;;  %v7647_v28 = vrot.slane %v8752_v35, %v8759_v61 }
 0x588   :  { %5141 = vmatprep.subr.bf16.mxu0 %v8745_v49  ;;  %5205 = vmatprep.subr.bf16.mxu1 %v8746_v57 }
 0x589   :  { %v7634_v16 = vrot.slane %v8752_v35, %v8755_v51  ;;  %8760 = vst [vmem:[#allocation38_spill] sm:$0xff] %v7647_v28 }
 0x58b   :  { %5143 = vmatpush1.bf16.msra.mxu0 %v8747_v2  ;;  %5207 = vmatpush1.bf16.msra.mxu1 %v8748_v40  ;;  %8756 = vst [vmem:[#allocation39_spill] sm:$0xff] %v7634_v16 }
 0x58c   :  { %5209 = vmatprep.subr.bf16.mxu0 %v8749_v1  ;;  %5241 = vmatprep.subr.bf16.mxu1 %v8750_v13  ;;  %v8757_v13 = vsub.s32 3, %v8754_v46 }
 0x58e   :  { %v7641_v0 = vrot.slane %v8752_v35, %v8757_v13 }
 0x590   :  { %8758 = vst [vmem:[#allocation37_spill] sm:$0xff] %v7641_v0 }
 0x601   :  { %v1347_v49 = vpop.f32.mrb[10].mxu0  ;;  %v1418_v26 = vpop.f32.mrb[10].mxu1 }
 0x602   :  { %v1348_v57 = vadd.f32 %v1347_v49, %v7629_v19  ;;  %v1349_v2 = vpop.f32.mrb[11].mxu0  ;;  %v1420_v22 = vpop.f32.mrb[11].mxu1  ;;  %v1419_v19 = vadd.f32 %v1418_v26, %v7647_v28 }
 0x603   :  { %v1350_v40 = vadd.f32 %v1349_v2, %v7634_v16  ;;  %v1421_v51 = vadd.f32 %v1420_v22, %v7641_v0 }
 0x604   :  { %v4205_v1 = vmul.f32 -1.442695, %v1348_v57 }
 0x605   :  { %v4206_v54 = vmul.f32 -1.442695, %v1350_v40  ;;  %v4207_v49 = vmul.f32 -1.442695, %v1421_v51 }
 0x606   :  { %6429 = vpow2.f32 %v4205_v1 }
 0x607   :  { %6431 = vpow2.f32 %v4206_v54 }
 0x608   :  { %6433 = vpow2.f32 %v4207_v49  ;;  %v8761_v49 = vld [vmem:[#allocation41_spill] sm:$0xff] }
 0x609   :  { %6435 = vtanh.f32 %v1419_v19 }
 0x610   :  { %v6430_v2 = vpop.eup %6429 }
 0x611   :  { %v6432_v57 = vpop.eup %6431  ;;  %v1429_v40 = vadd.f32 1.0, %v6430_v2 }
 0x612   :  { %v1430_v16 = vadd.f32 1.0, %v6432_v57  ;;  %v6434_v1 = vpop.eup %6433  ;;  %v8762_v57 = vld [vmem:[#allocation42_spill] sm:$0xff] }
 0x613   :  { %6437 = vrcp.f32 %v1429_v40  ;;  %v6436_v13 = vpop.eup %6435  ;;  %v1438_v46 = vadd.f32 1.0, %v6434_v1 }
 0x614   :  { %6439 = vrcp.f32 %v1430_v16 }
 0x615   :  { %6441 = vrcp.f32 %v1438_v46 }
 0x61d   :  { %v6438_v54 = vpop.eup %6437 }
 0x61e   :  { %v6440_v22 = vpop.eup %6439  ;;  %v1443_v0 = vmul.f32 %v6438_v54, %v6436_v13 }
 0x61f   :  { %v1442_v12 = vmul.f32 0.0, %v6440_v22 }
 0x621   :  { %v7650_v35 = vadd.f32 %v1443_v0, %v1442_v12  ;;  %v1513_v61 = vpop.f32.mrb[12].mxu0  ;;  %v1584_v51 = vpop.f32.mrb[12].mxu1 }
 0x622   :  { %v1593_v26 = vrot.slane %v1513_v61, 7  ;;  %v1515_v28 = vpop.f32.mrb[13].mxu0  ;;  %v1586_v2 = vpop.f32.mrb[13].mxu1  ;;  %v1595_v1 = vrot.slane %v1584_v51, 7 }
 0x623   :  { %6443 = vtanh.f32 %v7650_v35  ;;  %v1594_v19 = vrot.slane %v1515_v28, 7  ;;  %v1596_v13 = vrot.slane %v1586_v2, 7  ;;  %v6442_v0 = vpop.eup %6441 }
 0x624   :  { %v1601_v16 = vadd.f32 %v1593_v26, %v8761_v49  ;;  %v1603_v61 = vadd.f32 %v1595_v1, %v7215_v59 }
 0x625   :  { %v1602_v40 = vadd.f32 %v1594_v19, %v8762_v57  ;;  %v1604_v12 = vadd.f32 %v1596_v13, %v7217_v62 }
 0x626   :  { %v4208_v34 = vmul.f32 -1.442695, %v1601_v16 }
 0x627   :  { %v4209_v9 = vmul.f32 -1.442695, %v1602_v40  ;;  %v4210_v46 = vmul.f32 -1.442695, %v1604_v12  ;;  %v1625_v40 = vrot.slane %v7526_v11, 7  ;;  %v8764_v11 = vld [vmem:[#allocation47_spill] sm:$0xff] }
 0x628   :  { %6445 = vpow2.f32 %v4208_v34 }
 0x629   :  { %6447 = vpow2.f32 %v4209_v9 }
 0x62a   :  { %6449 = vpow2.f32 %v4210_v46 }
 0x62b   :  { %6451 = vtanh.f32 %v1603_v61 }
 0x62d   :  { %v6444_v54 = vpop.eup %6443 }
 0x62e   :  { %v7656_v22 = vmul.f32 %v6444_v54, %v6442_v0 }
 0x630   :  { %8763 = vst [vmem:[#allocation42_spill] sm:$0xff] %v7656_v22  ;;  %v1633_v28 = vrot.slane %v7656_v22, 7  ;;  %v8781_v22 = vld [vmem:[#allocation66_spill] sm:$0xff] }
 0x632   :  { %v6446_v26 = vpop.eup %6445  ;;  %v1636_v49 = vrot.slane %v1633_v28, 1 }
 0x633   :  { %v6448_v19 = vpop.eup %6447  ;;  %v1611_v16 = vadd.f32 1.0, %v6446_v26  ;;  %v8765_v26 = vld [vmem:[#allocation52_spill] sm:$0xff] }
 0x634   :  { %v1612_v34 = vadd.f32 1.0, %v6448_v19  ;;  %1703 = vmatprep.mubr.f32.mxu0 %v1636_v49  ;;  %1774 = vmatprep.mubr.f32.mxu1 %v1636_v49  ;;  %v6450_v9 = vpop.eup %6449  ;;  %v8766_v19 = vld [vmem:[#allocation49_spill] sm:$0xff] }
 0x635   :  { %6453 = vrcp.f32 %v1611_v16  ;;  %v6452_v51 = vpop.eup %6451  ;;  %v1620_v0 = vadd.f32 1.0, %v6450_v9  ;;  %v8767_v16 = vld [vmem:[#allocation54_spill] sm:$0xff]  ;;  %v8769_v9 = vld [vmem:[#allocation56_spill] sm:$0xff] }
 0x636   :  { %6455 = vrcp.f32 %v1612_v34  ;;  %v8768_v34 = vld [vmem:[#allocation51_spill] sm:$0xff] }
 0x637   :  { %6457 = vrcp.f32 %v1620_v0  ;;  %v8775_v0 = vld [vmem:[#allocation60_spill] sm:$0xff] }
 0x63f   :  { %v6454_v2 = vpop.eup %6453 }
 0x640   :  { %v6456_v13 = vpop.eup %6455  ;;  %v1628_v12 = vmul.f32 %v6454_v2, %v6452_v51  ;;  %v8770_v51 = vld [vmem:[#allocation53_spill] sm:$0xff] }
 0x641   :  { %v1627_v1 = vmul.f32 %v6456_v13, %v1625_v40  ;;  %v6458_v46 = vpop.eup %6457  ;;  %v8771_v2 = vld [vmem:[#allocation57_spill] sm:$0xff]  ;;  %v8772_v40 = vld [vmem:[#allocation55_spill] sm:$0xff]  ;;  %v8773_v13 = vld [vmem:[#allocation58_spill] sm:$0xff] }
 0x643   :  { %v7661_v54 = vadd.f32 %v1628_v12, %v1627_v1  ;;  %v8774_v12 = vld [vmem:[#allocation59_spill] sm:$0xff]  ;;  %v8776_v1 = vld [vmem:[#allocation61_spill] sm:$0xff] }
 0x645   :  { %6459 = vtanh.f32 %v7661_v54 }
 0x64f   :  { %v6460_v61 = vpop.eup %6459 }
 0x650   :  { %v1631_v28 = vmul.f32 %v6460_v61, %v6458_v46  ;;  %v8777_v46 = vld [vmem:[#allocation62_spill] sm:$0xff]  ;;  %v8778_v61 = vld [vmem:[#allocation63_spill] sm:$0xff] }
 0x652   :  { %v1635_v49 = vrot.slane %v1631_v28, 1  ;;  %v8779_v28 = vld [vmem:[#allocation64_spill] sm:$0xff] }
 0x654   :  { %1704 = vmatmul.mubr.f32.vlgmr.msra.gmra.mrb[14].mxu0 %v1635_v49  ;;  %1775 = vmatmul.mubr.f32.vlgmr.msra.gmra.mrb[14].mxu1 %v1635_v49 }
 0x655   :  { %5211 = vmatpush1.bf16.msra.mxu0 %v7230_v14  ;;  %5243 = vmatpush1.bf16.msra.mxu1 %v7243_v31 }
 0x656   :  { %5213 = vmatprep.subr.bf16.mxu0 %v7232_v17  ;;  %5245 = vmatprep.subr.bf16.mxu1 %v7253_v39 }
 0x657   :  { %1869 = vmatprep.mubr.f32.mxu0 %v8646_v37  ;;  %1940 = vmatprep.mubr.f32.mxu1 %v8646_v37 }
 0x659   :  { %5215 = vmatpush1.bf16.msra.mxu0 %v7236_v7  ;;  %5247 = vmatpush1.bf16.msra.mxu1 %v7255_v43 }
 0x65a   :  { %5217 = vmatprep.subr.bf16.mxu0 %v7239_v23  ;;  %5249 = vmatprep.subr.bf16.mxu1 %v7261_v55 }
 0x65d   :  { %5219 = vmatpush1.bf16.msra.mxu0 %v7246_v32  ;;  %5251 = vmatpush1.bf16.msra.mxu1 %v7267_v58 }
 0x65e   :  { %5221 = vmatprep.subr.bf16.mxu0 %v7250_v36  ;;  %5253 = vmatprep.subr.bf16.mxu1 %v7270_v5 }
 0x661   :  { %5223 = vmatpush1.bf16.msra.mxu0 %v7259_v48  ;;  %5255 = vmatpush1.bf16.msra.mxu1 %v7279_v21 }
 0x662   :  { %5225 = vmatprep.subr.bf16.mxu0 %v7264_v56  ;;  %5257 = vmatprep.subr.bf16.mxu1 %v7282_v24 }
 0x665   :  { %5227 = vmatpush1.bf16.msra.mxu0 %v7273_v10  ;;  %5259 = vmatpush1.bf16.msra.mxu1 %v7291_v38 }
 0x666   :  { %5229 = vmatprep.subr.bf16.mxu0 %v7276_v18  ;;  %5261 = vmatprep.subr.bf16.mxu1 %v7294_v41 }
 0x669   :  { %5231 = vmatpush1.bf16.msra.mxu0 %v7285_v30  ;;  %5263 = vmatpush1.bf16.msra.mxu1 %v7303_v60 }
 0x66a   :  { %5233 = vmatprep.subr.bf16.mxu0 %v7288_v33  ;;  %5265 = vmatprep.subr.bf16.mxu1 %v7306_v3 }
 0x66d   :  { %5235 = vmatpush1.bf16.msra.mxu0 %v7297_v47  ;;  %5267 = vmatpush1.bf16.msra.mxu1 %v7313_v15 }
 0x66e   :  { %5237 = vmatprep.subr.bf16.mxu0 %v7300_v50  ;;  %5269 = vmatprep.subr.bf16.mxu1 %v7318_v29 }
 0x671   :  { %5239 = vmatpush1.bf16.msra.mxu0 %v7309_v20  ;;  %5271 = vmatpush1.bf16.msra.mxu1 %v7324_v45 }
 0x672   :  { %5273 = vmatprep.subr.bf16.mxu0 %v7315_v25  ;;  %5337 = vmatprep.subr.bf16.mxu1 %v7330_v6 }
 0x674   :  { %1870 = vmatmul.mubr.f32.vlgmr.msra.gmra.mrb[16].mxu0 %v1635_v49  ;;  %1941 = vmatmul.mubr.f32.vlgmr.msra.gmra.mrb[16].mxu1 %v1635_v49  ;;  %v8780_v49 = vld [vmem:[#allocation65_spill] sm:$0xff] }
 0x675   :  { %5275 = vmatpush1.bf16.msra.mxu0 %v7321_v44  ;;  %5339 = vmatpush1.bf16.msra.mxu1 %v7338_v27 }
 0x676   :  { %5277 = vmatprep.subr.bf16.mxu0 %v7327_v53  ;;  %5341 = vmatprep.subr.bf16.mxu1 %v7344_v42 }
 0x679   :  { %5279 = vmatpush1.bf16.msra.mxu0 %v8699_v63  ;;  %5343 = vmatpush1.bf16.msra.mxu1 %v7351_v8 }
 0x67a   :  { %5281 = vmatprep.subr.bf16.mxu0 %v8700_v4  ;;  %5345 = vmatprep.subr.bf16.mxu1 %v7357_v52 }
 0x67d   :  { %5283 = vmatpush1.bf16.msra.mxu0 %v8764_v11  ;;  %5347 = vmatpush1.bf16.msra.mxu1 %v8765_v26 }
 0x67e   :  { %5285 = vmatprep.subr.bf16.mxu0 %v8766_v19  ;;  %5349 = vmatprep.subr.bf16.mxu1 %v8767_v16 }
 0x681   :  { %5287 = vmatpush1.bf16.msra.mxu0 %v8768_v34  ;;  %5351 = vmatpush1.bf16.msra.mxu1 %v8769_v9  ;;  %v8821_v34 = vld [vmem:[#allocation39_spill] sm:$0xff] }
 0x682   :  { %5289 = vmatprep.subr.bf16.mxu0 %v8770_v51  ;;  %5353 = vmatprep.subr.bf16.mxu1 %v8771_v2  ;;  %v8782_v2 = vld [vmem:[#allocation67_spill] sm:$0xff]  ;;  %v8820_v51 = vld [vmem:[#allocation45_spill] sm:$0xff] }
 0x685   :  { %5291 = vmatpush1.bf16.msra.mxu0 %v8772_v40  ;;  %5355 = vmatpush1.bf16.msra.mxu1 %v8773_v13  ;;  %v8783_v40 = vld [vmem:[#allocation68_spill] sm:$0xff]  ;;  %v8784_v13 = vld [vmem:[#allocation69_spill] sm:$0xff] }
 0x686   :  { %5293 = vmatprep.subr.bf16.mxu0 %v8774_v12  ;;  %5357 = vmatprep.subr.bf16.mxu1 %v8775_v0  ;;  %v8785_v12 = vld [vmem:[#allocation70_spill] sm:$0xff]  ;;  %v8786_v0 = vld [vmem:[#allocation71_spill] sm:$0xff] }
 0x689   :  { %5295 = vmatpush1.bf16.msra.mxu0 %v8776_v1  ;;  %5359 = vmatpush1.bf16.msra.mxu1 %v8777_v46  ;;  %v8787_v1 = vld [vmem:[#allocation72_spill] sm:$0xff]  ;;  %v8788_v46 = vld [vmem:[#allocation73_spill] sm:$0xff] }
 0x68a   :  { %5297 = vmatprep.subr.bf16.mxu0 %v8778_v61  ;;  %5361 = vmatprep.subr.bf16.mxu1 %v8779_v28  ;;  %v8789_v61 = vld [vmem:[#allocation74_spill] sm:$0xff]  ;;  %v8790_v28 = vld [vmem:[#allocation75_spill] sm:$0xff] }
 0x68d   :  { %5299 = vmatpush1.bf16.msra.mxu0 %v8780_v49  ;;  %5363 = vmatpush1.bf16.msra.mxu1 %v8781_v22  ;;  %v8791_v49 = vld [vmem:[#allocation76_spill] sm:$0xff]  ;;  %v8792_v22 = vld [vmem:[#allocation77_spill] sm:$0xff] }
 0x68e   :  { %5301 = vmatprep.subr.bf16.mxu0 %v8782_v2  ;;  %5365 = vmatprep.subr.bf16.mxu1 %v8783_v40  ;;  %v8793_v2 = vld [vmem:[#allocation78_spill] sm:$0xff]  ;;  %v8794_v40 = vld [vmem:[#allocation79_spill] sm:$0xff] }
 0x691   :  { %5303 = vmatpush1.bf16.msra.mxu0 %v8784_v13  ;;  %5367 = vmatpush1.bf16.msra.mxu1 %v8785_v12  ;;  %v8795_v13 = vld [vmem:[#allocation80_spill] sm:$0xff]  ;;  %v8796_v12 = vld [vmem:[#allocation81_spill] sm:$0xff] }
 0x692   :  { %5305 = vmatprep.subr.bf16.mxu0 %v8786_v0  ;;  %5369 = vmatprep.subr.bf16.mxu1 %v8787_v1  ;;  %v8797_v0 = vld [vmem:[#allocation82_spill] sm:$0xff]  ;;  %v8798_v1 = vld [vmem:[#allocation83_spill] sm:$0xff] }
 0x695   :  { %5307 = vmatpush1.bf16.msra.mxu0 %v8788_v46  ;;  %5371 = vmatpush1.bf16.msra.mxu1 %v8789_v61  ;;  %v8799_v46 = vld [vmem:[#allocation84_spill] sm:$0xff]  ;;  %v8800_v61 = vld [vmem:[#allocation85_spill] sm:$0xff] }
 0x696   :  { %5309 = vmatprep.subr.bf16.mxu0 %v8790_v28  ;;  %5373 = vmatprep.subr.bf16.mxu1 %v8791_v49  ;;  %v8801_v28 = vld [vmem:[#allocation86_spill] sm:$0xff]  ;;  %v8802_v49 = vld [vmem:[#allocation87_spill] sm:$0xff] }
 0x699   :  { %5311 = vmatpush1.bf16.msra.mxu0 %v8792_v22  ;;  %5375 = vmatpush1.bf16.msra.mxu1 %v8793_v2  ;;  %v8803_v22 = vld [vmem:[#allocation88_spill] sm:$0xff]  ;;  %v8804_v2 = vld [vmem:[#allocation89_spill] sm:$0xff] }
 0x69a   :  { %5313 = vmatprep.subr.bf16.mxu0 %v8794_v40  ;;  %5377 = vmatprep.subr.bf16.mxu1 %v8795_v13  ;;  %v8805_v40 = vld [vmem:[#allocation90_spill] sm:$0xff]  ;;  %v8806_v13 = vld [vmem:[#allocation91_spill] sm:$0xff] }
 0x69d   :  { %5315 = vmatpush1.bf16.msra.mxu0 %v8796_v12  ;;  %5379 = vmatpush1.bf16.msra.mxu1 %v8797_v0  ;;  %v8807_v12 = vld [vmem:[#allocation92_spill] sm:$0xff]  ;;  %v8808_v0 = vld [vmem:[#allocation93_spill] sm:$0xff] }
 0x69e   :  { %5317 = vmatprep.subr.bf16.mxu0 %v8798_v1  ;;  %5381 = vmatprep.subr.bf16.mxu1 %v8799_v46  ;;  %v8809_v1 = vld [vmem:[#allocation94_spill] sm:$0xff]  ;;  %v8810_v46 = vld [vmem:[#allocation95_spill] sm:$0xff] }
 0x6a1   :  { %5319 = vmatpush1.bf16.msra.mxu0 %v8800_v61  ;;  %5383 = vmatpush1.bf16.msra.mxu1 %v8801_v28  ;;  %v8811_v61 = vld [vmem:[#allocation96_spill] sm:$0xff]  ;;  %v8812_v28 = vld [vmem:[#allocation97_spill] sm:$0xff] }
 0x6a2   :  { %5321 = vmatprep.subr.bf16.mxu0 %v8802_v49  ;;  %5385 = vmatprep.subr.bf16.mxu1 %v8803_v22  ;;  %v8813_v49 = vld [vmem:[#allocation98_spill] sm:$0xff]  ;;  %v8814_v22 = vld [vmem:[#allocation99_spill] sm:$0xff] }
 0x6a5   :  { %5323 = vmatpush1.bf16.msra.mxu0 %v8804_v2  ;;  %5387 = vmatpush1.bf16.msra.mxu1 %v8805_v40  ;;  %v8815_v2 = vld [vmem:[#allocation100_spill] sm:$0xff]  ;;  %v8816_v40 = vld [vmem:[#allocation101_spill] sm:$0xff] }
 0x6a6   :  { %5325 = vmatprep.subr.bf16.mxu0 %v8806_v13  ;;  %5389 = vmatprep.subr.bf16.mxu1 %v8807_v12  ;;  %v8817_v13 = vld [vmem:[#allocation102_spill] sm:$0xff]  ;;  %v8818_v12 = vld [vmem:[#allocation43_spill] sm:$0xff] }
 0x6a9   :  { %5327 = vmatpush1.bf16.msra.mxu0 %v8808_v0  ;;  %5391 = vmatpush1.bf16.msra.mxu1 %v8809_v1  ;;  %v8819_v0 = vld [vmem:[#allocation44_spill] sm:$0xff] }
 0x6aa   :  { %5329 = vmatprep.subr.bf16.mxu0 %v8810_v46  ;;  %5393 = vmatprep.subr.bf16.mxu1 %v8811_v61 }
 0x6ad   :  { %5331 = vmatpush1.bf16.msra.mxu0 %v8812_v28  ;;  %5395 = vmatpush1.bf16.msra.mxu1 %v8813_v49 }
 0x6ae   :  { %5333 = vmatprep.subr.bf16.mxu0 %v8814_v22  ;;  %5397 = vmatprep.subr.bf16.mxu1 %v8815_v2  ;;  %v8822_v2 = vld [vmem:[#allocation37_spill] sm:$0xff] }
 0x6b1   :  { %5335 = vmatpush1.bf16.msra.mxu0 %v8816_v40  ;;  %5399 = vmatpush1.bf16.msra.mxu1 %v8817_v13  ;;  %v8823_v13 = vld [vmem:[#allocation38_spill] sm:$0xff] }
 0x6b2   :  { %5401 = vmatprep.subr.bf16.mxu0 %v8818_v12  ;;  %5433 = vmatprep.subr.bf16.mxu1 %v8819_v0 }
 0x727   :  { %v1705_v1 = vpop.f32.mrb[14].mxu0  ;;  %v1776_v46 = vpop.f32.mrb[14].mxu1 }
 0x728   :  { %v1706_v61 = vadd.f32 %v1705_v1, %v8820_v51  ;;  %v1707_v9 = vpop.f32.mrb[15].mxu0  ;;  %v1778_v28 = vpop.f32.mrb[15].mxu1  ;;  %v1777_v26 = vadd.f32 %v1776_v46, %v8823_v13 }
 0x729   :  { %v1708_v49 = vadd.f32 %v1707_v9, %v8821_v34  ;;  %v1779_v40 = vadd.f32 %v1778_v28, %v8822_v2 }
 0x72a   :  { %v4211_v16 = vmul.f32 -1.442695, %v1706_v61 }
 0x72b   :  { %v4212_v22 = vmul.f32 -1.442695, %v1708_v49  ;;  %v4213_v19 = vmul.f32 -1.442695, %v1779_v40 }
 0x72c   :  { %6461 = vpow2.f32 %v4211_v16 }
 0x72d   :  { %6463 = vpow2.f32 %v4212_v22 }
 0x72e   :  { %6465 = vpow2.f32 %v4213_v19 }
 0x72f   :  { %6467 = vtanh.f32 %v1777_v26 }
 0x736   :  { %v6462_v12 = vpop.eup %6461 }
 0x737   :  { %v6464_v11 = vpop.eup %6463  ;;  %v1787_v0 = vadd.f32 1.0, %v6462_v12 }
 0x738   :  { %v1788_v52 = vadd.f32 1.0, %v6464_v11  ;;  %v6466_v1 = vpop.eup %6465 }
 0x739   :  { %6469 = vrcp.f32 %v1787_v0  ;;  %v6468_v51 = vpop.eup %6467  ;;  %v1796_v16 = vadd.f32 1.0, %v6466_v1 }
 0x73a   :  { %6471 = vrcp.f32 %v1788_v52  ;;  %v8824_v52 = vld [vmem:[#allocation41_spill] sm:$0xff] }
 0x73b   :  { %6473 = vrcp.f32 %v1796_v16 }
 0x743   :  { %v6470_v9 = vpop.eup %6469 }
 0x744   :  { %v6472_v61 = vpop.eup %6471  ;;  %v1801_v49 = vmul.f32 %v6470_v9, %v6468_v51 }
 0x745   :  { %v1800_v22 = vmul.f32 %v6472_v61, %v7650_v35  ;;  %v6474_v9 = vpop.eup %6473 }
 0x747   :  { %v7767_v28 = vadd.f32 %v1801_v49, %v1800_v22  ;;  %v1871_v40 = vpop.f32.mrb[16].mxu0  ;;  %v1942_v46 = vpop.f32.mrb[16].mxu1 }
 0x748   :  { %v1951_v13 = vrot.slane %v1871_v40, 6  ;;  %v1873_v12 = vpop.f32.mrb[17].mxu0  ;;  %v1944_v19 = vpop.f32.mrb[17].mxu1  ;;  %v1953_v61 = vrot.slane %v1942_v46, 6 }
 0x749   :  { %v1952_v26 = vrot.slane %v1873_v12, 6  ;;  %6475 = vtanh.f32 %v7767_v28  ;;  %v1954_v1 = vrot.slane %v1944_v19, 6 }
 0x74a   :  { %v1959_v11 = vadd.f32 %v1951_v13, %v8824_v52  ;;  %v1961_v40 = vadd.f32 %v1953_v61, %v7215_v59 }
 0x74b   :  { %v1960_v0 = vadd.f32 %v1952_v26, %v8762_v57  ;;  %v1962_v35 = vadd.f32 %v1954_v1, %v7217_v62 }
 0x74c   :  { %v4214_v2 = vmul.f32 -1.442695, %v1959_v11 }
 0x74d   :  { %v4215_v51 = vmul.f32 -1.442695, %v1960_v0  ;;  %v4216_v22 = vmul.f32 -1.442695, %v1962_v35 }
 0x74e   :  { %6477 = vpow2.f32 %v4214_v2 }
 0x74f   :  { %6479 = vpow2.f32 %v4215_v51  ;;  %v1983_v51 = vrot.slane %v7661_v54, 7  ;;  %v8825_v54 = vld [vmem:[#allocation50_spill] sm:$0xff] }
 0x750   :  { %6481 = vpow2.f32 %v4216_v22 }
 0x751   :  { %6483 = vtanh.f32 %v1961_v40 }
 0x753   :  { %v6476_v49 = vpop.eup %6475 }
 0x754   :  { %v7773_v16 = vmul.f32 %v6476_v49, %v6474_v9 }
 0x756   :  { %v1991_v12 = vrot.slane %v7773_v16, 6 }
 0x758   :  { %v6478_v13 = vpop.eup %6477  ;;  %v1994_v52 = vrot.slane %v1991_v12, 2 }
 0x759   :  { %v6480_v26 = vpop.eup %6479  ;;  %v1969_v11 = vadd.f32 1.0, %v6478_v13  ;;  %v8826_v13 = vld [vmem:[#allocation47_spill] sm:$0xff] }
 0x75a   :  { %v1970_v2 = vadd.f32 1.0, %v6480_v26  ;;  %2061 = vmatprep.mubr.f32.mxu0 %v1994_v52  ;;  %2132 = vmatprep.mubr.f32.mxu1 %v1994_v52  ;;  %v6482_v46 = vpop.eup %6481  ;;  %v8827_v26 = vld [vmem:[#allocation52_spill] sm:$0xff] }
 0x75b   :  { %6485 = vrcp.f32 %v1969_v11  ;;  %v6484_v19 = vpop.eup %6483  ;;  %v1978_v9 = vadd.f32 1.0, %v6482_v46  ;;  %v8828_v11 = vld [vmem:[#allocation49_spill] sm:$0xff]  ;;  %v8830_v46 = vld [vmem:[#allocation51_spill] sm:$0xff] }
 0x75c   :  { %6487 = vrcp.f32 %v1970_v2  ;;  %v8829_v2 = vld [vmem:[#allocation54_spill] sm:$0xff] }
 0x75d   :  { %6489 = vrcp.f32 %v1978_v9  ;;  %v8836_v9 = vld [vmem:[#allocation59_spill] sm:$0xff] }
 0x765   :  { %v6486_v0 = vpop.eup %6485 }
 0x766   :  { %v6488_v1 = vpop.eup %6487  ;;  %v1986_v35 = vmul.f32 %v6486_v0, %v6484_v19  ;;  %v8831_v19 = vld [vmem:[#allocation56_spill] sm:$0xff]  ;;  %v8832_v0 = vld [vmem:[#allocation53_spill] sm:$0xff] }
 0x767   :  { %v1985_v61 = vmul.f32 %v6488_v1, %v1983_v51  ;;  %v6490_v22 = vpop.eup %6489  ;;  %v8833_v51 = vld [vmem:[#allocation57_spill] sm:$0xff]  ;;  %v8834_v1 = vld [vmem:[#allocation55_spill] sm:$0xff] }
 0x769   :  { %v7778_v49 = vadd.f32 %v1986_v35, %v1985_v61  ;;  %v8835_v35 = vld [vmem:[#allocation58_spill] sm:$0xff]  ;;  %v8837_v61 = vld [vmem:[#allocation60_spill] sm:$0xff] }
 0x76b   :  { %6491 = vtanh.f32 %v7778_v49 }
 0x775   :  { %v6492_v40 = vpop.eup %6491 }
 0x776   :  { %v1989_v12 = vmul.f32 %v6492_v40, %v6490_v22  ;;  %v8838_v22 = vld [vmem:[#allocation61_spill] sm:$0xff]  ;;  %v8839_v40 = vld [vmem:[#allocation62_spill] sm:$0xff] }
 0x778   :  { %v1993_v52 = vrot.slane %v1989_v12, 2  ;;  %v8840_v12 = vld [vmem:[#allocation63_spill] sm:$0xff] }
 0x77a   :  { %2062 = vmatmul.mubr.f32.vlgmr.msra.gmra.mrb[18].mxu0 %v1993_v52  ;;  %2133 = vmatmul.mubr.f32.vlgmr.msra.gmra.mrb[18].mxu1 %v1993_v52 }
 0x77b   :  { %5403 = vmatpush1.bf16.msra.mxu0 %v7230_v14  ;;  %5435 = vmatpush1.bf16.msra.mxu1 %v7243_v31 }
 0x77c   :  { %5405 = vmatprep.subr.bf16.mxu0 %v7232_v17  ;;  %5437 = vmatprep.subr.bf16.mxu1 %v7253_v39 }
 0x77d   :  { %2227 = vmatprep.mubr.f32.mxu0 %v8646_v37  ;;  %2298 = vmatprep.mubr.f32.mxu1 %v8646_v37 }
 0x77f   :  { %5407 = vmatpush1.bf16.msra.mxu0 %v7236_v7  ;;  %5439 = vmatpush1.bf16.msra.mxu1 %v7255_v43 }
 0x780   :  { %5409 = vmatprep.subr.bf16.mxu0 %v7239_v23  ;;  %5441 = vmatprep.subr.bf16.mxu1 %v7261_v55 }
 0x783   :  { %5411 = vmatpush1.bf16.msra.mxu0 %v7246_v32  ;;  %5443 = vmatpush1.bf16.msra.mxu1 %v7267_v58 }
 0x784   :  { %5413 = vmatprep.subr.bf16.mxu0 %v7250_v36  ;;  %5445 = vmatprep.subr.bf16.mxu1 %v7270_v5 }
 0x787   :  { %5415 = vmatpush1.bf16.msra.mxu0 %v7259_v48  ;;  %5447 = vmatpush1.bf16.msra.mxu1 %v7279_v21 }
 0x788   :  { %5417 = vmatprep.subr.bf16.mxu0 %v7264_v56  ;;  %5449 = vmatprep.subr.bf16.mxu1 %v7282_v24 }
 0x78b   :  { %5419 = vmatpush1.bf16.msra.mxu0 %v7273_v10  ;;  %5451 = vmatpush1.bf16.msra.mxu1 %v7291_v38 }
 0x78c   :  { %5421 = vmatprep.subr.bf16.mxu0 %v7276_v18  ;;  %5453 = vmatprep.subr.bf16.mxu1 %v7294_v41 }
 0x78f   :  { %5423 = vmatpush1.bf16.msra.mxu0 %v7285_v30  ;;  %5455 = vmatpush1.bf16.msra.mxu1 %v7303_v60 }
 0x790   :  { %5425 = vmatprep.subr.bf16.mxu0 %v7288_v33  ;;  %5457 = vmatprep.subr.bf16.mxu1 %v7306_v3 }
 0x793   :  { %5427 = vmatpush1.bf16.msra.mxu0 %v7297_v47  ;;  %5459 = vmatpush1.bf16.msra.mxu1 %v7313_v15 }
 0x794   :  { %5429 = vmatprep.subr.bf16.mxu0 %v7300_v50  ;;  %5461 = vmatprep.subr.bf16.mxu1 %v7318_v29 }
 0x797   :  { %5431 = vmatpush1.bf16.msra.mxu0 %v7309_v20  ;;  %5463 = vmatpush1.bf16.msra.mxu1 %v7324_v45 }
 0x798   :  { %5465 = vmatprep.subr.bf16.mxu0 %v7315_v25  ;;  %5529 = vmatprep.subr.bf16.mxu1 %v7330_v6 }
 0x79a   :  { %2228 = vmatmul.mubr.f32.vlgmr.msra.gmra.mrb[20].mxu0 %v1993_v52  ;;  %2299 = vmatmul.mubr.f32.vlgmr.msra.gmra.mrb[20].mxu1 %v1993_v52  ;;  %v8841_v52 = vld [vmem:[#allocation64_spill] sm:$0xff] }
 0x79b   :  { %5467 = vmatpush1.bf16.msra.mxu0 %v7321_v44  ;;  %5531 = vmatpush1.bf16.msra.mxu1 %v7338_v27 }
 0x79c   :  { %5469 = vmatprep.subr.bf16.mxu0 %v7327_v53  ;;  %5533 = vmatprep.subr.bf16.mxu1 %v7344_v42 }
 0x79f   :  { %5471 = vmatpush1.bf16.msra.mxu0 %v8699_v63  ;;  %5535 = vmatpush1.bf16.msra.mxu1 %v7351_v8 }
 0x7a0   :  { %5473 = vmatprep.subr.bf16.mxu0 %v8700_v4  ;;  %5537 = vmatprep.subr.bf16.mxu1 %v8825_v54 }
 0x7a3   :  { %5475 = vmatpush1.bf16.msra.mxu0 %v8826_v13  ;;  %5539 = vmatpush1.bf16.msra.mxu1 %v8827_v26 }
 0x7a4   :  { %5477 = vmatprep.subr.bf16.mxu0 %v8828_v11  ;;  %5541 = vmatprep.subr.bf16.mxu1 %v8829_v2 }
 0x7a7   :  { %5479 = vmatpush1.bf16.msra.mxu0 %v8830_v46  ;;  %5543 = vmatpush1.bf16.msra.mxu1 %v8831_v19  ;;  %v8842_v19 = vld [vmem:[#allocation65_spill] sm:$0xff] }
 0x7a8   :  { %5481 = vmatprep.subr.bf16.mxu0 %v8832_v0  ;;  %5545 = vmatprep.subr.bf16.mxu1 %v8833_v51  ;;  %v8843_v0 = vld [vmem:[#allocation66_spill] sm:$0xff]  ;;  %v8844_v51 = vld [vmem:[#allocation67_spill] sm:$0xff]  ;;  %v8882_v46 = vld [vmem:[#allocation45_spill] sm:$0xff] }
 0x7ab   :  { %5483 = vmatpush1.bf16.msra.mxu0 %v8834_v1  ;;  %5547 = vmatpush1.bf16.msra.mxu1 %v8835_v35  ;;  %v8845_v1 = vld [vmem:[#allocation68_spill] sm:$0xff]  ;;  %v8846_v35 = vld [vmem:[#allocation69_spill] sm:$0xff] }
 0x7ac   :  { %5485 = vmatprep.subr.bf16.mxu0 %v8836_v9  ;;  %5549 = vmatprep.subr.bf16.mxu1 %v8837_v61  ;;  %v8847_v9 = vld [vmem:[#allocation70_spill] sm:$0xff]  ;;  %v8848_v61 = vld [vmem:[#allocation71_spill] sm:$0xff] }
 0x7af   :  { %5487 = vmatpush1.bf16.msra.mxu0 %v8838_v22  ;;  %5551 = vmatpush1.bf16.msra.mxu1 %v8839_v40  ;;  %v8849_v22 = vld [vmem:[#allocation72_spill] sm:$0xff]  ;;  %v8850_v40 = vld [vmem:[#allocation73_spill] sm:$0xff] }
 0x7b0   :  { %5489 = vmatprep.subr.bf16.mxu0 %v8840_v12  ;;  %5553 = vmatprep.subr.bf16.mxu1 %v8841_v52  ;;  %v8851_v12 = vld [vmem:[#allocation74_spill] sm:$0xff]  ;;  %v8852_v52 = vld [vmem:[#allocation75_spill] sm:$0xff] }
 0x7b3   :  { %5491 = vmatpush1.bf16.msra.mxu0 %v8842_v19  ;;  %5555 = vmatpush1.bf16.msra.mxu1 %v8843_v0  ;;  %v8853_v19 = vld [vmem:[#allocation76_spill] sm:$0xff]  ;;  %v8854_v0 = vld [vmem:[#allocation77_spill] sm:$0xff] }
 0x7b4   :  { %5493 = vmatprep.subr.bf16.mxu0 %v8844_v51  ;;  %5557 = vmatprep.subr.bf16.mxu1 %v8845_v1  ;;  %v8855_v51 = vld [vmem:[#allocation78_spill] sm:$0xff]  ;;  %v8856_v1 = vld [vmem:[#allocation79_spill] sm:$0xff] }
 0x7b7   :  { %5495 = vmatpush1.bf16.msra.mxu0 %v8846_v35  ;;  %5559 = vmatpush1.bf16.msra.mxu1 %v8847_v9  ;;  %v8857_v35 = vld [vmem:[#allocation80_spill] sm:$0xff]  ;;  %v8858_v9 = vld [vmem:[#allocation81_spill] sm:$0xff] }
 0x7b8   :  { %5497 = vmatprep.subr.bf16.mxu0 %v8848_v61  ;;  %5561 = vmatprep.subr.bf16.mxu1 %v8849_v22  ;;  %v8859_v61 = vld [vmem:[#allocation82_spill] sm:$0xff]  ;;  %v8860_v22 = vld [vmem:[#allocation83_spill] sm:$0xff] }
 0x7bb   :  { %5499 = vmatpush1.bf16.msra.mxu0 %v8850_v40  ;;  %5563 = vmatpush1.bf16.msra.mxu1 %v8851_v12  ;;  %v8861_v40 = vld [vmem:[#allocation84_spill] sm:$0xff]  ;;  %v8862_v12 = vld [vmem:[#allocation85_spill] sm:$0xff] }
 0x7bc   :  { %5501 = vmatprep.subr.bf16.mxu0 %v8852_v52  ;;  %5565 = vmatprep.subr.bf16.mxu1 %v8853_v19  ;;  %v8863_v52 = vld [vmem:[#allocation86_spill] sm:$0xff]  ;;  %v8864_v19 = vld [vmem:[#allocation87_spill] sm:$0xff] }
 0x7bf   :  { %5503 = vmatpush1.bf16.msra.mxu0 %v8854_v0  ;;  %5567 = vmatpush1.bf16.msra.mxu1 %v8855_v51  ;;  %v8865_v0 = vld [vmem:[#allocation88_spill] sm:$0xff]  ;;  %v8866_v51 = vld [vmem:[#allocation89_spill] sm:$0xff] }
 0x7c0   :  { %5505 = vmatprep.subr.bf16.mxu0 %v8856_v1  ;;  %5569 = vmatprep.subr.bf16.mxu1 %v8857_v35  ;;  %v8867_v1 = vld [vmem:[#allocation90_spill] sm:$0xff]  ;;  %v8868_v35 = vld [vmem:[#allocation91_spill] sm:$0xff] }
 0x7c3   :  { %5507 = vmatpush1.bf16.msra.mxu0 %v8858_v9  ;;  %5571 = vmatpush1.bf16.msra.mxu1 %v8859_v61  ;;  %v8869_v9 = vld [vmem:[#allocation92_spill] sm:$0xff]  ;;  %v8870_v61 = vld [vmem:[#allocation93_spill] sm:$0xff] }
 0x7c4   :  { %5509 = vmatprep.subr.bf16.mxu0 %v8860_v22  ;;  %5573 = vmatprep.subr.bf16.mxu1 %v8861_v40  ;;  %v8871_v22 = vld [vmem:[#allocation94_spill] sm:$0xff]  ;;  %v8872_v40 = vld [vmem:[#allocation95_spill] sm:$0xff] }
 0x7c7   :  { %5511 = vmatpush1.bf16.msra.mxu0 %v8862_v12  ;;  %5575 = vmatpush1.bf16.msra.mxu1 %v8863_v52  ;;  %v8873_v12 = vld [vmem:[#allocation96_spill] sm:$0xff]  ;;  %v8874_v52 = vld [vmem:[#allocation97_spill] sm:$0xff] }
 0x7c8   :  { %5513 = vmatprep.subr.bf16.mxu0 %v8864_v19  ;;  %5577 = vmatprep.subr.bf16.mxu1 %v8865_v0  ;;  %v8875_v19 = vld [vmem:[#allocation98_spill] sm:$0xff]  ;;  %v8876_v0 = vld [vmem:[#allocation99_spill] sm:$0xff] }
 0x7cb   :  { %5515 = vmatpush1.bf16.msra.mxu0 %v8866_v51  ;;  %5579 = vmatpush1.bf16.msra.mxu1 %v8867_v1  ;;  %v8877_v51 = vld [vmem:[#allocation100_spill] sm:$0xff]  ;;  %v8878_v1 = vld [vmem:[#allocation101_spill] sm:$0xff] }
 0x7cc   :  { %5517 = vmatprep.subr.bf16.mxu0 %v8868_v35  ;;  %5581 = vmatprep.subr.bf16.mxu1 %v8869_v9  ;;  %v8879_v35 = vld [vmem:[#allocation102_spill] sm:$0xff]  ;;  %v8880_v9 = vld [vmem:[#allocation43_spill] sm:$0xff] }
 0x7cf   :  { %5519 = vmatpush1.bf16.msra.mxu0 %v8870_v61  ;;  %5583 = vmatpush1.bf16.msra.mxu1 %v8871_v22  ;;  %v8881_v61 = vld [vmem:[#allocation44_spill] sm:$0xff] }
 0x7d0   :  { %5521 = vmatprep.subr.bf16.mxu0 %v8872_v40  ;;  %5585 = vmatprep.subr.bf16.mxu1 %v8873_v12 }
 0x7d3   :  { %5523 = vmatpush1.bf16.msra.mxu0 %v8874_v52  ;;  %5587 = vmatpush1.bf16.msra.mxu1 %v8875_v19 }
 0x7d4   :  { %5525 = vmatprep.subr.bf16.mxu0 %v8876_v0  ;;  %5589 = vmatprep.subr.bf16.mxu1 %v8877_v51  ;;  %v8883_v51 = vld [vmem:[#allocation37_spill] sm:$0xff] }
 0x7d7   :  { %5527 = vmatpush1.bf16.msra.mxu0 %v8878_v1  ;;  %5591 = vmatpush1.bf16.msra.mxu1 %v8879_v35  ;;  %v8884_v35 = vld [vmem:[#allocation38_spill] sm:$0xff] }
 0x7d8   :  { %5593 = vmatprep.subr.bf16.mxu0 %v8880_v9  ;;  %5625 = vmatprep.subr.bf16.mxu1 %v8881_v61 }
 0x84d   :  { %v2063_v22 = vpop.f32.mrb[18].mxu0  ;;  %v2134_v40 = vpop.f32.mrb[18].mxu1 }
 0x84e   :  { %v2064_v12 = vadd.f32 %v2063_v22, %v8882_v46  ;;  %v2065_v2 = vpop.f32.mrb[19].mxu0  ;;  %v2136_v52 = vpop.f32.mrb[19].mxu1  ;;  %v2135_v13 = vadd.f32 %v2134_v40, %v8884_v35 }
 0x84f   :  { %v2066_v19 = vadd.f32 %v2065_v2, %v8821_v34  ;;  %v2137_v1 = vadd.f32 %v2136_v52, %v8883_v51 }
 0x850   :  { %v4217_v11 = vmul.f32 -1.442695, %v2064_v12 }
 0x851   :  { %v4218_v0 = vmul.f32 -1.442695, %v2066_v19  ;;  %v4219_v26 = vmul.f32 -1.442695, %v2137_v1 }
 0x852   :  { %6493 = vpow2.f32 %v4217_v11 }
 0x853   :  { %6495 = vpow2.f32 %v4218_v0 }
 0x854   :  { %6497 = vpow2.f32 %v4219_v26 }
 0x855   :  { %6499 = vtanh.f32 %v2135_v13 }
 0x85c   :  { %v6494_v9 = vpop.eup %6493 }
 0x85d   :  { %v6496_v54 = vpop.eup %6495  ;;  %v2145_v61 = vadd.f32 1.0, %v6494_v9 }
 0x85e   :  { %v2146_v4 = vadd.f32 1.0, %v6496_v54  ;;  %v6498_v22 = vpop.eup %6497 }
 0x85f   :  { %6501 = vrcp.f32 %v2145_v61  ;;  %v6500_v46 = vpop.eup %6499  ;;  %v2154_v11 = vadd.f32 1.0, %v6498_v22 }
 0x860   :  { %6503 = vrcp.f32 %v2146_v4  ;;  %v8885_v4 = vld [vmem:[#allocation41_spill] sm:$0xff] }
 0x861   :  { %6505 = vrcp.f32 %v2154_v11  ;;  %v3953_v11 = vrot.slane %v7773_v16, 7 }
 0x869   :  { %v6502_v2 = vpop.eup %6501 }
 0x86a   :  { %v6504_v12 = vpop.eup %6503  ;;  %v2159_v19 = vmul.f32 %v6502_v2, %v6500_v46 }
 0x86b   :  { %v2158_v0 = vmul.f32 %v6504_v12, %v7767_v28  ;;  %v6506_v2 = vpop.eup %6505 }
 0x86d   :  { %v7884_v52 = vadd.f32 %v2159_v19, %v2158_v0  ;;  %v2229_v1 = vpop.f32.mrb[20].mxu0  ;;  %v2300_v40 = vpop.f32.mrb[20].mxu1 }
 0x86e   :  { %v2309_v35 = vrot.slane %v2229_v1, 5  ;;  %v2231_v9 = vpop.f32.mrb[21].mxu0  ;;  %v2302_v26 = vpop.f32.mrb[21].mxu1  ;;  %v2311_v12 = vrot.slane %v2300_v40, 5 }
 0x86f   :  { %v2310_v13 = vrot.slane %v2231_v9, 5  ;;  %6507 = vtanh.f32 %v7884_v52  ;;  %v2312_v22 = vrot.slane %v2302_v26, 5 }
 0x870   :  { %v2317_v54 = vadd.f32 %v2309_v35, %v8885_v4  ;;  %v2319_v35 = vadd.f32 %v2311_v12, %v7215_v59 }
 0x871   :  { %v2318_v61 = vadd.f32 %v2310_v13, %v8762_v57  ;;  %v2320_v28 = vadd.f32 %v2312_v22, %v7217_v62 }
 0x872   :  { %v4220_v51 = vmul.f32 -1.442695, %v2317_v54  ;;  %v8886_v54 = vld [vmem:[#allocation42_spill] sm:$0xff] }
 0x873   :  { %v4221_v46 = vmul.f32 -1.442695, %v2318_v61  ;;  %v4222_v1 = vmul.f32 -1.442695, %v2320_v28  ;;  %v3969_v26 = vsel %vm3968_vm1, %v8886_v54, %v3953_v11 }
 0x874   :  { %6509 = vpow2.f32 %v4220_v51 }
 0x875   :  { %6511 = vpow2.f32 %v4221_v46 }
 0x876   :  { %6513 = vpow2.f32 %v4222_v1 }
 0x877   :  { %6515 = vtanh.f32 %v2319_v35 }
 0x879   :  { %v6508_v19 = vpop.eup %6507 }
 0x87a   :  { %v2162_v0 = vmul.f32 %v6508_v19, %v6506_v2  ;;  %v2341_v19 = vrot.slane %v7778_v49, 7  ;;  %v8887_v49 = vld [vmem:[#allocation46_spill] sm:$0xff] }
 0x87c   :  { %v2349_v9 = vrot.slane %v2162_v0, 5  ;;  %v3955_v13 = vrot.slane %v2162_v0, 6 }
 0x87e   :  { %v6510_v51 = vpop.eup %6509  ;;  %v2352_v61 = vrot.slane %v2349_v9, 3  ;;  %v7894_v46 = vsel %vm3970_vm2, %v3969_v26, %v3955_v13 }
 0x87f   :  { %v6512_v22 = vpop.eup %6511  ;;  %v2327_v40 = vadd.f32 1.0, %v6510_v51 }
 0x880   :  { %v2328_v16 = vadd.f32 1.0, %v6512_v22  ;;  %2419 = vmatprep.mubr.f32.mxu0 %v2352_v61  ;;  %2490 = vmatprep.mubr.f32.mxu1 %v2352_v61  ;;  %v6514_v28 = vpop.eup %6513  ;;  %v8888_v61 = vld [vmem:[#allocation50_spill] sm:$0xff]  ;;  %v8889_v22 = vld [vmem:[#allocation47_spill] sm:$0xff] }
 0x881   :  { %6517 = vrcp.f32 %v2327_v40  ;;  %v6516_v2 = vpop.eup %6515  ;;  %v2336_v54 = vadd.f32 1.0, %v6514_v28  ;;  %v8890_v40 = vld [vmem:[#allocation52_spill] sm:$0xff]  ;;  %v8892_v28 = vld [vmem:[#allocation54_spill] sm:$0xff] }
 0x882   :  { %6519 = vrcp.f32 %v2328_v16  ;;  %v8891_v16 = vld [vmem:[#allocation49_spill] sm:$0xff] }
 0x883   :  { %6521 = vrcp.f32 %v2336_v54  ;;  %v8898_v54 = vld [vmem:[#allocation58_spill] sm:$0xff] }
 0x88b   :  { %v6518_v12 = vpop.eup %6517 }
 0x88c   :  { %v6520_v0 = vpop.eup %6519  ;;  %v2344_v11 = vmul.f32 %v6518_v12, %v6516_v2  ;;  %v8893_v2 = vld [vmem:[#allocation51_spill] sm:$0xff]  ;;  %v8894_v12 = vld [vmem:[#allocation56_spill] sm:$0xff] }
 0x88d   :  { %v2343_v9 = vmul.f32 %v6520_v0, %v2341_v19  ;;  %v6522_v1 = vpop.eup %6521  ;;  %v8895_v19 = vld [vmem:[#allocation53_spill] sm:$0xff] }
 0x88e   :  { %v8896_v0 = vld [vmem:[#allocation57_spill] sm:$0xff] }
 0x88f   :  { %v7897_v13 = vadd.f32 %v2344_v11, %v2343_v9  ;;  %v8897_v11 = vld [vmem:[#allocation55_spill] sm:$0xff] }
 0x890   :  { %v8899_v9 = vld [vmem:[#allocation59_spill] sm:$0xff] }
 0x891   :  { %6523 = vtanh.f32 %v7897_v13 }
 0x89b   :  { %v6524_v35 = vpop.eup %6523 }
 0x89c   :  { %v2347_v26 = vmul.f32 %v6524_v35, %v6522_v1  ;;  %v8900_v1 = vld [vmem:[#allocation60_spill] sm:$0xff]  ;;  %v8901_v35 = vld [vmem:[#allocation61_spill] sm:$0xff] }
 0x89e   :  { %v2351_v51 = vrot.slane %v2347_v26, 3  ;;  %v8902_v26 = vld [vmem:[#allocation62_spill] sm:$0xff] }
 0x8a0   :  { %2420 = vmatmul.mubr.f32.vlgmr.msra.gmra.mrb[22].mxu0 %v2351_v51  ;;  %2491 = vmatmul.mubr.f32.vlgmr.msra.gmra.mrb[22].mxu1 %v2351_v51 }
 0x8a1   :  { %5595 = vmatpush1.bf16.msra.mxu0 %v7230_v14  ;;  %5627 = vmatpush1.bf16.msra.mxu1 %v7243_v31 }
 0x8a2   :  { %5597 = vmatprep.subr.bf16.mxu0 %v7232_v17  ;;  %5629 = vmatprep.subr.bf16.mxu1 %v7253_v39 }
 0x8a3   :  { %2585 = vmatprep.mubr.f32.mxu0 %v8646_v37  ;;  %2656 = vmatprep.mubr.f32.mxu1 %v8646_v37 }
 0x8a5   :  { %5599 = vmatpush1.bf16.msra.mxu0 %v7236_v7  ;;  %5631 = vmatpush1.bf16.msra.mxu1 %v7255_v43 }
 0x8a6   :  { %5601 = vmatprep.subr.bf16.mxu0 %v7239_v23  ;;  %5633 = vmatprep.subr.bf16.mxu1 %v7261_v55 }
 0x8a9   :  { %5603 = vmatpush1.bf16.msra.mxu0 %v7246_v32  ;;  %5635 = vmatpush1.bf16.msra.mxu1 %v7267_v58 }
 0x8aa   :  { %5605 = vmatprep.subr.bf16.mxu0 %v7250_v36  ;;  %5637 = vmatprep.subr.bf16.mxu1 %v7270_v5 }
 0x8ad   :  { %5607 = vmatpush1.bf16.msra.mxu0 %v7259_v48  ;;  %5639 = vmatpush1.bf16.msra.mxu1 %v7279_v21 }
 0x8ae   :  { %5609 = vmatprep.subr.bf16.mxu0 %v7264_v56  ;;  %5641 = vmatprep.subr.bf16.mxu1 %v7282_v24 }
 0x8b1   :  { %5611 = vmatpush1.bf16.msra.mxu0 %v7273_v10  ;;  %5643 = vmatpush1.bf16.msra.mxu1 %v7291_v38 }
 0x8b2   :  { %5613 = vmatprep.subr.bf16.mxu0 %v7276_v18  ;;  %5645 = vmatprep.subr.bf16.mxu1 %v7294_v41 }
 0x8b5   :  { %5615 = vmatpush1.bf16.msra.mxu0 %v7285_v30  ;;  %5647 = vmatpush1.bf16.msra.mxu1 %v7303_v60 }
 0x8b6   :  { %5617 = vmatprep.subr.bf16.mxu0 %v7288_v33  ;;  %5649 = vmatprep.subr.bf16.mxu1 %v7306_v3 }
 0x8b9   :  { %5619 = vmatpush1.bf16.msra.mxu0 %v7297_v47  ;;  %5651 = vmatpush1.bf16.msra.mxu1 %v7313_v15 }
 0x8ba   :  { %5621 = vmatprep.subr.bf16.mxu0 %v7300_v50  ;;  %5653 = vmatprep.subr.bf16.mxu1 %v7318_v29 }
 0x8bd   :  { %5623 = vmatpush1.bf16.msra.mxu0 %v7309_v20  ;;  %5655 = vmatpush1.bf16.msra.mxu1 %v7324_v45 }
 0x8be   :  { %5657 = vmatprep.subr.bf16.mxu0 %v7315_v25  ;;  %5721 = vmatprep.subr.bf16.mxu1 %v7330_v6 }
 0x8c0   :  { %2586 = vmatmul.mubr.f32.vlgmr.msra.gmra.mrb[24].mxu0 %v2351_v51  ;;  %2657 = vmatmul.mubr.f32.vlgmr.msra.gmra.mrb[24].mxu1 %v2351_v51  ;;  %v8903_v51 = vld [vmem:[#allocation63_spill] sm:$0xff] }
 0x8c1   :  { %5659 = vmatpush1.bf16.msra.mxu0 %v7321_v44  ;;  %5723 = vmatpush1.bf16.msra.mxu1 %v7338_v27 }
 0x8c2   :  { %5661 = vmatprep.subr.bf16.mxu0 %v7327_v53  ;;  %5725 = vmatprep.subr.bf16.mxu1 %v7344_v42 }
 0x8c5   :  { %5663 = vmatpush1.bf16.msra.mxu0 %v8699_v63  ;;  %5727 = vmatpush1.bf16.msra.mxu1 %v7351_v8 }
 0x8c6   :  { %5665 = vmatprep.subr.bf16.mxu0 %v8887_v49  ;;  %5729 = vmatprep.subr.bf16.mxu1 %v8888_v61 }
 0x8c9   :  { %5667 = vmatpush1.bf16.msra.mxu0 %v8889_v22  ;;  %5731 = vmatpush1.bf16.msra.mxu1 %v8890_v40 }
 0x8ca   :  { %5669 = vmatprep.subr.bf16.mxu0 %v8891_v16  ;;  %5733 = vmatprep.subr.bf16.mxu1 %v8892_v28  ;;  %v8945_v28 = vld [vmem:[#allocation45_spill] sm:$0xff] }
 0x8cd   :  { %5671 = vmatpush1.bf16.msra.mxu0 %v8893_v2  ;;  %5735 = vmatpush1.bf16.msra.mxu1 %v8894_v12  ;;  %v8904_v2 = vld [vmem:[#allocation64_spill] sm:$0xff]  ;;  %v8905_v12 = vld [vmem:[#allocation65_spill] sm:$0xff] }
 0x8ce   :  { %5673 = vmatprep.subr.bf16.mxu0 %v8895_v19  ;;  %5737 = vmatprep.subr.bf16.mxu1 %v8896_v0  ;;  %v8906_v19 = vld [vmem:[#allocation66_spill] sm:$0xff]  ;;  %v8907_v0 = vld [vmem:[#allocation67_spill] sm:$0xff] }
 0x8d1   :  { %5675 = vmatpush1.bf16.msra.mxu0 %v8897_v11  ;;  %5739 = vmatpush1.bf16.msra.mxu1 %v8898_v54  ;;  %v8908_v11 = vld [vmem:[#allocation68_spill] sm:$0xff]  ;;  %v8909_v54 = vld [vmem:[#allocation69_spill] sm:$0xff] }
 0x8d2   :  { %5677 = vmatprep.subr.bf16.mxu0 %v8899_v9  ;;  %5741 = vmatprep.subr.bf16.mxu1 %v8900_v1  ;;  %v8910_v9 = vld [vmem:[#allocation70_spill] sm:$0xff]  ;;  %v8911_v1 = vld [vmem:[#allocation71_spill] sm:$0xff] }
 0x8d5   :  { %5679 = vmatpush1.bf16.msra.mxu0 %v8901_v35  ;;  %5743 = vmatpush1.bf16.msra.mxu1 %v8902_v26  ;;  %v8912_v35 = vld [vmem:[#allocation72_spill] sm:$0xff]  ;;  %v8913_v26 = vld [vmem:[#allocation73_spill] sm:$0xff] }
 0x8d6   :  { %5681 = vmatprep.subr.bf16.mxu0 %v8903_v51  ;;  %5745 = vmatprep.subr.bf16.mxu1 %v8904_v2  ;;  %v8914_v51 = vld [vmem:[#allocation74_spill] sm:$0xff]  ;;  %v8915_v2 = vld [vmem:[#allocation75_spill] sm:$0xff] }
 0x8d9   :  { %5683 = vmatpush1.bf16.msra.mxu0 %v8905_v12  ;;  %5747 = vmatpush1.bf16.msra.mxu1 %v8906_v19  ;;  %v8916_v12 = vld [vmem:[#allocation76_spill] sm:$0xff]  ;;  %v8917_v19 = vld [vmem:[#allocation77_spill] sm:$0xff] }
 0x8da   :  { %5685 = vmatprep.subr.bf16.mxu0 %v8907_v0  ;;  %5749 = vmatprep.subr.bf16.mxu1 %v8908_v11  ;;  %v8918_v0 = vld [vmem:[#allocation78_spill] sm:$0xff]  ;;  %v8919_v11 = vld [vmem:[#allocation79_spill] sm:$0xff] }
 0x8dd   :  { %5687 = vmatpush1.bf16.msra.mxu0 %v8909_v54  ;;  %5751 = vmatpush1.bf16.msra.mxu1 %v8910_v9  ;;  %v8920_v54 = vld [vmem:[#allocation80_spill] sm:$0xff]  ;;  %v8921_v9 = vld [vmem:[#allocation81_spill] sm:$0xff] }
 0x8de   :  { %5689 = vmatprep.subr.bf16.mxu0 %v8911_v1  ;;  %5753 = vmatprep.subr.bf16.mxu1 %v8912_v35  ;;  %v8922_v1 = vld [vmem:[#allocation82_spill] sm:$0xff]  ;;  %v8923_v35 = vld [vmem:[#allocation83_spill] sm:$0xff] }
 0x8e1   :  { %5691 = vmatpush1.bf16.msra.mxu0 %v8913_v26  ;;  %5755 = vmatpush1.bf16.msra.mxu1 %v8914_v51  ;;  %v8924_v26 = vld [vmem:[#allocation84_spill] sm:$0xff]  ;;  %v8925_v51 = vld [vmem:[#allocation85_spill] sm:$0xff] }
 0x8e2   :  { %5693 = vmatprep.subr.bf16.mxu0 %v8915_v2  ;;  %5757 = vmatprep.subr.bf16.mxu1 %v8916_v12  ;;  %v8926_v2 = vld [vmem:[#allocation86_spill] sm:$0xff]  ;;  %v8927_v12 = vld [vmem:[#allocation87_spill] sm:$0xff] }
 0x8e5   :  { %5695 = vmatpush1.bf16.msra.mxu0 %v8917_v19  ;;  %5759 = vmatpush1.bf16.msra.mxu1 %v8918_v0  ;;  %v8928_v19 = vld [vmem:[#allocation88_spill] sm:$0xff]  ;;  %v8929_v0 = vld [vmem:[#allocation89_spill] sm:$0xff] }
 0x8e6   :  { %5697 = vmatprep.subr.bf16.mxu0 %v8919_v11  ;;  %5761 = vmatprep.subr.bf16.mxu1 %v8920_v54  ;;  %v8930_v11 = vld [vmem:[#allocation90_spill] sm:$0xff]  ;;  %v8931_v54 = vld [vmem:[#allocation91_spill] sm:$0xff] }
 0x8e9   :  { %5699 = vmatpush1.bf16.msra.mxu0 %v8921_v9  ;;  %5763 = vmatpush1.bf16.msra.mxu1 %v8922_v1  ;;  %v8932_v9 = vld [vmem:[#allocation92_spill] sm:$0xff]  ;;  %v8933_v1 = vld [vmem:[#allocation93_spill] sm:$0xff] }
 0x8ea   :  { %5701 = vmatprep.subr.bf16.mxu0 %v8923_v35  ;;  %5765 = vmatprep.subr.bf16.mxu1 %v8924_v26  ;;  %v8934_v35 = vld [vmem:[#allocation94_spill] sm:$0xff]  ;;  %v8935_v26 = vld [vmem:[#allocation95_spill] sm:$0xff] }
 0x8ed   :  { %5703 = vmatpush1.bf16.msra.mxu0 %v8925_v51  ;;  %5767 = vmatpush1.bf16.msra.mxu1 %v8926_v2  ;;  %v8936_v51 = vld [vmem:[#allocation96_spill] sm:$0xff]  ;;  %v8937_v2 = vld [vmem:[#allocation97_spill] sm:$0xff] }
 0x8ee   :  { %5705 = vmatprep.subr.bf16.mxu0 %v8927_v12  ;;  %5769 = vmatprep.subr.bf16.mxu1 %v8928_v19  ;;  %v8938_v12 = vld [vmem:[#allocation98_spill] sm:$0xff]  ;;  %v8939_v19 = vld [vmem:[#allocation99_spill] sm:$0xff] }
 0x8f1   :  { %5707 = vmatpush1.bf16.msra.mxu0 %v8929_v0  ;;  %5771 = vmatpush1.bf16.msra.mxu1 %v8930_v11  ;;  %v8940_v0 = vld [vmem:[#allocation100_spill] sm:$0xff]  ;;  %v8941_v11 = vld [vmem:[#allocation101_spill] sm:$0xff] }
 0x8f2   :  { %5709 = vmatprep.subr.bf16.mxu0 %v8931_v54  ;;  %5773 = vmatprep.subr.bf16.mxu1 %v8932_v9  ;;  %v8942_v54 = vld [vmem:[#allocation102_spill] sm:$0xff]  ;;  %v8943_v9 = vld [vmem:[#allocation43_spill] sm:$0xff] }
 0x8f5   :  { %5711 = vmatpush1.bf16.msra.mxu0 %v8933_v1  ;;  %5775 = vmatpush1.bf16.msra.mxu1 %v8934_v35  ;;  %v8944_v1 = vld [vmem:[#allocation44_spill] sm:$0xff] }
 0x8f6   :  { %5713 = vmatprep.subr.bf16.mxu0 %v8935_v26  ;;  %5777 = vmatprep.subr.bf16.mxu1 %v8936_v51 }
 0x8f9   :  { %5715 = vmatpush1.bf16.msra.mxu0 %v8937_v2  ;;  %5779 = vmatpush1.bf16.msra.mxu1 %v8938_v12 }
 0x8fa   :  { %5717 = vmatprep.subr.bf16.mxu0 %v8939_v19  ;;  %5781 = vmatprep.subr.bf16.mxu1 %v8940_v0  ;;  %v8946_v0 = vld [vmem:[#allocation37_spill] sm:$0xff] }
 0x8fd   :  { %5719 = vmatpush1.bf16.msra.mxu0 %v8941_v11  ;;  %5783 = vmatpush1.bf16.msra.mxu1 %v8942_v54  ;;  %v8947_v54 = vld [vmem:[#allocation38_spill] sm:$0xff] }
 0x8fe   :  { %5785 = vmatprep.subr.bf16.mxu0 %v8943_v9  ;;  %5817 = vmatprep.subr.bf16.mxu1 %v8944_v1 }
 0x973   :  { %v2421_v35 = vpop.f32.mrb[22].mxu0  ;;  %v2492_v26 = vpop.f32.mrb[22].mxu1 }
 0x974   :  { %v2422_v51 = vadd.f32 %v2421_v35, %v8945_v28  ;;  %v2423_v16 = vpop.f32.mrb[23].mxu0  ;;  %v2494_v2 = vpop.f32.mrb[23].mxu1  ;;  %v2493_v61 = vadd.f32 %v2492_v26, %v8947_v54 }
 0x975   :  { %v2424_v12 = vadd.f32 %v2423_v16, %v8821_v34  ;;  %v2495_v11 = vadd.f32 %v2494_v2, %v8946_v0 }
 0x976   :  { %v4223_v40 = vmul.f32 -1.442695, %v2422_v51 }
 0x977   :  { %v4224_v19 = vmul.f32 -1.442695, %v2424_v12  ;;  %v4225_v22 = vmul.f32 -1.442695, %v2495_v11 }
 0x978   :  { %6525 = vpow2.f32 %v4223_v40 }
 0x979   :  { %6527 = vpow2.f32 %v4224_v19 }
 0x97a   :  { %6529 = vpow2.f32 %v4225_v22 }
 0x97b   :  { %6531 = vtanh.f32 %v2493_v61 }
 0x982   :  { %v6526_v9 = vpop.eup %6525 }
 0x983   :  { %v6528_v49 = vpop.eup %6527  ;;  %v2503_v1 = vadd.f32 1.0, %v6526_v9 }
 0x984   :  { %v2504_v8 = vadd.f32 1.0, %v6528_v49  ;;  %v6530_v35 = vpop.eup %6529 }
 0x985   :  { %6533 = vrcp.f32 %v2503_v1  ;;  %v6532_v28 = vpop.eup %6531  ;;  %v2512_v40 = vadd.f32 1.0, %v6530_v35 }
 0x986   :  { %6535 = vrcp.f32 %v2504_v8 }
 0x987   :  { %6537 = vrcp.f32 %v2512_v40 }
 0x98f   :  { %v6534_v16 = vpop.eup %6533 }
 0x990   :  { %v6536_v51 = vpop.eup %6535  ;;  %v2517_v12 = vmul.f32 %v6534_v16, %v6532_v28 }
 0x991   :  { %v2516_v19 = vmul.f32 %v6536_v51, %v7884_v52  ;;  %v6538_v16 = vpop.eup %6537 }
 0x993   :  { %v8003_v2 = vadd.f32 %v2517_v12, %v2516_v19  ;;  %v2587_v11 = vpop.f32.mrb[24].mxu0  ;;  %v2658_v26 = vpop.f32.mrb[24].mxu1 }
 0x994   :  { %v2667_v54 = vrot.slane %v2587_v11, 4  ;;  %v2589_v9 = vpop.f32.mrb[25].mxu0  ;;  %v2660_v22 = vpop.f32.mrb[25].mxu1  ;;  %v2669_v51 = vrot.slane %v2658_v26, 4 }
 0x995   :  { %8948 = vst [vmem:[#allocation42_spill] sm:$0xff] %v8003_v2  ;;  %v2668_v61 = vrot.slane %v2589_v9, 4  ;;  %6539 = vtanh.f32 %v8003_v2  ;;  %v2670_v35 = vrot.slane %v2660_v22, 4 }
 0x996   :  { %v2675_v8 = vadd.f32 %v2667_v54, %v8885_v4  ;;  %v2677_v11 = vadd.f32 %v2669_v51, %v7215_v59 }
 0x997   :  { %v2676_v49 = vadd.f32 %v2668_v61, %v8762_v57  ;;  %v2678_v52 = vadd.f32 %v2670_v35, %v7217_v62  ;;  %v2699_v35 = vrot.slane %v7897_v13, 7  ;;  %v8949_v13 = vld [vmem:[#allocation48_spill] sm:$0xff] }
 0x998   :  { %v4226_v1 = vmul.f32 -1.442695, %v2675_v8 }
 0x999   :  { %v4227_v28 = vmul.f32 -1.442695, %v2676_v49  ;;  %v4228_v19 = vmul.f32 -1.442695, %v2678_v52 }
 0x99a   :  { %6541 = vpow2.f32 %v4226_v1 }
 0x99b   :  { %6543 = vpow2.f32 %v4227_v28 }
 0x99c   :  { %6545 = vpow2.f32 %v4228_v19 }
 0x99d   :  { %6547 = vtanh.f32 %v2677_v11  ;;  %v8950_v11 = vld [vmem:[#allocation46_spill] sm:$0xff] }
 0x99f   :  { %v6540_v12 = vpop.eup %6539 }
 0x9a0   :  { %v2520_v40 = vmul.f32 %v6540_v12, %v6538_v16 }
 0x9a2   :  { %v2707_v9 = vrot.slane %v2520_v40, 4  ;;  %v3957_v2 = vrot.slane %v2520_v40, 5 }
 0x9a4   :  { %v6542_v54 = vpop.eup %6541  ;;  %v2710_v4 = vrot.slane %v2707_v9, 4  ;;  %v8011_v61 = vsel %vm3972_vm3, %v7894_v46, %v3957_v2  ;;  %v8951_v9 = vld [vmem:[#allocation50_spill] sm:$0xff] }
 0x9a5   :  { %v6544_v22 = vpop.eup %6543  ;;  %v2685_v8 = vadd.f32 1.0, %v6542_v54  ;;  %v8952_v54 = vld [vmem:[#allocation47_spill] sm:$0xff] }
 0x9a6   :  { %v2686_v49 = vadd.f32 1.0, %v6544_v22  ;;  %2777 = vmatprep.mubr.f32.mxu0 %v2710_v4  ;;  %2848 = vmatprep.mubr.f32.mxu1 %v2710_v4  ;;  %v6546_v26 = vpop.eup %6545  ;;  %v8953_v22 = vld [vmem:[#allocation52_spill] sm:$0xff] }
 0x9a7   :  { %6549 = vrcp.f32 %v2685_v8  ;;  %v6548_v1 = vpop.eup %6547  ;;  %v2694_v51 = vadd.f32 1.0, %v6546_v26  ;;  %v8954_v8 = vld [vmem:[#allocation49_spill] sm:$0xff]  ;;  %v8956_v26 = vld [vmem:[#allocation51_spill] sm:$0xff] }
 0x9a8   :  { %6551 = vrcp.f32 %v2686_v49  ;;  %v8955_v49 = vld [vmem:[#allocation54_spill] sm:$0xff] }
 0x9a9   :  { %6553 = vrcp.f32 %v2694_v51  ;;  %v8962_v51 = vld [vmem:[#allocation59_spill] sm:$0xff] }
 0x9b1   :  { %v6550_v28 = vpop.eup %6549 }
 0x9b2   :  { %v6552_v52 = vpop.eup %6551  ;;  %v2702_v16 = vmul.f32 %v6550_v28, %v6548_v1  ;;  %v8957_v1 = vld [vmem:[#allocation56_spill] sm:$0xff]  ;;  %v8958_v28 = vld [vmem:[#allocation53_spill] sm:$0xff] }
 0x9b3   :  { %v2701_v12 = vmul.f32 %v6552_v52, %v2699_v35  ;;  %v6554_v2 = vpop.eup %6553  ;;  %v8959_v35 = vld [vmem:[#allocation57_spill] sm:$0xff]  ;;  %v8960_v52 = vld [vmem:[#allocation55_spill] sm:$0xff] }
 0x9b5   :  { %v8014_v46 = vadd.f32 %v2702_v16, %v2701_v12  ;;  %v8961_v16 = vld [vmem:[#allocation58_spill] sm:$0xff]  ;;  %v8963_v12 = vld [vmem:[#allocation60_spill] sm:$0xff] }
 0x9b7   :  { %6555 = vtanh.f32 %v8014_v46 }
 0x9c1   :  { %v6556_v40 = vpop.eup %6555 }
 0x9c2   :  { %v2705_v19 = vmul.f32 %v6556_v40, %v6554_v2  ;;  %v8964_v2 = vld [vmem:[#allocation61_spill] sm:$0xff]  ;;  %v8965_v40 = vld [vmem:[#allocation62_spill] sm:$0xff] }
 0x9c4   :  { %v2709_v4 = vrot.slane %v2705_v19, 4  ;;  %v8966_v19 = vld [vmem:[#allocation63_spill] sm:$0xff] }
 0x9c6   :  { %2778 = vmatmul.mubr.f32.vlgmr.msra.gmra.mrb[26].mxu0 %v2709_v4  ;;  %2849 = vmatmul.mubr.f32.vlgmr.msra.gmra.mrb[26].mxu1 %v2709_v4 }
 0x9c7   :  { %5787 = vmatpush1.bf16.msra.mxu0 %v7230_v14  ;;  %5819 = vmatpush1.bf16.msra.mxu1 %v7243_v31 }
 0x9c8   :  { %5789 = vmatprep.subr.bf16.mxu0 %v7232_v17  ;;  %5821 = vmatprep.subr.bf16.mxu1 %v7253_v39 }
 0x9c9   :  { %2943 = vmatprep.mubr.f32.mxu0 %v8646_v37  ;;  %3014 = vmatprep.mubr.f32.mxu1 %v8646_v37 }
 0x9cb   :  { %5791 = vmatpush1.bf16.msra.mxu0 %v7236_v7  ;;  %5823 = vmatpush1.bf16.msra.mxu1 %v7255_v43 }
 0x9cc   :  { %5793 = vmatprep.subr.bf16.mxu0 %v7239_v23  ;;  %5825 = vmatprep.subr.bf16.mxu1 %v7261_v55 }
 0x9cf   :  { %5795 = vmatpush1.bf16.msra.mxu0 %v7246_v32  ;;  %5827 = vmatpush1.bf16.msra.mxu1 %v7267_v58 }
 0x9d0   :  { %5797 = vmatprep.subr.bf16.mxu0 %v7250_v36  ;;  %5829 = vmatprep.subr.bf16.mxu1 %v7270_v5 }
 0x9d3   :  { %5799 = vmatpush1.bf16.msra.mxu0 %v7259_v48  ;;  %5831 = vmatpush1.bf16.msra.mxu1 %v7279_v21 }
 0x9d4   :  { %5801 = vmatprep.subr.bf16.mxu0 %v7264_v56  ;;  %5833 = vmatprep.subr.bf16.mxu1 %v7282_v24 }
 0x9d7   :  { %5803 = vmatpush1.bf16.msra.mxu0 %v7273_v10  ;;  %5835 = vmatpush1.bf16.msra.mxu1 %v7291_v38 }
 0x9d8   :  { %5805 = vmatprep.subr.bf16.mxu0 %v7276_v18  ;;  %5837 = vmatprep.subr.bf16.mxu1 %v7294_v41 }
 0x9db   :  { %5807 = vmatpush1.bf16.msra.mxu0 %v7285_v30  ;;  %5839 = vmatpush1.bf16.msra.mxu1 %v7303_v60 }
 0x9dc   :  { %5809 = vmatprep.subr.bf16.mxu0 %v7288_v33  ;;  %5841 = vmatprep.subr.bf16.mxu1 %v7306_v3 }
 0x9df   :  { %5811 = vmatpush1.bf16.msra.mxu0 %v7297_v47  ;;  %5843 = vmatpush1.bf16.msra.mxu1 %v7313_v15 }
 0x9e0   :  { %5813 = vmatprep.subr.bf16.mxu0 %v7300_v50  ;;  %5845 = vmatprep.subr.bf16.mxu1 %v7318_v29 }
 0x9e3   :  { %5815 = vmatpush1.bf16.msra.mxu0 %v7309_v20  ;;  %5847 = vmatpush1.bf16.msra.mxu1 %v7324_v45 }
 0x9e4   :  { %5849 = vmatprep.subr.bf16.mxu0 %v7315_v25  ;;  %5913 = vmatprep.subr.bf16.mxu1 %v7330_v6 }
 0x9e6   :  { %2944 = vmatmul.mubr.f32.vlgmr.msra.gmra.mrb[28].mxu0 %v2709_v4  ;;  %3015 = vmatmul.mubr.f32.vlgmr.msra.gmra.mrb[28].mxu1 %v2709_v4  ;;  %v8967_v4 = vld [vmem:[#allocation64_spill] sm:$0xff] }
 0x9e7   :  { %5851 = vmatpush1.bf16.msra.mxu0 %v7321_v44  ;;  %5915 = vmatpush1.bf16.msra.mxu1 %v7338_v27 }
 0x9e8   :  { %5853 = vmatprep.subr.bf16.mxu0 %v7327_v53  ;;  %5917 = vmatprep.subr.bf16.mxu1 %v7344_v42 }
 0x9eb   :  { %5855 = vmatpush1.bf16.msra.mxu0 %v8699_v63  ;;  %5919 = vmatpush1.bf16.msra.mxu1 %v8949_v13 }
 0x9ec   :  { %5857 = vmatprep.subr.bf16.mxu0 %v8950_v11  ;;  %5921 = vmatprep.subr.bf16.mxu1 %v8951_v9 }
 0x9ef   :  { %5859 = vmatpush1.bf16.msra.mxu0 %v8952_v54  ;;  %5923 = vmatpush1.bf16.msra.mxu1 %v8953_v22 }
 0x9f0   :  { %5861 = vmatprep.subr.bf16.mxu0 %v8954_v8  ;;  %5925 = vmatprep.subr.bf16.mxu1 %v8955_v49 }
 0x9f3   :  { %5863 = vmatpush1.bf16.msra.mxu0 %v8956_v26  ;;  %5927 = vmatpush1.bf16.msra.mxu1 %v8957_v1  ;;  %v8968_v1 = vld [vmem:[#allocation65_spill] sm:$0xff] }
 0x9f4   :  { %5865 = vmatprep.subr.bf16.mxu0 %v8958_v28  ;;  %5929 = vmatprep.subr.bf16.mxu1 %v8959_v35  ;;  %v8969_v28 = vld [vmem:[#allocation66_spill] sm:$0xff]  ;;  %v8970_v35 = vld [vmem:[#allocation67_spill] sm:$0xff]  ;;  %v9008_v26 = vld [vmem:[#allocation45_spill] sm:$0xff] }
 0x9f7   :  { %5867 = vmatpush1.bf16.msra.mxu0 %v8960_v52  ;;  %5931 = vmatpush1.bf16.msra.mxu1 %v8961_v16  ;;  %v8971_v52 = vld [vmem:[#allocation68_spill] sm:$0xff]  ;;  %v8972_v16 = vld [vmem:[#allocation69_spill] sm:$0xff] }
 0x9f8   :  { %5869 = vmatprep.subr.bf16.mxu0 %v8962_v51  ;;  %5933 = vmatprep.subr.bf16.mxu1 %v8963_v12  ;;  %v8973_v51 = vld [vmem:[#allocation70_spill] sm:$0xff]  ;;  %v8974_v12 = vld [vmem:[#allocation71_spill] sm:$0xff] }
 0x9fb   :  { %5871 = vmatpush1.bf16.msra.mxu0 %v8964_v2  ;;  %5935 = vmatpush1.bf16.msra.mxu1 %v8965_v40  ;;  %v8975_v2 = vld [vmem:[#allocation72_spill] sm:$0xff]  ;;  %v8976_v40 = vld [vmem:[#allocation73_spill] sm:$0xff] }
 0x9fc   :  { %5873 = vmatprep.subr.bf16.mxu0 %v8966_v19  ;;  %5937 = vmatprep.subr.bf16.mxu1 %v8967_v4  ;;  %v8977_v19 = vld [vmem:[#allocation74_spill] sm:$0xff]  ;;  %v8978_v4 = vld [vmem:[#allocation75_spill] sm:$0xff] }
 0x9ff   :  { %5875 = vmatpush1.bf16.msra.mxu0 %v8968_v1  ;;  %5939 = vmatpush1.bf16.msra.mxu1 %v8969_v28  ;;  %v8979_v1 = vld [vmem:[#allocation76_spill] sm:$0xff]  ;;  %v8980_v28 = vld [vmem:[#allocation77_spill] sm:$0xff] }
 0xa00   :  { %5877 = vmatprep.subr.bf16.mxu0 %v8970_v35  ;;  %5941 = vmatprep.subr.bf16.mxu1 %v8971_v52  ;;  %v8981_v35 = vld [vmem:[#allocation78_spill] sm:$0xff]  ;;  %v8982_v52 = vld [vmem:[#allocation79_spill] sm:$0xff] }
 0xa03   :  { %5879 = vmatpush1.bf16.msra.mxu0 %v8972_v16  ;;  %5943 = vmatpush1.bf16.msra.mxu1 %v8973_v51  ;;  %v8983_v16 = vld [vmem:[#allocation80_spill] sm:$0xff]  ;;  %v8984_v51 = vld [vmem:[#allocation81_spill] sm:$0xff] }
 0xa04   :  { %5881 = vmatprep.subr.bf16.mxu0 %v8974_v12  ;;  %5945 = vmatprep.subr.bf16.mxu1 %v8975_v2  ;;  %v8985_v12 = vld [vmem:[#allocation82_spill] sm:$0xff]  ;;  %v8986_v2 = vld [vmem:[#allocation83_spill] sm:$0xff] }
 0xa07   :  { %5883 = vmatpush1.bf16.msra.mxu0 %v8976_v40  ;;  %5947 = vmatpush1.bf16.msra.mxu1 %v8977_v19  ;;  %v8987_v40 = vld [vmem:[#allocation84_spill] sm:$0xff]  ;;  %v8988_v19 = vld [vmem:[#allocation85_spill] sm:$0xff] }
 0xa08   :  { %5885 = vmatprep.subr.bf16.mxu0 %v8978_v4  ;;  %5949 = vmatprep.subr.bf16.mxu1 %v8979_v1  ;;  %v8989_v4 = vld [vmem:[#allocation86_spill] sm:$0xff]  ;;  %v8990_v1 = vld [vmem:[#allocation87_spill] sm:$0xff] }
 0xa0b   :  { %5887 = vmatpush1.bf16.msra.mxu0 %v8980_v28  ;;  %5951 = vmatpush1.bf16.msra.mxu1 %v8981_v35  ;;  %v8991_v28 = vld [vmem:[#allocation88_spill] sm:$0xff]  ;;  %v8992_v35 = vld [vmem:[#allocation89_spill] sm:$0xff] }
 0xa0c   :  { %5889 = vmatprep.subr.bf16.mxu0 %v8982_v52  ;;  %5953 = vmatprep.subr.bf16.mxu1 %v8983_v16  ;;  %v8993_v52 = vld [vmem:[#allocation90_spill] sm:$0xff]  ;;  %v8994_v16 = vld [vmem:[#allocation91_spill] sm:$0xff] }
 0xa0f   :  { %5891 = vmatpush1.bf16.msra.mxu0 %v8984_v51  ;;  %5955 = vmatpush1.bf16.msra.mxu1 %v8985_v12  ;;  %v8995_v51 = vld [vmem:[#allocation92_spill] sm:$0xff]  ;;  %v8996_v12 = vld [vmem:[#allocation93_spill] sm:$0xff] }
 0xa10   :  { %5893 = vmatprep.subr.bf16.mxu0 %v8986_v2  ;;  %5957 = vmatprep.subr.bf16.mxu1 %v8987_v40  ;;  %v8997_v2 = vld [vmem:[#allocation94_spill] sm:$0xff]  ;;  %v8998_v40 = vld [vmem:[#allocation95_spill] sm:$0xff] }
 0xa13   :  { %5895 = vmatpush1.bf16.msra.mxu0 %v8988_v19  ;;  %5959 = vmatpush1.bf16.msra.mxu1 %v8989_v4  ;;  %v8999_v19 = vld [vmem:[#allocation96_spill] sm:$0xff]  ;;  %v9000_v4 = vld [vmem:[#allocation97_spill] sm:$0xff] }
 0xa14   :  { %5897 = vmatprep.subr.bf16.mxu0 %v8990_v1  ;;  %5961 = vmatprep.subr.bf16.mxu1 %v8991_v28  ;;  %v9001_v1 = vld [vmem:[#allocation98_spill] sm:$0xff]  ;;  %v9002_v28 = vld [vmem:[#allocation99_spill] sm:$0xff] }
 0xa17   :  { %5899 = vmatpush1.bf16.msra.mxu0 %v8992_v35  ;;  %5963 = vmatpush1.bf16.msra.mxu1 %v8993_v52  ;;  %v9003_v35 = vld [vmem:[#allocation100_spill] sm:$0xff]  ;;  %v9004_v52 = vld [vmem:[#allocation101_spill] sm:$0xff] }
 0xa18   :  { %5901 = vmatprep.subr.bf16.mxu0 %v8994_v16  ;;  %5965 = vmatprep.subr.bf16.mxu1 %v8995_v51  ;;  %v9005_v16 = vld [vmem:[#allocation102_spill] sm:$0xff]  ;;  %v9006_v51 = vld [vmem:[#allocation43_spill] sm:$0xff] }
 0xa1b   :  { %5903 = vmatpush1.bf16.msra.mxu0 %v8996_v12  ;;  %5967 = vmatpush1.bf16.msra.mxu1 %v8997_v2  ;;  %v9007_v12 = vld [vmem:[#allocation44_spill] sm:$0xff] }
 0xa1c   :  { %5905 = vmatprep.subr.bf16.mxu0 %v8998_v40  ;;  %5969 = vmatprep.subr.bf16.mxu1 %v8999_v19 }
 0xa1f   :  { %5907 = vmatpush1.bf16.msra.mxu0 %v9000_v4  ;;  %5971 = vmatpush1.bf16.msra.mxu1 %v9001_v1 }
 0xa20   :  { %5909 = vmatprep.subr.bf16.mxu0 %v9002_v28  ;;  %5973 = vmatprep.subr.bf16.mxu1 %v9003_v35 }
 0xa23   :  { %5911 = vmatpush1.bf16.msra.mxu0 %v9004_v52  ;;  %5975 = vmatpush1.bf16.msra.mxu1 %v9005_v16  ;;  %v9009_v16 = vld [vmem:[#allocation38_spill] sm:$0xff] }
 0xa24   :  { %5977 = vmatprep.subr.bf16.mxu0 %v9006_v51  ;;  %6009 = vmatprep.subr.bf16.mxu1 %v9007_v12 }
 0xa99   :  { %v2779_v2 = vpop.f32.mrb[26].mxu0  ;;  %v2850_v40 = vpop.f32.mrb[26].mxu1 }
 0xa9a   :  { %v2780_v19 = vadd.f32 %v2779_v2, %v9008_v26  ;;  %v2781_v49 = vpop.f32.mrb[27].mxu0  ;;  %v2852_v4 = vpop.f32.mrb[27].mxu1  ;;  %v2851_v22 = vadd.f32 %v2850_v40, %v9009_v16 }
 0xa9b   :  { %v2782_v1 = vadd.f32 %v2781_v49, %v8821_v34  ;;  %v2853_v52 = vadd.f32 %v2852_v4, %v8946_v0 }
 0xa9c   :  { %v4229_v8 = vmul.f32 -1.442695, %v2780_v19 }
 0xa9d   :  { %v4230_v28 = vmul.f32 -1.442695, %v2782_v1  ;;  %v4231_v35 = vmul.f32 -1.442695, %v2853_v52 }
 0xa9e   :  { %6557 = vpow2.f32 %v4229_v8 }
 0xa9f   :  { %6559 = vpow2.f32 %v4230_v28  ;;  %v9010_v28 = vld [vmem:[#allocation42_spill] sm:$0xff] }
 0xaa0   :  { %6561 = vpow2.f32 %v4231_v35 }
 0xaa1   :  { %6563 = vtanh.f32 %v2851_v22 }
 0xaa8   :  { %v6558_v51 = vpop.eup %6557 }
 0xaa9   :  { %v6560_v54 = vpop.eup %6559  ;;  %v2861_v12 = vadd.f32 1.0, %v6558_v51 }
 0xaaa   :  { %v2862_v9 = vadd.f32 1.0, %v6560_v54  ;;  %v6562_v2 = vpop.eup %6561 }
 0xaab   :  { %6565 = vrcp.f32 %v2861_v12  ;;  %v6564_v26 = vpop.eup %6563  ;;  %v2870_v8 = vadd.f32 1.0, %v6562_v2 }
 0xaac   :  { %6567 = vrcp.f32 %v2862_v9  ;;  %v9012_v9 = vld [vmem:[#allocation41_spill] sm:$0xff] }
 0xaad   :  { %6569 = vrcp.f32 %v2870_v8 }
 0xab5   :  { %v6566_v49 = vpop.eup %6565 }
 0xab6   :  { %v6568_v19 = vpop.eup %6567  ;;  %v2875_v1 = vmul.f32 %v6566_v49, %v6564_v26 }
 0xab7   :  { %v2874_v34 = vmul.f32 %v6568_v19, %v9010_v28  ;;  %v6570_v49 = vpop.eup %6569 }
 0xab9   :  { %v8120_v4 = vadd.f32 %v2875_v1, %v2874_v34  ;;  %v2945_v52 = vpop.f32.mrb[28].mxu0  ;;  %v3016_v40 = vpop.f32.mrb[28].mxu1 }
 0xaba   :  { %v3025_v16 = vrot.slane %v2945_v52, 3  ;;  %v2947_v51 = vpop.f32.mrb[29].mxu0  ;;  %v3018_v35 = vpop.f32.mrb[29].mxu1  ;;  %v3027_v19 = vrot.slane %v3016_v40, 3 }
 0xabb   :  { %9011 = vst [vmem:[#allocation48_spill] sm:$0xff] %v8120_v4  ;;  %v3026_v22 = vrot.slane %v2947_v51, 3  ;;  %6571 = vtanh.f32 %v8120_v4  ;;  %v3028_v2 = vrot.slane %v3018_v35, 3 }
 0xabc   :  { %v3033_v54 = vadd.f32 %v3025_v16, %v9012_v9  ;;  %v3035_v52 = vadd.f32 %v3027_v19, %v7215_v59 }
 0xabd   :  { %v3034_v12 = vadd.f32 %v3026_v22, %v8762_v57  ;;  %v3036_v34 = vadd.f32 %v3028_v2, %v7217_v62  ;;  %v3057_v2 = vrot.slane %v8014_v46, 7  ;;  %v9013_v46 = vld [vmem:[#allocation50_spill] sm:$0xff] }
 0xabe   :  { %v4232_v0 = vmul.f32 -1.442695, %v3033_v54 }
 0xabf   :  { %v4233_v26 = vmul.f32 -1.442695, %v3034_v12  ;;  %v4234_v28 = vmul.f32 -1.442695, %v3036_v34 }
 0xac0   :  { %6573 = vpow2.f32 %v4232_v0 }
 0xac1   :  { %6575 = vpow2.f32 %v4233_v26 }
 0xac2   :  { %6577 = vpow2.f32 %v4234_v28 }
 0xac3   :  { %6579 = vtanh.f32 %v3035_v52  ;;  %v9014_v52 = vld [vmem:[#allocation47_spill] sm:$0xff] }
 0xac5   :  { %v6572_v1 = vpop.eup %6571 }
 0xac6   :  { %v2878_v8 = vmul.f32 %v6572_v1, %v6570_v49 }
 0xac8   :  { %v3065_v51 = vrot.slane %v2878_v8, 3  ;;  %v3959_v4 = vrot.slane %v2878_v8, 4 }
 0xaca   :  { %v6574_v16 = vpop.eup %6573  ;;  %v3068_v9 = vrot.slane %v3065_v51, 5  ;;  %v8128_v22 = vsel %vm3974_vm4, %v8011_v61, %v3959_v4  ;;  %v9015_v51 = vld [vmem:[#allocation52_spill] sm:$0xff] }
 0xacb   :  { %v6576_v35 = vpop.eup %6575  ;;  %v3043_v0 = vadd.f32 1.0, %v6574_v16  ;;  %v9016_v16 = vld [vmem:[#allocation49_spill] sm:$0xff] }
 0xacc   :  { %v3044_v54 = vadd.f32 1.0, %v6576_v35  ;;  %3135 = vmatprep.mubr.f32.mxu0 %v3068_v9  ;;  %3206 = vmatprep.mubr.f32.mxu1 %v3068_v9  ;;  %v6578_v40 = vpop.eup %6577  ;;  %v9017_v35 = vld [vmem:[#allocation54_spill] sm:$0xff] }
 0xacd   :  { %6581 = vrcp.f32 %v3043_v0  ;;  %v6580_v12 = vpop.eup %6579  ;;  %v3052_v19 = vadd.f32 1.0, %v6578_v40  ;;  %v9018_v0 = vld [vmem:[#allocation51_spill] sm:$0xff]  ;;  %v9020_v40 = vld [vmem:[#allocation53_spill] sm:$0xff] }
 0xace   :  { %6583 = vrcp.f32 %v3044_v54  ;;  %v9019_v54 = vld [vmem:[#allocation56_spill] sm:$0xff] }
 0xacf   :  { %6585 = vrcp.f32 %v3052_v19  ;;  %v9026_v19 = vld [vmem:[#allocation61_spill] sm:$0xff] }
 0xad7   :  { %v6582_v26 = vpop.eup %6581 }
 0xad8   :  { %v6584_v34 = vpop.eup %6583  ;;  %v3060_v49 = vmul.f32 %v6582_v26, %v6580_v12  ;;  %v9021_v12 = vld [vmem:[#allocation57_spill] sm:$0xff]  ;;  %v9022_v26 = vld [vmem:[#allocation55_spill] sm:$0xff] }
 0xad9   :  { %v3059_v1 = vmul.f32 %v6584_v34, %v3057_v2  ;;  %v6586_v4 = vpop.eup %6585  ;;  %v9023_v2 = vld [vmem:[#allocation58_spill] sm:$0xff]  ;;  %v9024_v34 = vld [vmem:[#allocation59_spill] sm:$0xff] }
 0xadb   :  { %v8131_v61 = vadd.f32 %v3060_v49, %v3059_v1  ;;  %v9025_v49 = vld [vmem:[#allocation60_spill] sm:$0xff]  ;;  %v9027_v1 = vld [vmem:[#allocation62_spill] sm:$0xff] }
 0xadd   :  { %6587 = vtanh.f32 %v8131_v61 }
 0xae7   :  { %v6588_v8 = vpop.eup %6587 }
 0xae8   :  { %v3063_v28 = vmul.f32 %v6588_v8, %v6586_v4  ;;  %v9028_v4 = vld [vmem:[#allocation63_spill] sm:$0xff]  ;;  %v9029_v8 = vld [vmem:[#allocation64_spill] sm:$0xff] }
 0xaea   :  { %v3067_v9 = vrot.slane %v3063_v28, 5  ;;  %v9030_v28 = vld [vmem:[#allocation65_spill] sm:$0xff] }
 0xaec   :  { %3136 = vmatmul.mubr.f32.vlgmr.msra.gmra.mrb[30].mxu0 %v3067_v9  ;;  %3207 = vmatmul.mubr.f32.vlgmr.msra.gmra.mrb[30].mxu1 %v3067_v9 }
 0xaed   :  { %5979 = vmatpush1.bf16.msra.mxu0 %v7230_v14  ;;  %6011 = vmatpush1.bf16.msra.mxu1 %v7243_v31 }
 0xaee   :  { %5981 = vmatprep.subr.bf16.mxu0 %v7232_v17  ;;  %6013 = vmatprep.subr.bf16.mxu1 %v7253_v39 }
 0xaef   :  { %3301 = vmatprep.mubr.f32.mxu0 %v8646_v37  ;;  %3372 = vmatprep.mubr.f32.mxu1 %v8646_v37 }
 0xaf1   :  { %5983 = vmatpush1.bf16.msra.mxu0 %v7236_v7  ;;  %6015 = vmatpush1.bf16.msra.mxu1 %v7255_v43 }
 0xaf2   :  { %5985 = vmatprep.subr.bf16.mxu0 %v7239_v23  ;;  %6017 = vmatprep.subr.bf16.mxu1 %v7261_v55 }
 0xaf5   :  { %5987 = vmatpush1.bf16.msra.mxu0 %v7246_v32  ;;  %6019 = vmatpush1.bf16.msra.mxu1 %v7267_v58 }
 0xaf6   :  { %5989 = vmatprep.subr.bf16.mxu0 %v7250_v36  ;;  %6021 = vmatprep.subr.bf16.mxu1 %v7270_v5 }
 0xaf9   :  { %5991 = vmatpush1.bf16.msra.mxu0 %v7259_v48  ;;  %6023 = vmatpush1.bf16.msra.mxu1 %v7279_v21 }
 0xafa   :  { %5993 = vmatprep.subr.bf16.mxu0 %v7264_v56  ;;  %6025 = vmatprep.subr.bf16.mxu1 %v7282_v24 }
 0xafd   :  { %5995 = vmatpush1.bf16.msra.mxu0 %v7273_v10  ;;  %6027 = vmatpush1.bf16.msra.mxu1 %v7291_v38 }
 0xafe   :  { %5997 = vmatprep.subr.bf16.mxu0 %v7276_v18  ;;  %6029 = vmatprep.subr.bf16.mxu1 %v7294_v41 }
 0xb01   :  { %5999 = vmatpush1.bf16.msra.mxu0 %v7285_v30  ;;  %6031 = vmatpush1.bf16.msra.mxu1 %v7303_v60 }
 0xb02   :  { %6001 = vmatprep.subr.bf16.mxu0 %v7288_v33  ;;  %6033 = vmatprep.subr.bf16.mxu1 %v7306_v3 }
 0xb05   :  { %6003 = vmatpush1.bf16.msra.mxu0 %v7297_v47  ;;  %6035 = vmatpush1.bf16.msra.mxu1 %v7313_v15 }
 0xb06   :  { %6005 = vmatprep.subr.bf16.mxu0 %v7300_v50  ;;  %6037 = vmatprep.subr.bf16.mxu1 %v7318_v29 }
 0xb09   :  { %6007 = vmatpush1.bf16.msra.mxu0 %v7309_v20  ;;  %6039 = vmatpush1.bf16.msra.mxu1 %v7324_v45 }
 0xb0a   :  { %6041 = vmatprep.subr.bf16.mxu0 %v7315_v25  ;;  %6105 = vmatprep.subr.bf16.mxu1 %v7330_v6 }
 0xb0c   :  { %3302 = vmatmul.mubr.f32.vlgmr.msra.gmra.mrb[32].mxu0 %v3067_v9  ;;  %3373 = vmatmul.mubr.f32.vlgmr.msra.gmra.mrb[32].mxu1 %v3067_v9  ;;  %v9031_v9 = vld [vmem:[#allocation66_spill] sm:$0xff] }
 0xb0d   :  { %6043 = vmatpush1.bf16.msra.mxu0 %v7321_v44  ;;  %6107 = vmatpush1.bf16.msra.mxu1 %v7338_v27 }
 0xb0e   :  { %6045 = vmatprep.subr.bf16.mxu0 %v7327_v53  ;;  %6109 = vmatprep.subr.bf16.mxu1 %v7344_v42 }
 0xb11   :  { %6047 = vmatpush1.bf16.msra.mxu0 %v8699_v63  ;;  %6111 = vmatpush1.bf16.msra.mxu1 %v8949_v13 }
 0xb12   :  { %6049 = vmatprep.subr.bf16.mxu0 %v8950_v11  ;;  %6113 = vmatprep.subr.bf16.mxu1 %v9013_v46 }
 0xb15   :  { %6051 = vmatpush1.bf16.msra.mxu0 %v9014_v52  ;;  %6115 = vmatpush1.bf16.msra.mxu1 %v9015_v51 }
 0xb16   :  { %6053 = vmatprep.subr.bf16.mxu0 %v9016_v16  ;;  %6117 = vmatprep.subr.bf16.mxu1 %v9017_v35 }
 0xb19   :  { %6055 = vmatpush1.bf16.msra.mxu0 %v9018_v0  ;;  %6119 = vmatpush1.bf16.msra.mxu1 %v9019_v54  ;;  %v9071_v0 = vld [vmem:[#allocation39_spill] sm:$0xff] }
 0xb1a   :  { %6057 = vmatprep.subr.bf16.mxu0 %v9020_v40  ;;  %6121 = vmatprep.subr.bf16.mxu1 %v9021_v12  ;;  %v9032_v12 = vld [vmem:[#allocation67_spill] sm:$0xff]  ;;  %v9070_v40 = vld [vmem:[#allocation45_spill] sm:$0xff] }
 0xb1d   :  { %6059 = vmatpush1.bf16.msra.mxu0 %v9022_v26  ;;  %6123 = vmatpush1.bf16.msra.mxu1 %v9023_v2  ;;  %v9033_v26 = vld [vmem:[#allocation68_spill] sm:$0xff]  ;;  %v9034_v2 = vld [vmem:[#allocation69_spill] sm:$0xff] }
 0xb1e   :  { %6061 = vmatprep.subr.bf16.mxu0 %v9024_v34  ;;  %6125 = vmatprep.subr.bf16.mxu1 %v9025_v49  ;;  %v9035_v34 = vld [vmem:[#allocation70_spill] sm:$0xff]  ;;  %v9036_v49 = vld [vmem:[#allocation71_spill] sm:$0xff] }
 0xb21   :  { %6063 = vmatpush1.bf16.msra.mxu0 %v9026_v19  ;;  %6127 = vmatpush1.bf16.msra.mxu1 %v9027_v1  ;;  %v9037_v19 = vld [vmem:[#allocation72_spill] sm:$0xff]  ;;  %v9038_v1 = vld [vmem:[#allocation73_spill] sm:$0xff] }
 0xb22   :  { %6065 = vmatprep.subr.bf16.mxu0 %v9028_v4  ;;  %6129 = vmatprep.subr.bf16.mxu1 %v9029_v8  ;;  %v9039_v4 = vld [vmem:[#allocation74_spill] sm:$0xff]  ;;  %v9040_v8 = vld [vmem:[#allocation75_spill] sm:$0xff] }
 0xb25   :  { %6067 = vmatpush1.bf16.msra.mxu0 %v9030_v28  ;;  %6131 = vmatpush1.bf16.msra.mxu1 %v9031_v9  ;;  %v9041_v28 = vld [vmem:[#allocation76_spill] sm:$0xff]  ;;  %v9042_v9 = vld [vmem:[#allocation77_spill] sm:$0xff] }
 0xb26   :  { %6069 = vmatprep.subr.bf16.mxu0 %v9032_v12  ;;  %6133 = vmatprep.subr.bf16.mxu1 %v9033_v26  ;;  %v9043_v12 = vld [vmem:[#allocation78_spill] sm:$0xff]  ;;  %v9044_v26 = vld [vmem:[#allocation79_spill] sm:$0xff] }
 0xb29   :  { %6071 = vmatpush1.bf16.msra.mxu0 %v9034_v2  ;;  %6135 = vmatpush1.bf16.msra.mxu1 %v9035_v34  ;;  %v9045_v2 = vld [vmem:[#allocation80_spill] sm:$0xff]  ;;  %v9046_v34 = vld [vmem:[#allocation81_spill] sm:$0xff] }
 0xb2a   :  { %6073 = vmatprep.subr.bf16.mxu0 %v9036_v49  ;;  %6137 = vmatprep.subr.bf16.mxu1 %v9037_v19  ;;  %v9047_v49 = vld [vmem:[#allocation82_spill] sm:$0xff]  ;;  %v9048_v19 = vld [vmem:[#allocation83_spill] sm:$0xff] }
 0xb2d   :  { %6075 = vmatpush1.bf16.msra.mxu0 %v9038_v1  ;;  %6139 = vmatpush1.bf16.msra.mxu1 %v9039_v4  ;;  %v9049_v1 = vld [vmem:[#allocation84_spill] sm:$0xff]  ;;  %v9050_v4 = vld [vmem:[#allocation85_spill] sm:$0xff] }
 0xb2e   :  { %6077 = vmatprep.subr.bf16.mxu0 %v9040_v8  ;;  %6141 = vmatprep.subr.bf16.mxu1 %v9041_v28  ;;  %v9051_v8 = vld [vmem:[#allocation86_spill] sm:$0xff]  ;;  %v9052_v28 = vld [vmem:[#allocation87_spill] sm:$0xff] }
 0xb31   :  { %6079 = vmatpush1.bf16.msra.mxu0 %v9042_v9  ;;  %6143 = vmatpush1.bf16.msra.mxu1 %v9043_v12  ;;  %v9053_v9 = vld [vmem:[#allocation88_spill] sm:$0xff]  ;;  %v9054_v12 = vld [vmem:[#allocation89_spill] sm:$0xff] }
 0xb32   :  { %6081 = vmatprep.subr.bf16.mxu0 %v9044_v26  ;;  %6145 = vmatprep.subr.bf16.mxu1 %v9045_v2  ;;  %v9055_v26 = vld [vmem:[#allocation90_spill] sm:$0xff]  ;;  %v9056_v2 = vld [vmem:[#allocation91_spill] sm:$0xff] }
 0xb35   :  { %6083 = vmatpush1.bf16.msra.mxu0 %v9046_v34  ;;  %6147 = vmatpush1.bf16.msra.mxu1 %v9047_v49  ;;  %v9057_v34 = vld [vmem:[#allocation92_spill] sm:$0xff]  ;;  %v9058_v49 = vld [vmem:[#allocation93_spill] sm:$0xff] }
 0xb36   :  { %6085 = vmatprep.subr.bf16.mxu0 %v9048_v19  ;;  %6149 = vmatprep.subr.bf16.mxu1 %v9049_v1  ;;  %v9059_v19 = vld [vmem:[#allocation94_spill] sm:$0xff]  ;;  %v9060_v1 = vld [vmem:[#allocation95_spill] sm:$0xff] }
 0xb39   :  { %6087 = vmatpush1.bf16.msra.mxu0 %v9050_v4  ;;  %6151 = vmatpush1.bf16.msra.mxu1 %v9051_v8  ;;  %v9061_v4 = vld [vmem:[#allocation96_spill] sm:$0xff]  ;;  %v9062_v8 = vld [vmem:[#allocation97_spill] sm:$0xff] }
 0xb3a   :  { %6089 = vmatprep.subr.bf16.mxu0 %v9052_v28  ;;  %6153 = vmatprep.subr.bf16.mxu1 %v9053_v9  ;;  %v9063_v28 = vld [vmem:[#allocation98_spill] sm:$0xff]  ;;  %v9064_v9 = vld [vmem:[#allocation99_spill] sm:$0xff] }
 0xb3d   :  { %6091 = vmatpush1.bf16.msra.mxu0 %v9054_v12  ;;  %6155 = vmatpush1.bf16.msra.mxu1 %v9055_v26  ;;  %v9065_v12 = vld [vmem:[#allocation100_spill] sm:$0xff]  ;;  %v9066_v26 = vld [vmem:[#allocation101_spill] sm:$0xff] }
 0xb3e   :  { %6093 = vmatprep.subr.bf16.mxu0 %v9056_v2  ;;  %6157 = vmatprep.subr.bf16.mxu1 %v9057_v34  ;;  %v9067_v2 = vld [vmem:[#allocation102_spill] sm:$0xff]  ;;  %v9068_v34 = vld [vmem:[#allocation43_spill] sm:$0xff] }
 0xb41   :  { %6095 = vmatpush1.bf16.msra.mxu0 %v9058_v49  ;;  %6159 = vmatpush1.bf16.msra.mxu1 %v9059_v19  ;;  %v9069_v49 = vld [vmem:[#allocation44_spill] sm:$0xff] }
 0xb42   :  { %6097 = vmatprep.subr.bf16.mxu0 %v9060_v1  ;;  %6161 = vmatprep.subr.bf16.mxu1 %v9061_v4 }
 0xb45   :  { %6099 = vmatpush1.bf16.msra.mxu0 %v9062_v8  ;;  %6163 = vmatpush1.bf16.msra.mxu1 %v9063_v28 }
 0xb46   :  { %6101 = vmatprep.subr.bf16.mxu0 %v9064_v9  ;;  %6165 = vmatprep.subr.bf16.mxu1 %v9065_v12  ;;  %v9072_v12 = vld [vmem:[#allocation37_spill] sm:$0xff] }
 0xb49   :  { %6103 = vmatpush1.bf16.msra.mxu0 %v9066_v26  ;;  %6167 = vmatpush1.bf16.msra.mxu1 %v9067_v2  ;;  %v9073_v2 = vld [vmem:[#allocation38_spill] sm:$0xff] }
 0xb4a   :  { %6169 = vmatprep.subr.bf16.mxu0 %v9068_v34  ;;  %6201 = vmatprep.subr.bf16.mxu1 %v9069_v49 }
 0xbbf   :  { %v3137_v19 = vpop.f32.mrb[30].mxu0  ;;  %v3208_v1 = vpop.f32.mrb[30].mxu1 }
 0xbc0   :  { %v3138_v4 = vadd.f32 %v3137_v19, %v9070_v40  ;;  %v3139_v54 = vpop.f32.mrb[31].mxu0  ;;  %v3210_v8 = vpop.f32.mrb[31].mxu1  ;;  %v3209_v51 = vadd.f32 %v3208_v1, %v9073_v2 }
 0xbc1   :  { %v3140_v28 = vadd.f32 %v3139_v54, %v9071_v0  ;;  %v3211_v26 = vadd.f32 %v3210_v8, %v9072_v12 }
 0xbc2   :  { %v4235_v35 = vmul.f32 -1.442695, %v3138_v4 }
 0xbc3   :  { %v4236_v9 = vmul.f32 -1.442695, %v3140_v28  ;;  %v4237_v16 = vmul.f32 -1.442695, %v3211_v26 }
 0xbc4   :  { %6589 = vpow2.f32 %v4235_v35 }
 0xbc5   :  { %6591 = vpow2.f32 %v4236_v9  ;;  %v9074_v9 = vld [vmem:[#allocation48_spill] sm:$0xff] }
 0xbc6   :  { %6593 = vpow2.f32 %v4237_v16 }
 0xbc7   :  { %6595 = vtanh.f32 %v3209_v51 }
 0xbce   :  { %v6590_v34 = vpop.eup %6589 }
 0xbcf   :  { %v6592_v52 = vpop.eup %6591  ;;  %v3219_v49 = vadd.f32 1.0, %v6590_v34 }
 0xbd0   :  { %v3220_v46 = vadd.f32 1.0, %v6592_v52  ;;  %v6594_v19 = vpop.eup %6593 }
 0xbd1   :  { %6597 = vrcp.f32 %v3219_v49  ;;  %v6596_v40 = vpop.eup %6595  ;;  %v3228_v35 = vadd.f32 1.0, %v6594_v19 }
 0xbd2   :  { %6599 = vrcp.f32 %v3220_v46  ;;  %v9076_v46 = vld [vmem:[#allocation41_spill] sm:$0xff] }
 0xbd3   :  { %6601 = vrcp.f32 %v3228_v35 }
 0xbdb   :  { %v6598_v54 = vpop.eup %6597 }
 0xbdc   :  { %v6600_v4 = vpop.eup %6599  ;;  %v3233_v28 = vmul.f32 %v6598_v54, %v6596_v40 }
 0xbdd   :  { %v3232_v0 = vmul.f32 %v6600_v4, %v9074_v9  ;;  %v6602_v54 = vpop.eup %6601 }
 0xbdf   :  { %v8237_v8 = vadd.f32 %v3233_v28, %v3232_v0  ;;  %v3303_v26 = vpop.f32.mrb[32].mxu0  ;;  %v3374_v1 = vpop.f32.mrb[32].mxu1 }
 0xbe0   :  { %v3383_v2 = vrot.slane %v3303_v26, 2  ;;  %v3305_v34 = vpop.f32.mrb[33].mxu0  ;;  %v3376_v16 = vpop.f32.mrb[33].mxu1  ;;  %v3385_v4 = vrot.slane %v3374_v1, 2 }
 0xbe1   :  { %9075 = vst [vmem:[#allocation46_spill] sm:$0xff] %v8237_v8  ;;  %v3384_v51 = vrot.slane %v3305_v34, 2  ;;  %6603 = vtanh.f32 %v8237_v8  ;;  %v3386_v19 = vrot.slane %v3376_v16, 2 }
 0xbe2   :  { %v3391_v52 = vadd.f32 %v3383_v2, %v9076_v46  ;;  %v3393_v26 = vadd.f32 %v3385_v4, %v7215_v59 }
 0xbe3   :  { %v3392_v49 = vadd.f32 %v3384_v51, %v8762_v57  ;;  %v3394_v0 = vadd.f32 %v3386_v19, %v7217_v62  ;;  %v3415_v19 = vrot.slane %v8131_v61, 7  ;;  %v9116_v61 = vld [vmem:[#allocation87_spill] sm:$0xff] }
 0xbe4   :  { %v4238_v12 = vmul.f32 -1.442695, %v3391_v52 }
 0xbe5   :  { %v4239_v40 = vmul.f32 -1.442695, %v3392_v49  ;;  %v4240_v9 = vmul.f32 -1.442695, %v3394_v0 }
 0xbe6   :  { %6605 = vpow2.f32 %v4238_v12 }
 0xbe7   :  { %6607 = vpow2.f32 %v4239_v40 }
 0xbe8   :  { %6609 = vpow2.f32 %v4240_v9 }
 0xbe9   :  { %6611 = vtanh.f32 %v3393_v26  ;;  %v9117_v26 = vld [vmem:[#allocation88_spill] sm:$0xff] }
 0xbeb   :  { %v6604_v28 = vpop.eup %6603 }
 0xbec   :  { %v3236_v35 = vmul.f32 %v6604_v28, %v6602_v54 }
 0xbee   :  { %v3423_v34 = vrot.slane %v3236_v35, 2  ;;  %v3961_v8 = vrot.slane %v3236_v35, 3 }
 0xbf0   :  { %v6606_v2 = vpop.eup %6605  ;;  %v3426_v46 = vrot.slane %v3423_v34, 6  ;;  %v8245_v51 = vsel %vm3976_vm5, %v8128_v22, %v3961_v8  ;;  %v9118_v34 = vld [vmem:[#allocation89_spill] sm:$0xff] }
 0xbf1   :  { %v6608_v16 = vpop.eup %6607  ;;  %v3401_v12 = vadd.f32 1.0, %v6606_v2  ;;  %v9119_v2 = vld [vmem:[#allocation90_spill] sm:$0xff] }
 0xbf2   :  { %v3402_v52 = vadd.f32 1.0, %v6608_v16  ;;  %3493 = vmatprep.mubr.f32.mxu0 %v3426_v46  ;;  %3564 = vmatprep.mubr.f32.mxu1 %v3426_v46  ;;  %v6610_v1 = vpop.eup %6609  ;;  %v9120_v16 = vld [vmem:[#allocation91_spill] sm:$0xff] }
 0xbf3   :  { %6613 = vrcp.f32 %v3401_v12  ;;  %v6612_v49 = vpop.eup %6611  ;;  %v3410_v4 = vadd.f32 1.0, %v6610_v1  ;;  %v9121_v12 = vld [vmem:[#allocation92_spill] sm:$0xff]  ;;  %v9123_v1 = vld [vmem:[#allocation94_spill] sm:$0xff] }
 0xbf4   :  { %6615 = vrcp.f32 %v3402_v52  ;;  %v9122_v52 = vld [vmem:[#allocation93_spill] sm:$0xff] }
 0xbf5   :  { %6617 = vrcp.f32 %v3410_v4  ;;  %v9129_v4 = vld [vmem:[#allocation100_spill] sm:$0xff] }
 0xbfd   :  { %v6614_v40 = vpop.eup %6613 }
 0xbfe   :  { %v6616_v0 = vpop.eup %6615  ;;  %v3418_v54 = vmul.f32 %v6614_v40, %v6612_v49  ;;  %v9124_v49 = vld [vmem:[#allocation95_spill] sm:$0xff]  ;;  %v9125_v40 = vld [vmem:[#allocation96_spill] sm:$0xff] }
 0xbff   :  { %v3417_v28 = vmul.f32 %v6616_v0, %v3415_v19  ;;  %v6618_v8 = vpop.eup %6617  ;;  %v9126_v19 = vld [vmem:[#allocation97_spill] sm:$0xff]  ;;  %v9127_v0 = vld [vmem:[#allocation98_spill] sm:$0xff] }
 0xc01   :  { %v8248_v22 = vadd.f32 %v3418_v54, %v3417_v28  ;;  %v9128_v54 = vld [vmem:[#allocation99_spill] sm:$0xff]  ;;  %v9130_v28 = vld [vmem:[#allocation101_spill] sm:$0xff] }
 0xc03   :  { %6619 = vtanh.f32 %v8248_v22 }
 0xc0d   :  { %v6620_v35 = vpop.eup %6619 }
 0xc0e   :  { %v3421_v9 = vmul.f32 %v6620_v35, %v6618_v8  ;;  %v9131_v8 = vld [vmem:[#allocation102_spill] sm:$0xff]  ;;  %v9132_v35 = vmov 0.0|0.0  }
 0xc10   :  { %v3425_v46 = vrot.slane %v3421_v9, 6 }
 0xc12   :  { %3494 = vmatmul.mubr.f32.vlgmr.msra.gmra.mrb[34].mxu0 %v3425_v46  ;;  %3565 = vmatmul.mubr.f32.vlgmr.msra.gmra.mrb[34].mxu1 %v3425_v46 }
 0xc13   :  { %6171 = vmatpush1.bf16.msra.mxu0 %v7230_v14  ;;  %6203 = vmatpush1.bf16.msra.mxu1 %v7243_v31  ;;  %v9077_v14 = vld [vmem:[#allocation50_spill] sm:$0xff] }
 0xc14   :  { %6173 = vmatprep.subr.bf16.mxu0 %v7232_v17  ;;  %6205 = vmatprep.subr.bf16.mxu1 %v7253_v39  ;;  %v9078_v17 = vld [vmem:[#allocation47_spill] sm:$0xff]  ;;  %v9081_v31 = vld [vmem:[#allocation54_spill] sm:$0xff]  ;;  %v9084_v39 = vld [vmem:[#allocation53_spill] sm:$0xff] }
 0xc15   :  { %3659 = vmatprep.mubr.f32.mxu0 %v8646_v37  ;;  %3730 = vmatprep.mubr.f32.mxu1 %v8646_v37 }
 0xc17   :  { %6175 = vmatpush1.bf16.msra.mxu0 %v7236_v7  ;;  %6207 = vmatpush1.bf16.msra.mxu1 %v7255_v43  ;;  %v9079_v7 = vld [vmem:[#allocation52_spill] sm:$0xff]  ;;  %v9085_v43 = vld [vmem:[#allocation57_spill] sm:$0xff] }
 0xc18   :  { %6177 = vmatprep.subr.bf16.mxu0 %v7239_v23  ;;  %6209 = vmatprep.subr.bf16.mxu1 %v7261_v55  ;;  %v9080_v23 = vld [vmem:[#allocation49_spill] sm:$0xff]  ;;  %v9087_v55 = vld [vmem:[#allocation58_spill] sm:$0xff] }
 0xc1b   :  { %6179 = vmatpush1.bf16.msra.mxu0 %v7246_v32  ;;  %6211 = vmatpush1.bf16.msra.mxu1 %v7267_v58  ;;  %v9082_v32 = vld [vmem:[#allocation51_spill] sm:$0xff]  ;;  %v9089_v58 = vld [vmem:[#allocation60_spill] sm:$0xff] }
 0xc1c   :  { %6181 = vmatprep.subr.bf16.mxu0 %v7250_v36  ;;  %6213 = vmatprep.subr.bf16.mxu1 %v7270_v5  ;;  %v9083_v36 = vld [vmem:[#allocation56_spill] sm:$0xff]  ;;  %v9090_v5 = vld [vmem:[#allocation61_spill] sm:$0xff] }
 0xc1f   :  { %6183 = vmatpush1.bf16.msra.mxu0 %v7259_v48  ;;  %6215 = vmatpush1.bf16.msra.mxu1 %v7279_v21  ;;  %v9086_v48 = vld [vmem:[#allocation55_spill] sm:$0xff]  ;;  %v9093_v21 = vld [vmem:[#allocation64_spill] sm:$0xff] }
 0xc20   :  { %6185 = vmatprep.subr.bf16.mxu0 %v7264_v56  ;;  %6217 = vmatprep.subr.bf16.mxu1 %v7282_v24  ;;  %v9088_v56 = vld [vmem:[#allocation59_spill] sm:$0xff]  ;;  %v9094_v24 = vld [vmem:[#allocation65_spill] sm:$0xff] }
 0xc23   :  { %6187 = vmatpush1.bf16.msra.mxu0 %v7273_v10  ;;  %6219 = vmatpush1.bf16.msra.mxu1 %v7291_v38  ;;  %v9091_v10 = vld [vmem:[#allocation62_spill] sm:$0xff]  ;;  %v9097_v38 = vld [vmem:[#allocation68_spill] sm:$0xff] }
 0xc24   :  { %6189 = vmatprep.subr.bf16.mxu0 %v7276_v18  ;;  %6221 = vmatprep.subr.bf16.mxu1 %v7294_v41  ;;  %v9092_v18 = vld [vmem:[#allocation63_spill] sm:$0xff]  ;;  %v9098_v41 = vld [vmem:[#allocation69_spill] sm:$0xff] }
 0xc27   :  { %6191 = vmatpush1.bf16.msra.mxu0 %v7285_v30  ;;  %6223 = vmatpush1.bf16.msra.mxu1 %v7303_v60  ;;  %v9095_v30 = vld [vmem:[#allocation66_spill] sm:$0xff]  ;;  %v9101_v60 = vld [vmem:[#allocation72_spill] sm:$0xff] }
 0xc28   :  { %6193 = vmatprep.subr.bf16.mxu0 %v7288_v33  ;;  %6225 = vmatprep.subr.bf16.mxu1 %v7306_v3  ;;  %v9096_v33 = vld [vmem:[#allocation67_spill] sm:$0xff]  ;;  %v9102_v3 = vld [vmem:[#allocation73_spill] sm:$0xff] }
 0xc2b   :  { %6195 = vmatpush1.bf16.msra.mxu0 %v7297_v47  ;;  %6227 = vmatpush1.bf16.msra.mxu1 %v7313_v15  ;;  %v9099_v47 = vld [vmem:[#allocation70_spill] sm:$0xff]  ;;  %v9104_v15 = vld [vmem:[#allocation75_spill] sm:$0xff] }
 0xc2c   :  { %6197 = vmatprep.subr.bf16.mxu0 %v7300_v50  ;;  %6229 = vmatprep.subr.bf16.mxu1 %v7318_v29  ;;  %v9100_v50 = vld [vmem:[#allocation71_spill] sm:$0xff]  ;;  %v9106_v29 = vld [vmem:[#allocation77_spill] sm:$0xff] }
 0xc2f   :  { %6199 = vmatpush1.bf16.msra.mxu0 %v7309_v20  ;;  %6231 = vmatpush1.bf16.msra.mxu1 %v7324_v45  ;;  %v9103_v20 = vld [vmem:[#allocation74_spill] sm:$0xff]  ;;  %v9108_v45 = vld [vmem:[#allocation79_spill] sm:$0xff] }
 0xc30   :  { %6233 = vmatprep.subr.bf16.mxu0 %v7315_v25  ;;  %6297 = vmatprep.subr.bf16.mxu1 %v7330_v6  ;;  %v9105_v25 = vld [vmem:[#allocation76_spill] sm:$0xff]  ;;  %v9110_v6 = vld [vmem:[#allocation81_spill] sm:$0xff] }
 0xc32   :  { %3660 = vmatmul.mubr.f32.vlgmr.msra.gmra.mrb[36].mxu0 %v3425_v46  ;;  %3731 = vmatmul.mubr.f32.vlgmr.msra.gmra.mrb[36].mxu1 %v3425_v46 }
 0xc33   :  { %6235 = vmatpush1.bf16.msra.mxu0 %v7321_v44  ;;  %6299 = vmatpush1.bf16.msra.mxu1 %v7338_v27  ;;  %v9107_v44 = vld [vmem:[#allocation78_spill] sm:$0xff] }
 0xc34   :  { %6237 = vmatprep.subr.bf16.mxu0 %v7327_v53  ;;  %6301 = vmatprep.subr.bf16.mxu1 %v7344_v42  ;;  %v9109_v53 = vld [vmem:[#allocation80_spill] sm:$0xff]  ;;  %v9111_v27 = vld [vmem:[#allocation82_spill] sm:$0xff]  ;;  %v9112_v42 = vld [vmem:[#allocation83_spill] sm:$0xff] }
 0xc37   :  { %6239 = vmatpush1.bf16.msra.mxu0 %v8699_v63  ;;  %6303 = vmatpush1.bf16.msra.mxu1 %v8949_v13  ;;  %v9113_v63 = vld [vmem:[#allocation84_spill] sm:$0xff]  ;;  %v9114_v13 = vld [vmem:[#allocation85_spill] sm:$0xff] }
 0xc38   :  { %6241 = vmatprep.subr.bf16.mxu0 %v8950_v11  ;;  %6305 = vmatprep.subr.bf16.mxu1 %v9077_v14  ;;  %v9115_v11 = vld [vmem:[#allocation86_spill] sm:$0xff]  ;;  %v9133_v14 = vld [vmem:[#allocation45_spill] sm:$0xff] }
 0xc3b   :  { %6243 = vmatpush1.bf16.msra.mxu0 %v9078_v17  ;;  %6307 = vmatpush1.bf16.msra.mxu1 %v9079_v7 }
 0xc3c   :  { %6245 = vmatprep.subr.bf16.mxu0 %v9080_v23  ;;  %6309 = vmatprep.subr.bf16.mxu1 %v9081_v31  ;;  %v9134_v31 = vld [vmem:[#allocation39_spill] sm:$0xff] }
 0xc3f   :  { %6247 = vmatpush1.bf16.msra.mxu0 %v9082_v32  ;;  %6311 = vmatpush1.bf16.msra.mxu1 %v9083_v36 }
 0xc40   :  { %6249 = vmatprep.subr.bf16.mxu0 %v9084_v39  ;;  %6313 = vmatprep.subr.bf16.mxu1 %v9085_v43  ;;  %v9135_v43 = vld [vmem:[#allocation37_spill] sm:$0xff] }
 0xc43   :  { %6251 = vmatpush1.bf16.msra.mxu0 %v9086_v48  ;;  %6315 = vmatpush1.bf16.msra.mxu1 %v9087_v55 }
 0xc44   :  { %6253 = vmatprep.subr.bf16.mxu0 %v9088_v56  ;;  %6317 = vmatprep.subr.bf16.mxu1 %v9089_v58  ;;  %v9136_v56 = vld [vmem:[#allocation38_spill] sm:$0xff] }
 0xc47   :  { %6255 = vmatpush1.bf16.msra.mxu0 %v9090_v5  ;;  %6319 = vmatpush1.bf16.msra.mxu1 %v9091_v10 }
 0xc48   :  { %6257 = vmatprep.subr.bf16.mxu0 %v9092_v18  ;;  %6321 = vmatprep.subr.bf16.mxu1 %v9093_v21 }
 0xc4b   :  { %6259 = vmatpush1.bf16.msra.mxu0 %v9094_v24  ;;  %6323 = vmatpush1.bf16.msra.mxu1 %v9095_v30 }
 0xc4c   :  { %6261 = vmatprep.subr.bf16.mxu0 %v9096_v33  ;;  %6325 = vmatprep.subr.bf16.mxu1 %v9097_v38 }
 0xc4f   :  { %6263 = vmatpush1.bf16.msra.mxu0 %v9098_v41  ;;  %6327 = vmatpush1.bf16.msra.mxu1 %v9099_v47 }
 0xc50   :  { %6265 = vmatprep.subr.bf16.mxu0 %v9100_v50  ;;  %6329 = vmatprep.subr.bf16.mxu1 %v9101_v60  ;;  %v9137_v50 = vld [vmem:[#allocation46_spill] sm:$0xff] }
 0xc53   :  { %6267 = vmatpush1.bf16.msra.mxu0 %v9102_v3  ;;  %6331 = vmatpush1.bf16.msra.mxu1 %v9103_v20 }
 0xc54   :  { %6269 = vmatprep.subr.bf16.mxu0 %v9104_v15  ;;  %6333 = vmatprep.subr.bf16.mxu1 %v9105_v25 }
 0xc57   :  { %6271 = vmatpush1.bf16.msra.mxu0 %v9106_v29  ;;  %6335 = vmatpush1.bf16.msra.mxu1 %v9107_v44 }
 0xc58   :  { %6273 = vmatprep.subr.bf16.mxu0 %v9108_v45  ;;  %6337 = vmatprep.subr.bf16.mxu1 %v9109_v53  ;;  %v9138_v53 = vld [vmem:[#allocation41_spill] sm:$0xff] }
 0xc5b   :  { %6275 = vmatpush1.bf16.msra.mxu0 %v9110_v6  ;;  %6339 = vmatpush1.bf16.msra.mxu1 %v9111_v27 }
 0xc5c   :  { %6277 = vmatprep.subr.bf16.mxu0 %v9112_v42  ;;  %6341 = vmatprep.subr.bf16.mxu1 %v9113_v63 }
 0xc5f   :  { %6279 = vmatpush1.bf16.msra.mxu0 %v9114_v13  ;;  %6343 = vmatpush1.bf16.msra.mxu1 %v9115_v11 }
 0xc60   :  { %6281 = vmatprep.subr.bf16.mxu0 %v9116_v61  ;;  %6345 = vmatprep.subr.bf16.mxu1 %v9117_v26 }
 0xc63   :  { %6283 = vmatpush1.bf16.msra.mxu0 %v9118_v34  ;;  %6347 = vmatpush1.bf16.msra.mxu1 %v9119_v2 }
 0xc64   :  { %6285 = vmatprep.subr.bf16.mxu0 %v9120_v16  ;;  %6349 = vmatprep.subr.bf16.mxu1 %v9121_v12 }
 0xc67   :  { %6287 = vmatpush1.bf16.msra.mxu0 %v9122_v52  ;;  %6351 = vmatpush1.bf16.msra.mxu1 %v9123_v1 }
 0xc68   :  { %6289 = vmatprep.subr.bf16.mxu0 %v9124_v49  ;;  %6353 = vmatprep.subr.bf16.mxu1 %v9125_v40 }
 0xc6b   :  { %6291 = vmatpush1.bf16.msra.mxu0 %v9126_v19  ;;  %6355 = vmatpush1.bf16.msra.mxu1 %v9127_v0 }
 0xc6c   :  { %6293 = vmatprep.subr.bf16.mxu0 %v9128_v54  ;;  %6357 = vmatprep.subr.bf16.mxu1 %v9129_v4 }
 0xc6f   :  { %6295 = vmatpush1.bf16.msra.mxu0 %v9130_v28  ;;  %6359 = vmatpush1.bf16.msra.mxu1 %v9131_v8 }
 0xc70   :  { %6360 = vmatprep.subr.bf16.mxu0 %v9132_v35 }
 0xce5   :  { %v3495_v9 = vpop.f32.mrb[34].mxu0  ;;  %v3566_v46 = vpop.f32.mrb[34].mxu1 }
 0xce6   :  { %v3496_v17 = vadd.f32 %v3495_v9, %v9133_v14  ;;  %v3497_v7 = vpop.f32.mrb[35].mxu0  ;;  %v3568_v23 = vpop.f32.mrb[35].mxu1  ;;  %v3567_v58 = vadd.f32 %v3566_v46, %v9136_v56 }
 0xce7   :  { %v3498_v32 = vadd.f32 %v3497_v7, %v9134_v31  ;;  %v3569_v48 = vadd.f32 %v3568_v23, %v9135_v43 }
 0xce8   :  { %v4241_v36 = vmul.f32 -1.442695, %v3496_v17 }
 0xce9   :  { %v4242_v39 = vmul.f32 -1.442695, %v3498_v32  ;;  %v4243_v55 = vmul.f32 -1.442695, %v3569_v48 }
 0xcea   :  { %6621 = vpow2.f32 %v4241_v36 }
 0xceb   :  { %6623 = vpow2.f32 %v4242_v39  ;;  %v3983_v39 = vld [vmem:[#allocation8 + $0x88] sm:$0xff] }
 0xcec   :  { %6625 = vpow2.f32 %v4243_v55  ;;  %v3984_v55 = vld [vmem:[#allocation8 + $0x90] sm:$0xff] }
 0xced   :  { %6627 = vtanh.f32 %v3567_v58  ;;  %v3985_v58 = vld [vmem:[#allocation8 + $0x98] sm:$0xff] }
 0xcf4   :  { %v6622_v5 = vpop.eup %6621 }
 0xcf5   :  { %v6624_v10 = vpop.eup %6623  ;;  %v3577_v18 = vadd.f32 1.0, %v6622_v5  ;;  %v6364_v5 = vpack.c.bf16 %v3985_v58, %v3984_v55 }
 0xcf6   :  { %v3578_v21 = vadd.f32 1.0, %v6624_v10  ;;  %v6626_v24 = vpop.eup %6625  ;;  %v3986_v10 = vld [vmem:[#allocation8 + $0xa0] sm:$0xff] }
 0xcf7   :  { %6629 = vrcp.f32 %v3577_v18  ;;  %v6628_v30 = vpop.eup %6627  ;;  %v3586_v47 = vadd.f32 1.0, %v6626_v24  ;;  %v3987_v18 = vld [vmem:[#allocation8 + $0xa8] sm:$0xff]  ;;  %v3988_v24 = vld [vmem:[#allocation8 + $0xb0] sm:$0xff] }
 0xcf8   :  { %6631 = vrcp.f32 %v3578_v21  ;;  %v6367_v21 = vpack.c.bf16 %v3987_v18, %v3986_v10 }
 0xcf9   :  { %6633 = vrcp.f32 %v3586_v47  ;;  %v3992_v47 = vld [vmem:[#allocation8 + $0xd0] sm:$0xff] }
 0xd01   :  { %v6630_v33 = vpop.eup %6629 }
 0xd02   :  { %v6632_v38 = vpop.eup %6631  ;;  %v3591_v41 = vmul.f32 %v6630_v33, %v6628_v30  ;;  %v3990_v33 = vld [vmem:[#allocation8 + $0xc0] sm:$0xff] }
 0xd03   :  { %v3590_v60 = vmul.f32 %v6632_v38, %v9137_v50  ;;  %v6634_v61 = vpop.eup %6633  ;;  %v3991_v38 = vld [vmem:[#allocation8 + $0xc8] sm:$0xff]  ;;  %v3993_v50 = vld [vmem:[#allocation8 + $0xd8] sm:$0xff] }
 0xd05   :  { %v8353_v3 = vadd.f32 %v3591_v41, %v3590_v60  ;;  %v3661_v20 = vpop.f32.mrb[36].mxu0  ;;  %v3732_v15 = vpop.f32.mrb[36].mxu1  ;;  %v6373_v41 = vpack.c.bf16 %v3991_v38, %v3990_v33  ;;  %v6376_v60 = vpack.c.bf16 %v3993_v50, %v3992_v47 }
 0xd06   :  { %v3741_v25 = vrot.slane %v3661_v20, 1  ;;  %v3663_v29 = vpop.f32.mrb[37].mxu0  ;;  %v3734_v44 = vpop.f32.mrb[37].mxu1  ;;  %v3743_v26 = vrot.slane %v3732_v15, 1  ;;  %v3994_v20 = vld [vmem:[#allocation8 + $0xe0] sm:$0xff]  ;;  %v3995_v15 = vld [vmem:[#allocation8 + $0xe8] sm:$0xff] }
 0xd07   :  { %v3742_v45 = vrot.slane %v3663_v29, 1  ;;  %6635 = vtanh.f32 %v8353_v3  ;;  %v3744_v13 = vrot.slane %v3734_v44, 1  ;;  %v3996_v29 = vld [vmem:[#allocation8 + $0xf0] sm:$0xff]  ;;  %v3997_v44 = vld [vmem:[#allocation8 + $0xf8] sm:$0xff] }
 0xd08   :  { %v3749_v6 = vadd.f32 %v3741_v25, %v9138_v53  ;;  %v3751_v12 = vadd.f32 %v3743_v26, %v7215_v59  ;;  %v3773_v59 = vrot.slane %v8248_v22, 7  ;;  %v3982_v22 = vld [vmem:[#allocation8 + $0x80] sm:$0xff]  ;;  %v6379_v25 = vpack.c.bf16 %v3995_v15, %v3994_v20 }
 0xd09   :  { %v3750_v27 = vadd.f32 %v3742_v45, %v8762_v57  ;;  %v3752_v11 = vadd.f32 %v3744_v13, %v7217_v62  ;;  %v6361_v48 = vpack.c.bf16 %v3983_v39, %v3982_v22  ;;  %v6382_v45 = vpack.c.bf16 %v3997_v44, %v3996_v29  ;;  %v4069_v53 = vld [vmem:[%s8467_s1] sm:$0xff]  ;;  %s6969_s1 = smov [#allocation14]  }
 0xd0a   :  { %v4244_v42 = vmul.f32 -1.442695, %v3749_v6  ;;  %v6968_v6 = vmov 0   ;;  %s4119_s30 = sshll.u32 %s6969_s1, 4  ;;  %s4120_s30 = int_to_ptr.vmem [resolvable:$true] %s4119_s30 }
 0xd0b   :  { %v4245_v63 = vmul.f32 -1.442695, %v3750_v27  ;;  %v4246_v16 = vmul.f32 -1.442695, %v3752_v11  ;;  %6412 = vset.pattern.permute.xlu0 %v6968_v6  ;;  %v4076_v27 = vsub.f32 1.0, %v4069_v53  ;;  %s6803_s3 = scalar_lea.vmem %s4120_s30, 128  ;;  %p6808_p7 = scmp.lt.s32.totalorder %s4120_s30, %s4120_s30 }
 0xd0c   :  { %6637 = vpow2.f32 %v4244_v42  ;;  %4072 = vperm.xlu0 %6412, %v4069_v53   ;;  %p6804_p6 = scmp.ne.s32.totalorder %s4120_s30, %s6803_s3  ;;  %p6809_p8 = scmp.lt.s32.totalorder %s6803_s3, %s6803_s3 }
 0xd0d   :  { %6639 = vpow2.f32 %v4245_v63 }
 0xd0e   :  { %6641 = vpow2.f32 %v4246_v16  ;;  %p6810_p9 = por %p6809_p8, %p6808_p7 }
 0xd0f   :  { %6643 = vtanh.f32 %v3751_v12 }
 0xd10   :  { %4079 = vperm.xlu0 %6412, %v4076_v27   ;;  %p6811_p10 = pnand %p6810_p9, %p6804_p6 }
 0xd11   :  { %v6636_v34 = vpop.eup %6635 }
 0xd12   :  { %v3594_v2 = vmul.f32 %v6636_v34, %v6634_v61 }
 0xd14   :  { %v3781_v52 = vrot.slane %v3594_v2, 1  ;;  %v3963_v1 = vrot.slane %v3594_v2, 2 }
 0xd16   :  { %v6638_v49 = vpop.eup %6637  ;;  %v3784_v40 = vrot.slane %v3781_v52, 7  ;;  %v8361_v57 = vsel %vm3978_vm6, %v8245_v51, %v3963_v1 }
 0xd17   :  { %v6640_v19 = vpop.eup %6639  ;;  %v3759_v0 = vadd.f32 1.0, %v6638_v49 }
 0xd18   :  { %v3760_v62 = vadd.f32 1.0, %v6640_v19  ;;  %3851 = vmatprep.mubr.f32.mxu0 %v3784_v40  ;;  %3922 = vmatprep.mubr.f32.mxu1 %v3784_v40  ;;  %v6642_v54 = vpop.eup %6641 }
 0xd19   :  { %6645 = vrcp.f32 %v3759_v0  ;;  %v6644_v4 = vpop.eup %6643  ;;  %v3768_v46 = vadd.f32 1.0, %v6642_v54 }
 0xd1a   :  { %6647 = vrcp.f32 %v3760_v62 }
 0xd1b   :  { %6649 = vrcp.f32 %v3768_v46 }
 0xd23   :  { %v6646_v28 = vpop.eup %6645 }
 0xd24   :  { %v6648_v8 = vpop.eup %6647  ;;  %v3776_v9 = vmul.f32 %v6646_v28, %v6644_v4 }
 0xd25   :  { %v3775_v17 = vmul.f32 %v6648_v8, %v3773_v59  ;;  %v6650_v7 = vpop.eup %6649 }
 0xd27   :  { %v8364_v51 = vadd.f32 %v3776_v9, %v3775_v17 }
 0xd29   :  { %6651 = vtanh.f32 %v8364_v51 }
 0xd33   :  { %v6652_v23 = vpop.eup %6651 }
 0xd34   :  { %v3779_v32 = vmul.f32 %v6652_v23, %v6650_v7 }
 0xd36   :  { %v8367_v36 = vrot.slane %v3779_v32, 7 }
 0xd38   :  { %3852 = vmatmul.mubr.f32.vlgmr.msra.gmra.mrb[38].mxu0 %v8367_v36  ;;  %3923 = vmatmul.mubr.f32.vlgmr.msra.gmra.mrb[38].mxu1 %v8367_v36 }
 0xd39   :  { %4613 = vmatprep.mubr.msk.f32.mxu0 %vm6964_vm0, %v8646_v37  ;;  %6362 = vmatpush3.bf16.msra.mxu0 %v6361_v48  ;;  %v3989_v37 = vld [vmem:[#allocation8 + $0xb8] sm:$0xff] }
 0xd3a   :  { %6363 = vmatprep.subr.bf16.mxu0 %v9132_v35  ;;  %v6370_v30 = vpack.c.bf16 %v3989_v37, %v3988_v24 }
 0xd3d   :  { %6365 = vmatpush3.bf16.msra.mxu0 %v6364_v5 }
 0xd3e   :  { %6366 = vmatprep.subr.bf16.mxu0 %v9132_v35 }
 0xd41   :  { %6368 = vmatpush3.bf16.msra.mxu0 %v6367_v21 }
 0xd42   :  { %6369 = vmatprep.subr.bf16.mxu0 %v9132_v35 }
 0xd45   :  { %6371 = vmatpush3.bf16.msra.mxu0 %v6370_v30 }
 0xd46   :  { %6372 = vmatprep.subr.bf16.mxu0 %v9132_v35 }
 0xd49   :  { %6374 = vmatpush3.bf16.msra.mxu0 %v6373_v41 }
 0xd4a   :  { %6375 = vmatprep.subr.bf16.mxu0 %v9132_v35 }
 0xd4d   :  { %6377 = vmatpush3.bf16.msra.mxu0 %v6376_v60 }
 0xd4e   :  { %6378 = vmatprep.subr.bf16.mxu0 %v9132_v35 }
 0xd51   :  { %6380 = vmatpush3.bf16.msra.mxu0 %v6379_v25 }
 0xd52   :  { %6381 = vmatprep.subr.bf16.mxu0 %v9132_v35 }
 0xd55   :  { %6383 = vmatpush3.bf16.msra.mxu0 %v6382_v45 }
 0xe0b   :  { %v3853_v42 = vpop.f32.mrb[38].mxu0  ;;  %v3924_v63 = vpop.f32.mrb[38].mxu1 }
 0xe0c   :  { %v3854_v13 = vadd.f32 %v3853_v42, %v9133_v14  ;;  %v3855_v11 = vpop.f32.mrb[39].mxu0  ;;  %v3926_v61 = vpop.f32.mrb[39].mxu1  ;;  %v3925_v12 = vadd.f32 %v3924_v63, %v9136_v56  ;;  %v4096_v56 = vrot.slane %v8364_v51, 7 }
 0xe0d   :  { %v3856_v26 = vadd.f32 %v3855_v11, %v9134_v31  ;;  %v3927_v2 = vadd.f32 %v3926_v61, %v9135_v43 }
 0xe0e   :  { %v4247_v34 = vmul.f32 -1.442695, %v3854_v13 }
 0xe0f   :  { %v4248_v35 = vmul.f32 -1.442695, %v3856_v26  ;;  %v4249_v16 = vmul.f32 -1.442695, %v3927_v2 }
 0xe10   :  { %6653 = vpow2.f32 %v4247_v34 }
 0xe11   :  { %6655 = vpow2.f32 %v4248_v35 }
 0xe12   :  { %6657 = vpow2.f32 %v4249_v16 }
 0xe13   :  { %6659 = vtanh.f32 %v3925_v12 }
 0xe1a   :  { %v6654_v52 = vpop.eup %6653 }
 0xe1b   :  { %v6656_v1 = vpop.eup %6655  ;;  %v3935_v49 = vadd.f32 1.0, %v6654_v52 }
 0xe1c   :  { %v3936_v40 = vadd.f32 1.0, %v6656_v1  ;;  %v6658_v14 = vpop.eup %6657 }
 0xe1d   :  { %6661 = vrcp.f32 %v3935_v49  ;;  %v6660_v19 = vpop.eup %6659  ;;  %v3944_v54 = vadd.f32 1.0, %v6658_v14 }
 0xe1e   :  { %6663 = vrcp.f32 %v3936_v40 }
 0xe1f   :  { %6665 = vrcp.f32 %v3944_v54 }
 0xe27   :  { %v6662_v31 = vpop.eup %6661 }
 0xe28   :  { %v6664_v0 = vpop.eup %6663  ;;  %v3949_v62 = vmul.f32 %v6662_v31, %v6660_v19 }
 0xe29   :  { %v3948_v4 = vmul.f32 %v6664_v0, %v8353_v3  ;;  %v6666_v8 = vpop.eup %6665 }
 0xe2b   :  { %v3950_v43 = vadd.f32 %v3949_v62, %v3948_v4 }
 0xe2d   :  { %6667 = vtanh.f32 %v3950_v43  ;;  %v4099_v28 = vrot.slane %v3950_v43, 7 }
 0xe2f   :  { %v4101_v59 = vsel %vm3968_vm1, %v4096_v56, %v4099_v28 }
 0xe30   :  { %4102 = vst [vmem:[#allocation20] sm:$0x3] %v4101_v59 }
 0xe37   :  { %v6668_v9 = vpop.eup %6667 }
 0xe38   :  { %v3952_v46 = vmul.f32 %v6668_v9, %v6666_v8 }
 0xe3a   :  { %v3966_v17 = vrot.slane %v3952_v46, 1  ;;  %v4091_v7 = vrot.slane %v3952_v46, 7 }
 0xe3c   :  { %v3981_v23 = vsel %vm3980_vm7, %v8361_v57, %v3966_v17  ;;  %v4093_v3 = vsel %vm3968_vm1, %v8367_v36, %v4091_v7 }
 0xe3d   :  { %4614 = vmatmul.mubr.f32.vlgmr.msra.gmra.mrb[40].mxu0 %v3981_v23  ;;  %4094 = vst [vmem:[#allocation19] sm:$0x3] %v4093_v3 }
 0xe3e   :  { %6814 = shalt.err (!%p6811_p10)
}
 0xe3f   :  { %s6815_s17 = scalar_lea.hbm %s8475_s9, 128 }
 0xe40   :  { %p6816_p11 = scmp.ne.s32.totalorder %s8475_s9, %s6815_s17  ;;  %p6819_p12 = scmp.lt.u32.totalorder %s6815_s17, %s8475_s9 }
 0xe42   :  { %p6821_p13 = pnand %p6819_p12, %p6816_p11 }
 0xe44   :  { %6824 = shalt.err (!%p6821_p13)
}
 0xe45   :  { %4122 = dma.vmem_to_hbm [thread:$0]  %s4120_s30, 128, %s8475_s9, [#allocation15]  }
 0xe46   :  { %s6825_s19 = scalar_lea.vmem %s4140_s15, 16  ;;  %s6829_s5 = scalar_lea.vmem %s4140_s15, 32 }
 0xe47   :  { %p6826_p0 = scmp.ne.s32.totalorder %s4140_s15, %s6825_s19  ;;  %p6830_p1 = scmp.lt.s32.totalorder %s4140_s15, %s4140_s15 }
 0xe48   :  { %p6831_p2 = scmp.lt.s32.totalorder %s6829_s5, %s6825_s19 }
 0xe4a   :  { %p6832_p3 = por %p6831_p2, %p6830_p1 }
 0xe4c   :  { %p6833_p4 = pnand %p6832_p3, %p6826_p0 }
 0xe4e   :  { %6836 = shalt.err (!%p6833_p4)
}
 0xe4f   :  { %s6837_s28 = scalar_lea.hbm %s8477_s11, 16 }
 0xe50   :  { %p6838_p5 = scmp.ne.s32.totalorder %s8477_s11, %s6837_s28  ;;  %p6841_p6 = scmp.lt.u32.totalorder %s6837_s28, %s8477_s11 }
 0xe52   :  { %p6843_p7 = pnand %p6841_p6, %p6838_p5 }
 0xe54   :  { %6846 = shalt.err (!%p6843_p7)
}
 0xe55   :  { %4142 = dma.vmem_to_hbm [thread:$0]  %s4140_s15, 16, %s8477_s11, [#allocation18]  }
 0xe56   :  { %s6971_s23 = smov [#allocation16]  }
 0xe57   :  { %s4129_s1 = sshll.u32 %s6971_s23, 4  ;;  %s4130_s1 = int_to_ptr.vmem [resolvable:$true] %s4129_s1 }
 0xe58   :  { %s6847_s30 = scalar_lea.vmem %s4130_s1, 16  ;;  %s6851_s14 = scalar_lea.vmem %s4130_s1, 32 }
 0xe59   :  { %p6848_p8 = scmp.ne.s32.totalorder %s4130_s1, %s6847_s30  ;;  %p6852_p9 = scmp.lt.s32.totalorder %s4130_s1, %s4130_s1 }
 0xe5a   :  { %p6853_p10 = scmp.lt.s32.totalorder %s6851_s14, %s6847_s30 }
 0xe5c   :  { %p6854_p11 = por %p6853_p10, %p6852_p9 }
 0xe5e   :  { %p6855_p12 = pnand %p6854_p11, %p6848_p8 }
 0xe60   :  { %6858 = shalt.err (!%p6855_p12)
}
 0xe61   :  { %s6859_s16 = scalar_lea.hbm %s8476_s10, 16 }
 0xe62   :  { %p6860_p13 = scmp.ne.s32.totalorder %s8476_s10, %s6859_s16  ;;  %p6863_p0 = scmp.lt.u32.totalorder %s6859_s16, %s8476_s10 }
 0xe64   :  { %p6865_p1 = pnand %p6863_p0, %p6860_p13 }
 0xe66   :  { %6868 = shalt.err (!%p6865_p1)
}
 0xe67   :  { %4132 = dma.vmem_to_hbm [thread:$0]  %s4130_s1, 16, %s8476_s10, [#allocation15]  }
 0xe68   :  { %s6972_s22 = smov [#allocation19]   ;;  %s6973_s4 = smov [#allocation20]  }
 0xe69   :  { %s4149_s24 = sshll.u32 %s6972_s22, 4  ;;  %s4159_s19 = sshll.u32 %s6973_s4, 4  ;;  %s4150_s24 = int_to_ptr.vmem [resolvable:$true] %s4149_s24  ;;  %s4160_s19 = int_to_ptr.vmem [resolvable:$true] %s4159_s19 }
 0xe6a   :  { %s6869_s5 = scalar_lea.vmem %s4150_s24, 32  ;;  %p6874_p3 = scmp.lt.s32.totalorder %s4150_s24, %s4150_s24 }
 0xe6b   :  { %p6870_p2 = scmp.ne.s32.totalorder %s4150_s24, %s6869_s5  ;;  %p6875_p4 = scmp.lt.s32.totalorder %s6869_s5, %s6869_s5 }
 0xe6d   :  { %p6876_p5 = por %p6875_p4, %p6874_p3 }
 0xe6f   :  { %p6877_p6 = pnand %p6876_p5, %p6870_p2 }
 0xe71   :  { %6880 = shalt.err (!%p6877_p6)
}
 0xe72   :  { %s6881_s28 = scalar_lea.hbm %s8478_s12, 32 }
 0xe73   :  { %p6882_p7 = scmp.ne.s32.totalorder %s8478_s12, %s6881_s28  ;;  %p6885_p8 = scmp.lt.u32.totalorder %s6881_s28, %s8478_s12 }
 0xe75   :  { %p6887_p9 = pnand %p6885_p8, %p6882_p7 }
 0xe77   :  { %6890 = shalt.err (!%p6887_p9)
}
 0xe78   :  { %4152 = dma.vmem_to_hbm [thread:$0]  %s4150_s24, 32, %s8478_s12, [#allocation18]  }
 0xe79   :  { %s6891_s7 = scalar_lea.vmem %s4160_s19, 32  ;;  %p6896_p11 = scmp.lt.s32.totalorder %s4160_s19, %s4160_s19 }
 0xe7a   :  { %p6892_p10 = scmp.ne.s32.totalorder %s4160_s19, %s6891_s7  ;;  %p6897_p12 = scmp.lt.s32.totalorder %s6891_s7, %s6891_s7 }
 0xe7c   :  { %p6898_p13 = por %p6897_p12, %p6896_p11 }
 0xe7e   :  { %p6899_p0 = pnand %p6898_p13, %p6892_p10 }
 0xe80   :  { %6902 = shalt.err (!%p6899_p0)
}
 0xe81   :  { %s6903_s30 = scalar_lea.hbm %s8479_s13, 32 }
 0xe82   :  { %p6904_p1 = scmp.ne.s32.totalorder %s8479_s13, %s6903_s30  ;;  %p6907_p2 = scmp.lt.u32.totalorder %s6903_s30, %s8479_s13 }
 0xe84   :  { %p6909_p3 = pnand %p6907_p2, %p6904_p1 }
 0xe86   :  { %6912 = shalt.err (!%p6909_p3)
}
 0xe87   :  { %4162 = dma.vmem_to_hbm [thread:$0]  %s4160_s19, 32, %s8479_s13, [#allocation21]   ;;  %v4073_v57 = vpop.permute.xlu0 %4072  ;;  %v3998_v51 = vld [vmem:[#allocation11 + $0x6] ss:$0 sm:$0xff]  ;;  %v9139_v48 = vld [vmem:[#allocation40_spill] sm:$0xff] }
 0xe88   :  { %s6974_s18 = smov [#allocation13]  }
 0xe89   :  { %s4109_s11 = sshll.u32 %s6974_s18, 4  ;;  %s4110_s11 = int_to_ptr.vmem [resolvable:$true] %s4109_s11 }
 0xe8a   :  { %s6913_s15 = scalar_lea.vmem %s4110_s11, 128  ;;  %p6918_p5 = scmp.lt.s32.totalorder %s4110_s11, %s4110_s11 }
 0xe8b   :  { %v4080_v32 = vpop.permute.xlu0 %4079  ;;  %p6914_p4 = scmp.ne.s32.totalorder %s4110_s11, %s6913_s15  ;;  %p6919_p6 = scmp.lt.s32.totalorder %s6913_s15, %s6913_s15 }
 0xe8c   :  { %v4082_v55 = vmul.f32 %v9139_v48, %v4080_v32 }
 0xe8d   :  { %p6920_p7 = por %p6919_p6, %p6918_p5 }
 0xe8f   :  { %p6921_p8 = pnand %p6920_p7, %p6914_p4 }
 0xf10   :  { %v4065_v36 = vpop.f32.mrb[40].mxu0 }
 0xf11   :  { %v4066_v22 = vadd.f32 %v4065_v36, %v3998_v51  ;;  %v4615_v39 = vpop.f32.mrb[41].mxu0 }
 0xf13   :  { %v4075_v58 = vmul.f32 %v4073_v57, %v4066_v22 }
 0xf15   :  { %v4083_v5 = vadd.f32 %v4082_v55, %v4075_v58 }
 0xf17   :  { %v4084_v10 = vsub.f32 %v4083_v5, %v4083_v5 }
 0xf19   :  { %v4085_v18 = vmul.f32 1.442695, %v4084_v10 }
 0xf1b   :  { %6669 = vpow2.f32 %v4085_v18 }
 0xf25   :  { %v6670_v21 = vpop.eup %6669 }
 0xf26   :  { %4087 = vst [vmem:[#allocation13] sm:$0xff] %v6670_v21 }
 0xf27   :  { %6924 = shalt.err (!%p6921_p8)
}
 0xf28   :  { %s6925_s21 = scalar_lea.hbm %s8474_s8, 128 }
 0xf29   :  { %p6926_p9 = scmp.ne.s32.totalorder %s8474_s8, %s6925_s21  ;;  %p6929_p10 = scmp.lt.u32.totalorder %s6925_s21, %s8474_s8 }
 0xf2b   :  { %p6931_p11 = pnand %p6929_p10, %p6926_p9 }
 0xf2d   :  { %6934 = shalt.err (!%p6931_p11)
}
 0xf2e   :  { %4112 = dma.vmem_to_hbm [thread:$0]  %s4110_s11, 128, %s8474_s8, [#allocation7]  }
 0xf2f   :  { %6945 = dma.done.wait [#allocation7], 128  }
 0xf30   :  { %6946 = vsyncadd [#allocation7], 4294967168 }
 0xf31   :  { %6947 = dma.done.wait [#allocation15], 144  }
 0xf32   :  { %6948 = vsyncadd [#allocation15], 4294967152 }
 0xf33   :  { %6949 = dma.done.wait [#allocation18], 48  }
 0xf34   :  { %6950 = vsyncadd [#allocation18], 4294967248 }
 0xf35   :  { %6951 = dma.done.wait [#allocation21], 32  }
 0xf36   :  { %6952 = vsyncadd [#allocation21], 4294967264 }
 0xf37   :  { %4181 = vsyncpa [#allocation6], 1 }
 0xf38   :  { %4182 = vsyncpa [#allocation9], 1 }
 0xf39   :  { %4183 = vsyncpa [#allocation12], 1 }
 0xf3a   :  { %4184 = vsyncpa [#allocation7], 1 }
 0xf3b   :  { %4185 = vsyncpa [#allocation15], 1 }
 0xf3c   :  { %4186 = vsyncpa [#allocation18], 1 }
 0xf3d   :  { %4187 = vsyncpa [#allocation21], 1 }
 0xf3e   :  { %4188 = vsyncmov [#allocation4] }
 0xf41   :  { %s4189_s27 = vpop.sfrf %4188 }
 0xf42   :  { %p4250_p12 = scmp.ne.s32.totalorder %s4189_s27, 0 }
 0xf44   :  { %4193 = shalt.err (%p4250_p12)  }
 0xf45   :  { %4195 = vsyncmov [#allocation4 + $0x1] }
 0xf48   :  { %s4196_s8 = vpop.sfrf %4195 }
 0xf49   :  { %p4251_p13 = scmp.ne.s32.totalorder %s4196_s8, 0 }
 0xf4b   :  { %4200 = shalt.err (%p4251_p13)  }

</bundles_post_ra>
